<compile_context>
chip_gen: v6e
topology: v6e:2x2x1
jax: 0.10.0
libtpu: 0.0.40
codegen_flags: <defaults>
</compile_context>

<pallas_src>
import functools

import jax
import jax.numpy as jnp
import numpy as np
from jax import lax
from jax.experimental import pallas as pl
from jax.experimental.pallas import tpu as pltpu


def _sigmoid(t):
    # exp() runs on the EUP; the divide only touches pooled-size arrays.
    return 1.0 / (1.0 + jnp.exp(-t))


def cbam_kernel(x_ref, w1t_ref, w2_ref, b1_ref, b2_ref, wma_ref, wmm_ref,
                negpad_ref, cb_ref, o_ref, *, W, hw, padded):
    """One grid step: CBAM forward for a block of `bb` images.

    x_ref:      (bb, C, HWp) f32 VMEM  input block (pad lanes are zero)
    w1t_ref:    (C, mid)     f32 VMEM  Linear(C->mid) weight, transposed
    w2_ref:     (C, mid)     f32 VMEM  Linear(mid->C) weight (PyTorch layout)
    b1_ref:     (1, mid)     f32 VMEM  Linear(C->mid) bias row
    b2_ref:     (1, C)       f32 VMEM  Linear(mid->C) bias row
    wma_ref:    (49, HWp)    f32 VMEM  boundary-mask * conv weight (avg channel)
    wmm_ref:    (49, HWp)    f32 VMEM  boundary-mask * conv weight (max channel)
    negpad_ref: (1, HWp)     f32 VMEM  0 on valid lanes, -1e30 on pad lanes
    cb_ref:     (1,)         f32 SMEM  conv bias
    o_ref:      (bb, C, HWp) f32 VMEM  output block
    """
    x = x_ref[...]                                        # (bb, C, HWp)
    bb, C, HWp = x.shape
    inv_hw = 1.0 / float(hw)
    inv_c = 1.0 / float(C)

    # ------------------------ channel attention ------------------------
    avg_p = jnp.sum(x, axis=2) * inv_hw                   # (bb, C) lane-reduce
    if padded:
        max_p = jnp.max(x + negpad_ref[...][None], axis=2)  # exclude pad lanes
    else:
        max_p = jnp.max(x, axis=2)                        # (bb, C)
    z = jnp.concatenate([avg_p, max_p], axis=0)           # (2*bb, C)

    # Shared MLP, avg+max branches fused, exact f32 on the VPU/XLU:
    #   h = relu(z @ W1^T + b1); y = h @ W2^T; logits = y_avg + y_max + 2*b2
    w1t = w1t_ref[...]                                    # (C, mid)
    w2 = w2_ref[...]                                      # (C, mid)
    h = jnp.sum(z[:, :, None] * w1t[None], axis=1) + b1_ref[...]   # (2*bb, mid)
    h = jnp.maximum(h, 0.0)
    y = jnp.sum(h[:, None, :] * w2[None], axis=2)         # (2*bb, C)
    logits = y[:bb] + y[bb:] + 2.0 * b2_ref[...]          # (bb, C)
    ca = _sigmoid(logits)                                 # (bb, C)
    out1 = x * ca[:, :, None]                             # (bb, C, HWp)

    # ------------------------ spatial attention ------------------------
    avg_sp = jnp.sum(out1, axis=1) * inv_c                # (bb, HWp)
    max_sp = jnp.max(out1, axis=1)                        # (bb, HWp)
    zsp = jnp.concatenate([avg_sp, max_sp], axis=0)       # (2*bb, HWp) dense

    # 7x7 "same" conv over the flattened spatial axis: 49 taps, each ONE lane
    # roll (XLU) of the stacked avg/max array + two masked-weight FMAs (VPU).
    # The boundary masks guarantee masked-in outputs never read wrapped lanes
    # (or pad lanes), and the tap weights are pre-folded into the masks.
    conv = jnp.zeros((bb, HWp), jnp.float32)
    for ki in range(7):
        di = ki - 3
        for kj in range(7):
            dj = kj - 3
            d = di * W + dj
            tap = ki * 7 + kj
            shift = (-d) % HWp                            # out[p] <- in[p + d]
            r = zsp if shift == 0 else pltpu.roll(zsp, shift, 1)
            wa = wma_ref[tap:tap + 1, :]                  # (1, HWp)
            wm = wmm_ref[tap:tap + 1, :]                  # (1, HWp)
            conv = conv + wa * r[:bb] + wm * r[bb:]
    sa = _sigmoid(conv + cb_ref[0])                       # (bb, HWp)

    o_ref[...] = out1 * sa[:, None, :]                    # single fused store


def _conv_weight_masks(H, W, hwp, cw):
    """Two (49, hwp) arrays: boundary-validity mask * tap weight for the avg
    (in_ch 0) and max (in_ch 1) channels of the 7x7 'same' conv."""
    cw = np.asarray(cw, np.float32).reshape(2, 7, 7)
    hw = H * W
    r = np.arange(H)[:, None]
    c = np.arange(W)[None, :]
    wa = np.zeros((49, hwp), np.float32)
    wm = np.zeros((49, hwp), np.float32)
    for ki in range(7):
        di = ki - 3
        rv = (r + di >= 0) & (r + di < H)
        for kj in range(7):
            dj = kj - 3
            cv = (c + dj >= 0) & (c + dj < W)
            valid = np.broadcast_to(rv & cv, (H, W)).astype(np.float32).reshape(hw)
            tap = ki * 7 + kj
            wa[tap, :hw] = valid * cw[0, ki, kj]
            wm[tap, :hw] = valid * cw[1, ki, kj]
    return jnp.asarray(wa), jnp.asarray(wm)


def _device_tuning():
    """Per-generation block-size policy."""
    kind = ""
    try:
        kind = jax.devices()[0].device_kind.lower()
    except Exception:
        pass
    if ("v5" in kind or "v6" in kind) and "v7" not in kind:
        # Single TensorCore, 128 MiB VMEM: bigger blocks amortize per-step
        # overhead; raise the scoped-VMEM limit for double-buffered in/out +
        # the out1 intermediate.
        return dict(max_block_bytes=8 << 20, min_steps=4, vmem_limit_bytes=96 << 20)
    # v7x / default: 2 TensorCores share the grid, 64 MiB VMEM per core.
    return dict(max_block_bytes=4 << 20, min_steps=8, vmem_limit_bytes=None)


def _pick_batch_block(B, C, hwp, *, max_block_bytes, min_steps):
    """Images per grid step: block a few MiB, but keep >= min_steps pipelined
    grid steps so prefetch/writeback overlap compute (and both v7x cores get
    several steps each).  Prefer sublane-aligned (multiple of 8) blocks."""
    per_image = C * hwp * 4
    cap = max(1, max_block_bytes // per_image)
    cap = min(cap, B // min_steps) if B >= min_steps else 1
    cap = max(1, min(cap, B))
    divisors = [d for d in range(1, cap + 1) if B % d == 0]
    aligned = [d for d in divisors if d % 8 == 0]
    return (aligned or divisors)[-1]


def cbam_pallas(x, params, *, batch_block=None):
    W1, b1, W2, b2, cw, cb = params
    B, C, H, W = x.shape
    hw = H * W
    hwp = ((hw + 127) // 128) * 128          # lane-dense spatial axis
    padded = hwp != hw
    mid = W1.shape[0]
    assert mid >= 1, "channel // reduction must be >= 1"

    tune = _device_tuning()
    bb = batch_block if batch_block is not None else _pick_batch_block(
        B, C, hwp, max_block_bytes=tune["max_block_bytes"], min_steps=tune["min_steps"])
    assert B % bb == 0
    grid = (B // bb,)

    f32 = jnp.float32
    x2 = x.reshape(B, C, hw).astype(f32)
    if padded:
        x2 = jnp.pad(x2, ((0, 0), (0, 0), (0, hwp - hw)))
    w1t = jnp.asarray(W1, f32).T                 # (C, mid)
    w2c = jnp.asarray(W2, f32)                   # (C, mid)
    b1r = jnp.asarray(b1, f32).reshape(1, mid)
    b2r = jnp.asarray(b2, f32).reshape(1, C)
    wma, wmm = _conv_weight_masks(H, W, hwp, cw)
    negpad = np.zeros((1, hwp), np.float32)
    negpad[0, hw:] = -1e30
    negpad = jnp.asarray(negpad)
    cbv = jnp.asarray(cb, f32).reshape(1)

    kernel = functools.partial(cbam_kernel, W=W, hw=hw, padded=padded)

    cp_kwargs = dict(dimension_semantics=("parallel",))
    if tune["vmem_limit_bytes"] is not None:
        cp_kwargs["vmem_limit_bytes"] = tune["vmem_limit_bytes"]

    out = pl.pallas_call(
        kernel,
        out_shape=jax.ShapeDtypeStruct((B, C, hwp), f32),
        grid_spec=pltpu.PrefetchScalarGridSpec(
            num_scalar_prefetch=0,
            grid=grid,
            in_specs=[
                pl.BlockSpec((bb, C, hwp), lambda i: (i, 0, 0)),      # x block
                pl.BlockSpec((C, mid), lambda i: (0, 0)),             # W1^T
                pl.BlockSpec((C, mid), lambda i: (0, 0)),             # W2
                pl.BlockSpec((1, mid), lambda i: (0, 0)),             # b1 row
                pl.BlockSpec((1, C), lambda i: (0, 0)),               # b2 row
                pl.BlockSpec((49, hwp), lambda i: (0, 0)),            # mask*w (avg)
                pl.BlockSpec((49, hwp), lambda i: (0, 0)),            # mask*w (max)
                pl.BlockSpec((1, hwp), lambda i: (0, 0)),             # -inf pad row
                pl.BlockSpec(memory_space=pltpu.MemorySpace.SMEM),    # conv bias
            ],
            out_specs=pl.BlockSpec((bb, C, hwp), lambda i: (i, 0, 0)),
        ),
        compiler_params=pltpu.CompilerParams(**cp_kwargs),
    )(x2, w1t, w2c, b1r, b2r, wma, wmm, negpad, cbv)

    if padded:
        out = out[:, :, :hw]
    return out.reshape(B, C, H, W)


def cbam_ref(x, params):
    """Pure-JAX reference mirroring the PyTorch module (high precision)."""
    W1, b1, W2, b2, cw, cb = params
    avg = jnp.mean(x, axis=(2, 3))
    mx = jnp.max(x, axis=(2, 3))

    def mlp(v):
        h = jnp.maximum(v @ W1.T + b1, 0.0)
        return h @ W2.T + b2

    ca = jax.nn.sigmoid(mlp(avg) + mlp(mx))[:, :, None, None]
    out1 = x * ca

    avg_sp = jnp.mean(out1, axis=1, keepdims=True)
    max_sp = jnp.max(out1, axis=1, keepdims=True)
    cat = jnp.concatenate([avg_sp, max_sp], axis=1)
    conv = lax.conv_general_dilated(
        cat, cw, window_strides=(1, 1), padding=((3, 3), (3, 3)),
        dimension_numbers=("NCHW", "OIHW", "NCHW"),
        precision=lax.Precision.HIGHEST) + cb.reshape(1, 1, 1, 1)
    sa = jax.nn.sigmoid(conv)
    return out1 * sa


if __name__ == "__main__":
    def run_case(B, C, H, W, reduction):
        mid = C // reduction
        key = jax.random.PRNGKey(0)
        kx, k1, k2, k3, k4, k5, k6 = jax.random.split(key, 7)
        x = jax.random.normal(kx, (B, C, H, W), dtype=jnp.float32)
        # Deterministic synthetic parameters (PyTorch Linear / Conv2d layouts).
        W1 = 0.2 * jax.random.normal(k1, (mid, C), dtype=jnp.float32)
        b1 = 0.1 * jax.random.normal(k2, (mid,), dtype=jnp.float32)
        W2 = 0.2 * jax.random.normal(k3, (C, mid), dtype=jnp.float32)
        b2 = 0.1 * jax.random.normal(k4, (C,), dtype=jnp.float32)
        cw = 0.2 * jax.random.normal(k5, (1, 2, 7, 7), dtype=jnp.float32)
        cb = 0.1 * jax.random.normal(k6, (1,), dtype=jnp.float32)
        params = (W1, b1, W2, b2, cw, cb)

        out = jax.block_until_ready(cbam_pallas(x, params))
        with jax.default_matmul_precision("highest"):
            ref = jax.block_until_ready(cbam_ref(x, params))
        assert out.shape == x.shape
        np.testing.assert_allclose(np.asarray(out), np.asarray(ref),
                                   atol=1e-4, rtol=1e-4)

    run_case(8, 32, 16, 16, 16)   # H*W = 256, already lane-dense
    run_case(4, 32, 14, 14, 16)   # H*W = 196 -> padded to 256 in-kernel
    print("KERNEL_OK")
</pallas_src>

<mosaic_0001>
module attributes {stable_mosaic.version = 11 : i64} {
  func.func @cbam_kernel(%arg0: i32, %arg1: memref<1x32x256xf32, #tpu.memory_space<vmem>>, %arg2: memref<32x2xf32, #tpu.memory_space<vmem>>, %arg3: memref<32x2xf32, #tpu.memory_space<vmem>>, %arg4: memref<1x2xf32, #tpu.memory_space<vmem>>, %arg5: memref<1x32xf32, #tpu.memory_space<vmem>>, %arg6: memref<49x256xf32, #tpu.memory_space<vmem>>, %arg7: memref<49x256xf32, #tpu.memory_space<vmem>>, %arg8: memref<1x256xf32, #tpu.memory_space<vmem>>, %arg9: memref<1xf32, #tpu.memory_space<smem>>, %arg10: memref<1x32x256xf32, #tpu.memory_space<vmem>>) attributes {dimension_semantics = [#tpu.dimension_semantics<parallel>], iteration_bounds = array<i64: 8>, scalar_prefetch = 0 : i64, scratch_operands = 0 : i64, tpu.core_type = #tpu.core_type<tc>, window_params = [{transform_indices = @transform_0, window_bounds = array<i64: 1, 32, 256>}, {pipeline_mode = #tpu.pipeline_mode<synchronous>, transform_indices = @transform_1, window_bounds = array<i64: 32, 2>}, {pipeline_mode = #tpu.pipeline_mode<synchronous>, transform_indices = @transform_2, window_bounds = array<i64: 32, 2>}, {pipeline_mode = #tpu.pipeline_mode<synchronous>, transform_indices = @transform_3, window_bounds = array<i64: 1, 2>}, {pipeline_mode = #tpu.pipeline_mode<synchronous>, transform_indices = @transform_4, window_bounds = array<i64: 1, 32>}, {pipeline_mode = #tpu.pipeline_mode<synchronous>, transform_indices = @transform_5, window_bounds = array<i64: 49, 256>}, {pipeline_mode = #tpu.pipeline_mode<synchronous>, transform_indices = @transform_6, window_bounds = array<i64: 49, 256>}, {pipeline_mode = #tpu.pipeline_mode<synchronous>, transform_indices = @transform_7, window_bounds = array<i64: 1, 256>}, {transform_indices = @transform_8, window_bounds = array<i64: 1>}, {transform_indices = @transform_9, window_bounds = array<i64: 1, 32, 256>}]} {
    %c0 = arith.constant 0 : index
    %c0_0 = arith.constant 0 : index
    %c0_1 = arith.constant 0 : index
    %0 = vector.load %arg1[%c0, %c0_0, %c0_1] : memref<1x32x256xf32, #tpu.memory_space<vmem>>, vector<1x32x256xf32>
    %cst = arith.constant dense<0.000000e+00> : vector<1x32xf32>
    %1 = vector.multi_reduction <add>, %0, %cst [2] : vector<1x32x256xf32> to vector<1x32xf32>
    %cst_2 = arith.constant 3.906250e-03 : f32
    %2 = vector.broadcast %cst_2 : f32 to vector<1x32xf32>
    %3 = arith.mulf %1, %2 : vector<1x32xf32>
    %cst_3 = arith.constant dense<0xFF800000> : vector<1x32xf32>
    %4 = vector.multi_reduction <maximumf>, %0, %cst_3 [2] : vector<1x32x256xf32> to vector<1x32xf32>
    %5 = tpu.concatenate %3, %4 in 0 : vector<1x32xf32>, vector<1x32xf32> -> vector<2x32xf32>
    %c0_4 = arith.constant 0 : index
    %c0_5 = arith.constant 0 : index
    %6 = vector.load %arg2[%c0_4, %c0_5] : memref<32x2xf32, #tpu.memory_space<vmem>>, vector<32x2xf32>
    %c0_6 = arith.constant 0 : index
    %c0_7 = arith.constant 0 : index
    %7 = vector.load %arg3[%c0_6, %c0_7] : memref<32x2xf32, #tpu.memory_space<vmem>>, vector<32x2xf32>
    %8 = vector.shape_cast %5 : vector<2x32xf32> to vector<2x32x1xf32>
    %9 = vector.shape_cast %6 : vector<32x2xf32> to vector<1x32x2xf32>
    %10 = vector.broadcast %8 : vector<2x32x1xf32> to vector<2x32x2xf32>
    %11 = vector.broadcast %9 : vector<1x32x2xf32> to vector<2x32x2xf32>
    %12 = arith.mulf %10, %11 : vector<2x32x2xf32>
    %cst_8 = arith.constant dense<0.000000e+00> : vector<2x2xf32>
    %13 = vector.multi_reduction <add>, %12, %cst_8 [1] : vector<2x32x2xf32> to vector<2x2xf32>
    %c0_9 = arith.constant 0 : index
    %c0_10 = arith.constant 0 : index
    %14 = vector.load %arg4[%c0_9, %c0_10] : memref<1x2xf32, #tpu.memory_space<vmem>>, vector<1x2xf32>
    %15 = vector.broadcast %14 : vector<1x2xf32> to vector<2x2xf32>
    %16 = arith.addf %13, %15 : vector<2x2xf32>
    %cst_11 = arith.constant 0.000000e+00 : f32
    %17 = vector.broadcast %cst_11 : f32 to vector<2x2xf32>
    %18 = arith.maximumf %16, %17 : vector<2x2xf32>
    %19 = vector.shape_cast %18 : vector<2x2xf32> to vector<2x1x2xf32>
    %20 = vector.shape_cast %7 : vector<32x2xf32> to vector<1x32x2xf32>
    %21 = vector.broadcast %19 : vector<2x1x2xf32> to vector<2x32x2xf32>
    %22 = vector.broadcast %20 : vector<1x32x2xf32> to vector<2x32x2xf32>
    %23 = arith.mulf %21, %22 : vector<2x32x2xf32>
    %cst_12 = arith.constant dense<0.000000e+00> : vector<2x32xf32>
    %24 = vector.multi_reduction <add>, %23, %cst_12 [2] : vector<2x32x2xf32> to vector<2x32xf32>
    %25 = vector.extract_strided_slice %24 {offsets = [0, 0], sizes = [1, 32], strides = [1, 1]} : vector<2x32xf32> to vector<1x32xf32>
    %26 = vector.extract_strided_slice %24 {offsets = [1, 0], sizes = [1, 32], strides = [1, 1]} : vector<2x32xf32> to vector<1x32xf32>
    %27 = arith.addf %25, %26 : vector<1x32xf32>
    %c0_13 = arith.constant 0 : index
    %c0_14 = arith.constant 0 : index
    %28 = vector.load %arg5[%c0_13, %c0_14] : memref<1x32xf32, #tpu.memory_space<vmem>>, vector<1x32xf32>
    %cst_15 = arith.constant 2.000000e+00 : f32
    %29 = vector.broadcast %cst_15 : f32 to vector<1x32xf32>
    %30 = arith.mulf %29, %28 : vector<1x32xf32>
    %31 = arith.addf %27, %30 : vector<1x32xf32>
    %cst_16 = arith.constant 0.000000e+00 : f32
    %32 = vector.broadcast %cst_16 : f32 to vector<1x32xf32>
    %33 = arith.subf %32, %31 : vector<1x32xf32>
    %34 = math.exp %33 : vector<1x32xf32>
    %cst_17 = arith.constant 1.000000e+00 : f32
    %35 = vector.broadcast %cst_17 : f32 to vector<1x32xf32>
    %36 = arith.addf %35, %34 : vector<1x32xf32>
    %cst_18 = arith.constant 1.000000e+00 : f32
    %37 = vector.broadcast %cst_18 : f32 to vector<1x32xf32>
    %38 = arith.divf %37, %36 : vector<1x32xf32>
    %39 = vector.shape_cast %38 : vector<1x32xf32> to vector<1x32x1xf32>
    %40 = vector.broadcast %39 : vector<1x32x1xf32> to vector<1x32x256xf32>
    %41 = arith.mulf %0, %40 : vector<1x32x256xf32>
    %cst_19 = arith.constant dense<0.000000e+00> : vector<1x256xf32>
    %42 = vector.multi_reduction <add>, %41, %cst_19 [1] : vector<1x32x256xf32> to vector<1x256xf32>
    %cst_20 = arith.constant 3.125000e-02 : f32
    %43 = vector.broadcast %cst_20 : f32 to vector<1x256xf32>
    %44 = arith.mulf %42, %43 : vector<1x256xf32>
    %cst_21 = arith.constant dense<0xFF800000> : vector<1x256xf32>
    %45 = vector.multi_reduction <maximumf>, %41, %cst_21 [1] : vector<1x32x256xf32> to vector<1x256xf32>
    %46 = tpu.concatenate %44, %45 in 0 : vector<1x256xf32>, vector<1x256xf32> -> vector<2x256xf32>
    %cst_22 = arith.constant 0.000000e+00 : f32
    %47 = vector.broadcast %cst_22 : f32 to vector<1x256xf32>
    %c51_i32 = arith.constant 51 : i32
    %48 = tpu.dynamic_rotate %46 by %c51_i32 dim 1 : vector<2x256xf32>, i32 -> vector<2x256xf32>
    %c0_23 = arith.constant 0 : index
    %c0_24 = arith.constant 0 : index
    %49 = vector.load %arg6[%c0_23, %c0_24] : memref<49x256xf32, #tpu.memory_space<vmem>>, vector<1x256xf32>
    %c0_25 = arith.constant 0 : index
    %c0_26 = arith.constant 0 : index
    %50 = vector.load %arg7[%c0_25, %c0_26] : memref<49x256xf32, #tpu.memory_space<vmem>>, vector<1x256xf32>
    %51 = vector.extract_strided_slice %48 {offsets = [0, 0], sizes = [1, 256], strides = [1, 1]} : vector<2x256xf32> to vector<1x256xf32>
    %52 = arith.mulf %49, %51 : vector<1x256xf32>
    %53 = arith.addf %47, %52 : vector<1x256xf32>
    %54 = vector.extract_strided_slice %48 {offsets = [1, 0], sizes = [1, 256], strides = [1, 1]} : vector<2x256xf32> to vector<1x256xf32>
    %55 = arith.mulf %50, %54 : vector<1x256xf32>
    %56 = arith.addf %53, %55 : vector<1x256xf32>
    %c50_i32 = arith.constant 50 : i32
    %57 = tpu.dynamic_rotate %46 by %c50_i32 dim 1 : vector<2x256xf32>, i32 -> vector<2x256xf32>
    %c1 = arith.constant 1 : index
    %c0_27 = arith.constant 0 : index
    %58 = vector.load %arg6[%c1, %c0_27] : memref<49x256xf32, #tpu.memory_space<vmem>>, vector<1x256xf32>
    %c1_28 = arith.constant 1 : index
    %c0_29 = arith.constant 0 : index
    %59 = vector.load %arg7[%c1_28, %c0_29] : memref<49x256xf32, #tpu.memory_space<vmem>>, vector<1x256xf32>
    %60 = vector.extract_strided_slice %57 {offsets = [0, 0], sizes = [1, 256], strides = [1, 1]} : vector<2x256xf32> to vector<1x256xf32>
    %61 = arith.mulf %58, %60 : vector<1x256xf32>
    %62 = arith.addf %56, %61 : vector<1x256xf32>
    %63 = vector.extract_strided_slice %57 {offsets = [1, 0], sizes = [1, 256], strides = [1, 1]} : vector<2x256xf32> to vector<1x256xf32>
    %64 = arith.mulf %59, %63 : vector<1x256xf32>
    %65 = arith.addf %62, %64 : vector<1x256xf32>
    %c49_i32 = arith.constant 49 : i32
    %66 = tpu.dynamic_rotate %46 by %c49_i32 dim 1 : vector<2x256xf32>, i32 -> vector<2x256xf32>
    %c2 = arith.constant 2 : index
    %c0_30 = arith.constant 0 : index
    %67 = vector.load %arg6[%c2, %c0_30] : memref<49x256xf32, #tpu.memory_space<vmem>>, vector<1x256xf32>
    %c2_31 = arith.constant 2 : index
    %c0_32 = arith.constant 0 : index
    %68 = vector.load %arg7[%c2_31, %c0_32] : memref<49x256xf32, #tpu.memory_space<vmem>>, vector<1x256xf32>
    %69 = vector.extract_strided_slice %66 {offsets = [0, 0], sizes = [1, 256], strides = [1, 1]} : vector<2x256xf32> to vector<1x256xf32>
    %70 = arith.mulf %67, %69 : vector<1x256xf32>
    %71 = arith.addf %65, %70 : vector<1x256xf32>
    %72 = vector.extract_strided_slice %66 {offsets = [1, 0], sizes = [1, 256], strides = [1, 1]} : vector<2x256xf32> to vector<1x256xf32>
    %73 = arith.mulf %68, %72 : vector<1x256xf32>
    %74 = arith.addf %71, %73 : vector<1x256xf32>
    %c48_i32 = arith.constant 48 : i32
    %75 = tpu.dynamic_rotate %46 by %c48_i32 dim 1 : vector<2x256xf32>, i32 -> vector<2x256xf32>
    %c3 = arith.constant 3 : index
    %c0_33 = arith.constant 0 : index
    %76 = vector.load %arg6[%c3, %c0_33] : memref<49x256xf32, #tpu.memory_space<vmem>>, vector<1x256xf32>
    %c3_34 = arith.constant 3 : index
    %c0_35 = arith.constant 0 : index
    %77 = vector.load %arg7[%c3_34, %c0_35] : memref<49x256xf32, #tpu.memory_space<vmem>>, vector<1x256xf32>
    %78 = vector.extract_strided_slice %75 {offsets = [0, 0], sizes = [1, 256], strides = [1, 1]} : vector<2x256xf32> to vector<1x256xf32>
    %79 = arith.mulf %76, %78 : vector<1x256xf32>
    %80 = arith.addf %74, %79 : vector<1x256xf32>
    %81 = vector.extract_strided_slice %75 {offsets = [1, 0], sizes = [1, 256], strides = [1, 1]} : vector<2x256xf32> to vector<1x256xf32>
    %82 = arith.mulf %77, %81 : vector<1x256xf32>
    %83 = arith.addf %80, %82 : vector<1x256xf32>
    %c47_i32 = arith.constant 47 : i32
    %84 = tpu.dynamic_rotate %46 by %c47_i32 dim 1 : vector<2x256xf32>, i32 -> vector<2x256xf32>
    %c4 = arith.constant 4 : index
    %c0_36 = arith.constant 0 : index
    %85 = vector.load %arg6[%c4, %c0_36] : memref<49x256xf32, #tpu.memory_space<vmem>>, vector<1x256xf32>
    %c4_37 = arith.constant 4 : index
    %c0_38 = arith.constant 0 : index
    %86 = vector.load %arg7[%c4_37, %c0_38] : memref<49x256xf32, #tpu.memory_space<vmem>>, vector<1x256xf32>
    %87 = vector.extract_strided_slice %84 {offsets = [0, 0], sizes = [1, 256], strides = [1, 1]} : vector<2x256xf32> to vector<1x256xf32>
    %88 = arith.mulf %85, %87 : vector<1x256xf32>
    %89 = arith.addf %83, %88 : vector<1x256xf32>
    %90 = vector.extract_strided_slice %84 {offsets = [1, 0], sizes = [1, 256], strides = [1, 1]} : vector<2x256xf32> to vector<1x256xf32>
    %91 = arith.mulf %86, %90 : vector<1x256xf32>
    %92 = arith.addf %89, %91 : vector<1x256xf32>
    %c46_i32 = arith.constant 46 : i32
    %93 = tpu.dynamic_rotate %46 by %c46_i32 dim 1 : vector<2x256xf32>, i32 -> vector<2x256xf32>
    %c5 = arith.constant 5 : index
    %c0_39 = arith.constant 0 : index
    %94 = vector.load %arg6[%c5, %c0_39] : memref<49x256xf32, #tpu.memory_space<vmem>>, vector<1x256xf32>
    %c5_40 = arith.constant 5 : index
    %c0_41 = arith.constant 0 : index
    %95 = vector.load %arg7[%c5_40, %c0_41] : memref<49x256xf32, #tpu.memory_space<vmem>>, vector<1x256xf32>
    %96 = vector.extract_strided_slice %93 {offsets = [0, 0], sizes = [1, 256], strides = [1, 1]} : vector<2x256xf32> to vector<1x256xf32>
    %97 = arith.mulf %94, %96 : vector<1x256xf32>
    %98 = arith.addf %92, %97 : vector<1x256xf32>
    %99 = vector.extract_strided_slice %93 {offsets = [1, 0], sizes = [1, 256], strides = [1, 1]} : vector<2x256xf32> to vector<1x256xf32>
    %100 = arith.mulf %95, %99 : vector<1x256xf32>
    %101 = arith.addf %98, %100 : vector<1x256xf32>
    %c45_i32 = arith.constant 45 : i32
    %102 = tpu.dynamic_rotate %46 by %c45_i32 dim 1 : vector<2x256xf32>, i32 -> vector<2x256xf32>
    %c6 = arith.constant 6 : index
    %c0_42 = arith.constant 0 : index
    %103 = vector.load %arg6[%c6, %c0_42] : memref<49x256xf32, #tpu.memory_space<vmem>>, vector<1x256xf32>
    %c6_43 = arith.constant 6 : index
    %c0_44 = arith.constant 0 : index
    %104 = vector.load %arg7[%c6_43, %c0_44] : memref<49x256xf32, #tpu.memory_space<vmem>>, vector<1x256xf32>
    %105 = vector.extract_strided_slice %102 {offsets = [0, 0], sizes = [1, 256], strides = [1, 1]} : vector<2x256xf32> to vector<1x256xf32>
    %106 = arith.mulf %103, %105 : vector<1x256xf32>
    %107 = arith.addf %101, %106 : vector<1x256xf32>
    %108 = vector.extract_strided_slice %102 {offsets = [1, 0], sizes = [1, 256], strides = [1, 1]} : vector<2x256xf32> to vector<1x256xf32>
    %109 = arith.mulf %104, %108 : vector<1x256xf32>
    %110 = arith.addf %107, %109 : vector<1x256xf32>
    %c35_i32 = arith.constant 35 : i32
    %111 = tpu.dynamic_rotate %46 by %c35_i32 dim 1 : vector<2x256xf32>, i32 -> vector<2x256xf32>
    %c7 = arith.constant 7 : index
    %c0_45 = arith.constant 0 : index
    %112 = vector.load %arg6[%c7, %c0_45] : memref<49x256xf32, #tpu.memory_space<vmem>>, vector<1x256xf32>
    %c7_46 = arith.constant 7 : index
    %c0_47 = arith.constant 0 : index
    %113 = vector.load %arg7[%c7_46, %c0_47] : memref<49x256xf32, #tpu.memory_space<vmem>>, vector<1x256xf32>
    %114 = vector.extract_strided_slice %111 {offsets = [0, 0], sizes = [1, 256], strides = [1, 1]} : vector<2x256xf32> to vector<1x256xf32>
    %115 = arith.mulf %112, %114 : vector<1x256xf32>
    %116 = arith.addf %110, %115 : vector<1x256xf32>
    %117 = vector.extract_strided_slice %111 {offsets = [1, 0], sizes = [1, 256], strides = [1, 1]} : vector<2x256xf32> to vector<1x256xf32>
    %118 = arith.mulf %113, %117 : vector<1x256xf32>
    %119 = arith.addf %116, %118 : vector<1x256xf32>
    %c34_i32 = arith.constant 34 : i32
    %120 = tpu.dynamic_rotate %46 by %c34_i32 dim 1 : vector<2x256xf32>, i32 -> vector<2x256xf32>
    %c8 = arith.constant 8 : index
    %c0_48 = arith.constant 0 : index
    %121 = vector.load %arg6[%c8, %c0_48] : memref<49x256xf32, #tpu.memory_space<vmem>>, vector<1x256xf32>
    %c8_49 = arith.constant 8 : index
    %c0_50 = arith.constant 0 : index
    %122 = vector.load %arg7[%c8_49, %c0_50] : memref<49x256xf32, #tpu.memory_space<vmem>>, vector<1x256xf32>
    %123 = vector.extract_strided_slice %120 {offsets = [0, 0], sizes = [1, 256], strides = [1, 1]} : vector<2x256xf32> to vector<1x256xf32>
    %124 = arith.mulf %121, %123 : vector<1x256xf32>
    %125 = arith.addf %119, %124 : vector<1x256xf32>
    %126 = vector.extract_strided_slice %120 {offsets = [1, 0], sizes = [1, 256], strides = [1, 1]} : vector<2x256xf32> to vector<1x256xf32>
    %127 = arith.mulf %122, %126 : vector<1x256xf32>
    %128 = arith.addf %125, %127 : vector<1x256xf32>
    %c33_i32 = arith.constant 33 : i32
    %129 = tpu.dynamic_rotate %46 by %c33_i32 dim 1 : vector<2x256xf32>, i32 -> vector<2x256xf32>
    %c9 = arith.constant 9 : index
    %c0_51 = arith.constant 0 : index
    %130 = vector.load %arg6[%c9, %c0_51] : memref<49x256xf32, #tpu.memory_space<vmem>>, vector<1x256xf32>
    %c9_52 = arith.constant 9 : index
    %c0_53 = arith.constant 0 : index
    %131 = vector.load %arg7[%c9_52, %c0_53] : memref<49x256xf32, #tpu.memory_space<vmem>>, vector<1x256xf32>
    %132 = vector.extract_strided_slice %129 {offsets = [0, 0], sizes = [1, 256], strides = [1, 1]} : vector<2x256xf32> to vector<1x256xf32>
    %133 = arith.mulf %130, %132 : vector<1x256xf32>
    %134 = arith.addf %128, %133 : vector<1x256xf32>
    %135 = vector.extract_strided_slice %129 {offsets = [1, 0], sizes = [1, 256], strides = [1, 1]} : vector<2x256xf32> to vector<1x256xf32>
    %136 = arith.mulf %131, %135 : vector<1x256xf32>
    %137 = arith.addf %134, %136 : vector<1x256xf32>
    %c32_i32 = arith.constant 32 : i32
    %138 = tpu.dynamic_rotate %46 by %c32_i32 dim 1 : vector<2x256xf32>, i32 -> vector<2x256xf32>
    %c10 = arith.constant 10 : index
    %c0_54 = arith.constant 0 : index
    %139 = vector.load %arg6[%c10, %c0_54] : memref<49x256xf32, #tpu.memory_space<vmem>>, vector<1x256xf32>
    %c10_55 = arith.constant 10 : index
    %c0_56 = arith.constant 0 : index
    %140 = vector.load %arg7[%c10_55, %c0_56] : memref<49x256xf32, #tpu.memory_space<vmem>>, vector<1x256xf32>
    %141 = vector.extract_strided_slice %138 {offsets = [0, 0], sizes = [1, 256], strides = [1, 1]} : vector<2x256xf32> to vector<1x256xf32>
    %142 = arith.mulf %139, %141 : vector<1x256xf32>
    %143 = arith.addf %137, %142 : vector<1x256xf32>
    %144 = vector.extract_strided_slice %138 {offsets = [1, 0], sizes = [1, 256], strides = [1, 1]} : vector<2x256xf32> to vector<1x256xf32>
    %145 = arith.mulf %140, %144 : vector<1x256xf32>
    %146 = arith.addf %143, %145 : vector<1x256xf32>
    %c31_i32 = arith.constant 31 : i32
    %147 = tpu.dynamic_rotate %46 by %c31_i32 dim 1 : vector<2x256xf32>, i32 -> vector<2x256xf32>
    %c11 = arith.constant 11 : index
    %c0_57 = arith.constant 0 : index
    %148 = vector.load %arg6[%c11, %c0_57] : memref<49x256xf32, #tpu.memory_space<vmem>>, vector<1x256xf32>
    %c11_58 = arith.constant 11 : index
    %c0_59 = arith.constant 0 : index
    %149 = vector.load %arg7[%c11_58, %c0_59] : memref<49x256xf32, #tpu.memory_space<vmem>>, vector<1x256xf32>
    %150 = vector.extract_strided_slice %147 {offsets = [0, 0], sizes = [1, 256], strides = [1, 1]} : vector<2x256xf32> to vector<1x256xf32>
    %151 = arith.mulf %148, %150 : vector<1x256xf32>
    %152 = arith.addf %146, %151 : vector<1x256xf32>
    %153 = vector.extract_strided_slice %147 {offsets = [1, 0], sizes = [1, 256], strides = [1, 1]} : vector<2x256xf32> to vector<1x256xf32>
    %154 = arith.mulf %149, %153 : vector<1x256xf32>
    %155 = arith.addf %152, %154 : vector<1x256xf32>
    %c30_i32 = arith.constant 30 : i32
    %156 = tpu.dynamic_rotate %46 by %c30_i32 dim 1 : vector<2x256xf32>, i32 -> vector<2x256xf32>
    %c12 = arith.constant 12 : index
    %c0_60 = arith.constant 0 : index
    %157 = vector.load %arg6[%c12, %c0_60] : memref<49x256xf32, #tpu.memory_space<vmem>>, vector<1x256xf32>
    %c12_61 = arith.constant 12 : index
    %c0_62 = arith.constant 0 : index
    %158 = vector.load %arg7[%c12_61, %c0_62] : memref<49x256xf32, #tpu.memory_space<vmem>>, vector<1x256xf32>
    %159 = vector.extract_strided_slice %156 {offsets = [0, 0], sizes = [1, 256], strides = [1, 1]} : vector<2x256xf32> to vector<1x256xf32>
    %160 = arith.mulf %157, %159 : vector<1x256xf32>
    %161 = arith.addf %155, %160 : vector<1x256xf32>
    %162 = vector.extract_strided_slice %156 {offsets = [1, 0], sizes = [1, 256], strides = [1, 1]} : vector<2x256xf32> to vector<1x256xf32>
    %163 = arith.mulf %158, %162 : vector<1x256xf32>
    %164 = arith.addf %161, %163 : vector<1x256xf32>
    %c29_i32 = arith.constant 29 : i32
    %165 = tpu.dynamic_rotate %46 by %c29_i32 dim 1 : vector<2x256xf32>, i32 -> vector<2x256xf32>
    %c13 = arith.constant 13 : index
    %c0_63 = arith.constant 0 : index
    %166 = vector.load %arg6[%c13, %c0_63] : memref<49x256xf32, #tpu.memory_space<vmem>>, vector<1x256xf32>
    %c13_64 = arith.constant 13 : index
    %c0_65 = arith.constant 0 : index
    %167 = vector.load %arg7[%c13_64, %c0_65] : memref<49x256xf32, #tpu.memory_space<vmem>>, vector<1x256xf32>
    %168 = vector.extract_strided_slice %165 {offsets = [0, 0], sizes = [1, 256], strides = [1, 1]} : vector<2x256xf32> to vector<1x256xf32>
    %169 = arith.mulf %166, %168 : vector<1x256xf32>
    %170 = arith.addf %164, %169 : vector<1x256xf32>
    %171 = vector.extract_strided_slice %165 {offsets = [1, 0], sizes = [1, 256], strides = [1, 1]} : vector<2x256xf32> to vector<1x256xf32>
    %172 = arith.mulf %167, %171 : vector<1x256xf32>
    %173 = arith.addf %170, %172 : vector<1x256xf32>
    %c19_i32 = arith.constant 19 : i32
    %174 = tpu.dynamic_rotate %46 by %c19_i32 dim 1 : vector<2x256xf32>, i32 -> vector<2x256xf32>
    %c14 = arith.constant 14 : index
    %c0_66 = arith.constant 0 : index
    %175 = vector.load %arg6[%c14, %c0_66] : memref<49x256xf32, #tpu.memory_space<vmem>>, vector<1x256xf32>
    %c14_67 = arith.constant 14 : index
    %c0_68 = arith.constant 0 : index
    %176 = vector.load %arg7[%c14_67, %c0_68] : memref<49x256xf32, #tpu.memory_space<vmem>>, vector<1x256xf32>
    %177 = vector.extract_strided_slice %174 {offsets = [0, 0], sizes = [1, 256], strides = [1, 1]} : vector<2x256xf32> to vector<1x256xf32>
    %178 = arith.mulf %175, %177 : vector<1x256xf32>
    %179 = arith.addf %173, %178 : vector<1x256xf32>
    %180 = vector.extract_strided_slice %174 {offsets = [1, 0], sizes = [1, 256], strides = [1, 1]} : vector<2x256xf32> to vector<1x256xf32>
    %181 = arith.mulf %176, %180 : vector<1x256xf32>
    %182 = arith.addf %179, %181 : vector<1x256xf32>
    %c18_i32 = arith.constant 18 : i32
    %183 = tpu.dynamic_rotate %46 by %c18_i32 dim 1 : vector<2x256xf32>, i32 -> vector<2x256xf32>
    %c15 = arith.constant 15 : index
    %c0_69 = arith.constant 0 : index
    %184 = vector.load %arg6[%c15, %c0_69] : memref<49x256xf32, #tpu.memory_space<vmem>>, vector<1x256xf32>
    %c15_70 = arith.constant 15 : index
    %c0_71 = arith.constant 0 : index
    %185 = vector.load %arg7[%c15_70, %c0_71] : memref<49x256xf32, #tpu.memory_space<vmem>>, vector<1x256xf32>
    %186 = vector.extract_strided_slice %183 {offsets = [0, 0], sizes = [1, 256], strides = [1, 1]} : vector<2x256xf32> to vector<1x256xf32>
    %187 = arith.mulf %184, %186 : vector<1x256xf32>
    %188 = arith.addf %182, %187 : vector<1x256xf32>
    %189 = vector.extract_strided_slice %183 {offsets = [1, 0], sizes = [1, 256], strides = [1, 1]} : vector<2x256xf32> to vector<1x256xf32>
    %190 = arith.mulf %185, %189 : vector<1x256xf32>
    %191 = arith.addf %188, %190 : vector<1x256xf32>
    %c17_i32 = arith.constant 17 : i32
    %192 = tpu.dynamic_rotate %46 by %c17_i32 dim 1 : vector<2x256xf32>, i32 -> vector<2x256xf32>
    %c16 = arith.constant 16 : index
    %c0_72 = arith.constant 0 : index
    %193 = vector.load %arg6[%c16, %c0_72] : memref<49x256xf32, #tpu.memory_space<vmem>>, vector<1x256xf32>
    %c16_73 = arith.constant 16 : index
    %c0_74 = arith.constant 0 : index
    %194 = vector.load %arg7[%c16_73, %c0_74] : memref<49x256xf32, #tpu.memory_space<vmem>>, vector<1x256xf32>
    %195 = vector.extract_strided_slice %192 {offsets = [0, 0], sizes = [1, 256], strides = [1, 1]} : vector<2x256xf32> to vector<1x256xf32>
    %196 = arith.mulf %193, %195 : vector<1x256xf32>
    %197 = arith.addf %191, %196 : vector<1x256xf32>
    %198 = vector.extract_strided_slice %192 {offsets = [1, 0], sizes = [1, 256], strides = [1, 1]} : vector<2x256xf32> to vector<1x256xf32>
    %199 = arith.mulf %194, %198 : vector<1x256xf32>
    %200 = arith.addf %197, %199 : vector<1x256xf32>
    %c16_i32 = arith.constant 16 : i32
    %201 = tpu.dynamic_rotate %46 by %c16_i32 dim 1 : vector<2x256xf32>, i32 -> vector<2x256xf32>
    %c17 = arith.constant 17 : index
    %c0_75 = arith.constant 0 : index
    %202 = vector.load %arg6[%c17, %c0_75] : memref<49x256xf32, #tpu.memory_space<vmem>>, vector<1x256xf32>
    %c17_76 = arith.constant 17 : index
    %c0_77 = arith.constant 0 : index
    %203 = vector.load %arg7[%c17_76, %c0_77] : memref<49x256xf32, #tpu.memory_space<vmem>>, vector<1x256xf32>
    %204 = vector.extract_strided_slice %201 {offsets = [0, 0], sizes = [1, 256], strides = [1, 1]} : vector<2x256xf32> to vector<1x256xf32>
    %205 = arith.mulf %202, %204 : vector<1x256xf32>
    %206 = arith.addf %200, %205 : vector<1x256xf32>
    %207 = vector.extract_strided_slice %201 {offsets = [1, 0], sizes = [1, 256], strides = [1, 1]} : vector<2x256xf32> to vector<1x256xf32>
    %208 = arith.mulf %203, %207 : vector<1x256xf32>
    %209 = arith.addf %206, %208 : vector<1x256xf32>
    %c15_i32 = arith.constant 15 : i32
    %210 = tpu.dynamic_rotate %46 by %c15_i32 dim 1 : vector<2x256xf32>, i32 -> vector<2x256xf32>
    %c18 = arith.constant 18 : index
    %c0_78 = arith.constant 0 : index
    %211 = vector.load %arg6[%c18, %c0_78] : memref<49x256xf32, #tpu.memory_space<vmem>>, vector<1x256xf32>
    %c18_79 = arith.constant 18 : index
    %c0_80 = arith.constant 0 : index
    %212 = vector.load %arg7[%c18_79, %c0_80] : memref<49x256xf32, #tpu.memory_space<vmem>>, vector<1x256xf32>
    %213 = vector.extract_strided_slice %210 {offsets = [0, 0], sizes = [1, 256], strides = [1, 1]} : vector<2x256xf32> to vector<1x256xf32>
    %214 = arith.mulf %211, %213 : vector<1x256xf32>
    %215 = arith.addf %209, %214 : vector<1x256xf32>
    %216 = vector.extract_strided_slice %210 {offsets = [1, 0], sizes = [1, 256], strides = [1, 1]} : vector<2x256xf32> to vector<1x256xf32>
    %217 = arith.mulf %212, %216 : vector<1x256xf32>
    %218 = arith.addf %215, %217 : vector<1x256xf32>
    %c14_i32 = arith.constant 14 : i32
    %219 = tpu.dynamic_rotate %46 by %c14_i32 dim 1 : vector<2x256xf32>, i32 -> vector<2x256xf32>
    %c19 = arith.constant 19 : index
    %c0_81 = arith.constant 0 : index
    %220 = vector.load %arg6[%c19, %c0_81] : memref<49x256xf32, #tpu.memory_space<vmem>>, vector<1x256xf32>
    %c19_82 = arith.constant 19 : index
    %c0_83 = arith.constant 0 : index
    %221 = vector.load %arg7[%c19_82, %c0_83] : memref<49x256xf32, #tpu.memory_space<vmem>>, vector<1x256xf32>
    %222 = vector.extract_strided_slice %219 {offsets = [0, 0], sizes = [1, 256], strides = [1, 1]} : vector<2x256xf32> to vector<1x256xf32>
    %223 = arith.mulf %220, %222 : vector<1x256xf32>
    %224 = arith.addf %218, %223 : vector<1x256xf32>
    %225 = vector.extract_strided_slice %219 {offsets = [1, 0], sizes = [1, 256], strides = [1, 1]} : vector<2x256xf32> to vector<1x256xf32>
    %226 = arith.mulf %221, %225 : vector<1x256xf32>
    %227 = arith.addf %224, %226 : vector<1x256xf32>
    %c13_i32 = arith.constant 13 : i32
    %228 = tpu.dynamic_rotate %46 by %c13_i32 dim 1 : vector<2x256xf32>, i32 -> vector<2x256xf32>
    %c20 = arith.constant 20 : index
    %c0_84 = arith.constant 0 : index
    %229 = vector.load %arg6[%c20, %c0_84] : memref<49x256xf32, #tpu.memory_space<vmem>>, vector<1x256xf32>
    %c20_85 = arith.constant 20 : index
    %c0_86 = arith.constant 0 : index
    %230 = vector.load %arg7[%c20_85, %c0_86] : memref<49x256xf32, #tpu.memory_space<vmem>>, vector<1x256xf32>
    %231 = vector.extract_strided_slice %228 {offsets = [0, 0], sizes = [1, 256], strides = [1, 1]} : vector<2x256xf32> to vector<1x256xf32>
    %232 = arith.mulf %229, %231 : vector<1x256xf32>
    %233 = arith.addf %227, %232 : vector<1x256xf32>
    %234 = vector.extract_strided_slice %228 {offsets = [1, 0], sizes = [1, 256], strides = [1, 1]} : vector<2x256xf32> to vector<1x256xf32>
    %235 = arith.mulf %230, %234 : vector<1x256xf32>
    %236 = arith.addf %233, %235 : vector<1x256xf32>
    %c3_i32 = arith.constant 3 : i32
    %237 = tpu.dynamic_rotate %46 by %c3_i32 dim 1 : vector<2x256xf32>, i32 -> vector<2x256xf32>
    %c21 = arith.constant 21 : index
    %c0_87 = arith.constant 0 : index
    %238 = vector.load %arg6[%c21, %c0_87] : memref<49x256xf32, #tpu.memory_space<vmem>>, vector<1x256xf32>
    %c21_88 = arith.constant 21 : index
    %c0_89 = arith.constant 0 : index
    %239 = vector.load %arg7[%c21_88, %c0_89] : memref<49x256xf32, #tpu.memory_space<vmem>>, vector<1x256xf32>
    %240 = vector.extract_strided_slice %237 {offsets = [0, 0], sizes = [1, 256], strides = [1, 1]} : vector<2x256xf32> to vector<1x256xf32>
    %241 = arith.mulf %238, %240 : vector<1x256xf32>
    %242 = arith.addf %236, %241 : vector<1x256xf32>
    %243 = vector.extract_strided_slice %237 {offsets = [1, 0], sizes = [1, 256], strides = [1, 1]} : vector<2x256xf32> to vector<1x256xf32>
    %244 = arith.mulf %239, %243 : vector<1x256xf32>
    %245 = arith.addf %242, %244 : vector<1x256xf32>
    %c2_i32 = arith.constant 2 : i32
    %246 = tpu.dynamic_rotate %46 by %c2_i32 dim 1 : vector<2x256xf32>, i32 -> vector<2x256xf32>
    %c22 = arith.constant 22 : index
    %c0_90 = arith.constant 0 : index
    %247 = vector.load %arg6[%c22, %c0_90] : memref<49x256xf32, #tpu.memory_space<vmem>>, vector<1x256xf32>
    %c22_91 = arith.constant 22 : index
    %c0_92 = arith.constant 0 : index
    %248 = vector.load %arg7[%c22_91, %c0_92] : memref<49x256xf32, #tpu.memory_space<vmem>>, vector<1x256xf32>
    %249 = vector.extract_strided_slice %246 {offsets = [0, 0], sizes = [1, 256], strides = [1, 1]} : vector<2x256xf32> to vector<1x256xf32>
    %250 = arith.mulf %247, %249 : vector<1x256xf32>
    %251 = arith.addf %245, %250 : vector<1x256xf32>
    %252 = vector.extract_strided_slice %246 {offsets = [1, 0], sizes = [1, 256], strides = [1, 1]} : vector<2x256xf32> to vector<1x256xf32>
    %253 = arith.mulf %248, %252 : vector<1x256xf32>
    %254 = arith.addf %251, %253 : vector<1x256xf32>
    %c1_i32 = arith.constant 1 : i32
    %255 = tpu.dynamic_rotate %46 by %c1_i32 dim 1 : vector<2x256xf32>, i32 -> vector<2x256xf32>
    %c23 = arith.constant 23 : index
    %c0_93 = arith.constant 0 : index
    %256 = vector.load %arg6[%c23, %c0_93] : memref<49x256xf32, #tpu.memory_space<vmem>>, vector<1x256xf32>
    %c23_94 = arith.constant 23 : index
    %c0_95 = arith.constant 0 : index
    %257 = vector.load %arg7[%c23_94, %c0_95] : memref<49x256xf32, #tpu.memory_space<vmem>>, vector<1x256xf32>
    %258 = vector.extract_strided_slice %255 {offsets = [0, 0], sizes = [1, 256], strides = [1, 1]} : vector<2x256xf32> to vector<1x256xf32>
    %259 = arith.mulf %256, %258 : vector<1x256xf32>
    %260 = arith.addf %254, %259 : vector<1x256xf32>
    %261 = vector.extract_strided_slice %255 {offsets = [1, 0], sizes = [1, 256], strides = [1, 1]} : vector<2x256xf32> to vector<1x256xf32>
    %262 = arith.mulf %257, %261 : vector<1x256xf32>
    %263 = arith.addf %260, %262 : vector<1x256xf32>
    %c24 = arith.constant 24 : index
    %c0_96 = arith.constant 0 : index
    %264 = vector.load %arg6[%c24, %c0_96] : memref<49x256xf32, #tpu.memory_space<vmem>>, vector<1x256xf32>
    %c24_97 = arith.constant 24 : index
    %c0_98 = arith.constant 0 : index
    %265 = vector.load %arg7[%c24_97, %c0_98] : memref<49x256xf32, #tpu.memory_space<vmem>>, vector<1x256xf32>
    %266 = vector.extract_strided_slice %46 {offsets = [0, 0], sizes = [1, 256], strides = [1, 1]} : vector<2x256xf32> to vector<1x256xf32>
    %267 = arith.mulf %264, %266 : vector<1x256xf32>
    %268 = arith.addf %263, %267 : vector<1x256xf32>
    %269 = vector.extract_strided_slice %46 {offsets = [1, 0], sizes = [1, 256], strides = [1, 1]} : vector<2x256xf32> to vector<1x256xf32>
    %270 = arith.mulf %265, %269 : vector<1x256xf32>
    %271 = arith.addf %268, %270 : vector<1x256xf32>
    %c255_i32 = arith.constant 255 : i32
    %272 = tpu.dynamic_rotate %46 by %c255_i32 dim 1 : vector<2x256xf32>, i32 -> vector<2x256xf32>
    %c25 = arith.constant 25 : index
    %c0_99 = arith.constant 0 : index
    %273 = vector.load %arg6[%c25, %c0_99] : memref<49x256xf32, #tpu.memory_space<vmem>>, vector<1x256xf32>
    %c25_100 = arith.constant 25 : index
    %c0_101 = arith.constant 0 : index
    %274 = vector.load %arg7[%c25_100, %c0_101] : memref<49x256xf32, #tpu.memory_space<vmem>>, vector<1x256xf32>
    %275 = vector.extract_strided_slice %272 {offsets = [0, 0], sizes = [1, 256], strides = [1, 1]} : vector<2x256xf32> to vector<1x256xf32>
    %276 = arith.mulf %273, %275 : vector<1x256xf32>
    %277 = arith.addf %271, %276 : vector<1x256xf32>
    %278 = vector.extract_strided_slice %272 {offsets = [1, 0], sizes = [1, 256], strides = [1, 1]} : vector<2x256xf32> to vector<1x256xf32>
    %279 = arith.mulf %274, %278 : vector<1x256xf32>
    %280 = arith.addf %277, %279 : vector<1x256xf32>
    %c254_i32 = arith.constant 254 : i32
    %281 = tpu.dynamic_rotate %46 by %c254_i32 dim 1 : vector<2x256xf32>, i32 -> vector<2x256xf32>
    %c26 = arith.constant 26 : index
    %c0_102 = arith.constant 0 : index
    %282 = vector.load %arg6[%c26, %c0_102] : memref<49x256xf32, #tpu.memory_space<vmem>>, vector<1x256xf32>
    %c26_103 = arith.constant 26 : index
    %c0_104 = arith.constant 0 : index
    %283 = vector.load %arg7[%c26_103, %c0_104] : memref<49x256xf32, #tpu.memory_space<vmem>>, vector<1x256xf32>
    %284 = vector.extract_strided_slice %281 {offsets = [0, 0], sizes = [1, 256], strides = [1, 1]} : vector<2x256xf32> to vector<1x256xf32>
    %285 = arith.mulf %282, %284 : vector<1x256xf32>
    %286 = arith.addf %280, %285 : vector<1x256xf32>
    %287 = vector.extract_strided_slice %281 {offsets = [1, 0], sizes = [1, 256], strides = [1, 1]} : vector<2x256xf32> to vector<1x256xf32>
    %288 = arith.mulf %283, %287 : vector<1x256xf32>
    %289 = arith.addf %286, %288 : vector<1x256xf32>
    %c253_i32 = arith.constant 253 : i32
    %290 = tpu.dynamic_rotate %46 by %c253_i32 dim 1 : vector<2x256xf32>, i32 -> vector<2x256xf32>
    %c27 = arith.constant 27 : index
    %c0_105 = arith.constant 0 : index
    %291 = vector.load %arg6[%c27, %c0_105] : memref<49x256xf32, #tpu.memory_space<vmem>>, vector<1x256xf32>
    %c27_106 = arith.constant 27 : index
    %c0_107 = arith.constant 0 : index
    %292 = vector.load %arg7[%c27_106, %c0_107] : memref<49x256xf32, #tpu.memory_space<vmem>>, vector<1x256xf32>
    %293 = vector.extract_strided_slice %290 {offsets = [0, 0], sizes = [1, 256], strides = [1, 1]} : vector<2x256xf32> to vector<1x256xf32>
    %294 = arith.mulf %291, %293 : vector<1x256xf32>
    %295 = arith.addf %289, %294 : vector<1x256xf32>
    %296 = vector.extract_strided_slice %290 {offsets = [1, 0], sizes = [1, 256], strides = [1, 1]} : vector<2x256xf32> to vector<1x256xf32>
    %297 = arith.mulf %292, %296 : vector<1x256xf32>
    %298 = arith.addf %295, %297 : vector<1x256xf32>
    %c243_i32 = arith.constant 243 : i32
    %299 = tpu.dynamic_rotate %46 by %c243_i32 dim 1 : vector<2x256xf32>, i32 -> vector<2x256xf32>
    %c28 = arith.constant 28 : index
    %c0_108 = arith.constant 0 : index
    %300 = vector.load %arg6[%c28, %c0_108] : memref<49x256xf32, #tpu.memory_space<vmem>>, vector<1x256xf32>
    %c28_109 = arith.constant 28 : index
    %c0_110 = arith.constant 0 : index
    %301 = vector.load %arg7[%c28_109, %c0_110] : memref<49x256xf32, #tpu.memory_space<vmem>>, vector<1x256xf32>
    %302 = vector.extract_strided_slice %299 {offsets = [0, 0], sizes = [1, 256], strides = [1, 1]} : vector<2x256xf32> to vector<1x256xf32>
    %303 = arith.mulf %300, %302 : vector<1x256xf32>
    %304 = arith.addf %298, %303 : vector<1x256xf32>
    %305 = vector.extract_strided_slice %299 {offsets = [1, 0], sizes = [1, 256], strides = [1, 1]} : vector<2x256xf32> to vector<1x256xf32>
    %306 = arith.mulf %301, %305 : vector<1x256xf32>
    %307 = arith.addf %304, %306 : vector<1x256xf32>
    %c242_i32 = arith.constant 242 : i32
    %308 = tpu.dynamic_rotate %46 by %c242_i32 dim 1 : vector<2x256xf32>, i32 -> vector<2x256xf32>
    %c29 = arith.constant 29 : index
    %c0_111 = arith.constant 0 : index
    %309 = vector.load %arg6[%c29, %c0_111] : memref<49x256xf32, #tpu.memory_space<vmem>>, vector<1x256xf32>
    %c29_112 = arith.constant 29 : index
    %c0_113 = arith.constant 0 : index
    %310 = vector.load %arg7[%c29_112, %c0_113] : memref<49x256xf32, #tpu.memory_space<vmem>>, vector<1x256xf32>
    %311 = vector.extract_strided_slice %308 {offsets = [0, 0], sizes = [1, 256], strides = [1, 1]} : vector<2x256xf32> to vector<1x256xf32>
    %312 = arith.mulf %309, %311 : vector<1x256xf32>
    %313 = arith.addf %307, %312 : vector<1x256xf32>
    %314 = vector.extract_strided_slice %308 {offsets = [1, 0], sizes = [1, 256], strides = [1, 1]} : vector<2x256xf32> to vector<1x256xf32>
    %315 = arith.mulf %310, %314 : vector<1x256xf32>
    %316 = arith.addf %313, %315 : vector<1x256xf32>
    %c241_i32 = arith.constant 241 : i32
    %317 = tpu.dynamic_rotate %46 by %c241_i32 dim 1 : vector<2x256xf32>, i32 -> vector<2x256xf32>
    %c30 = arith.constant 30 : index
    %c0_114 = arith.constant 0 : index
    %318 = vector.load %arg6[%c30, %c0_114] : memref<49x256xf32, #tpu.memory_space<vmem>>, vector<1x256xf32>
    %c30_115 = arith.constant 30 : index
    %c0_116 = arith.constant 0 : index
    %319 = vector.load %arg7[%c30_115, %c0_116] : memref<49x256xf32, #tpu.memory_space<vmem>>, vector<1x256xf32>
    %320 = vector.extract_strided_slice %317 {offsets = [0, 0], sizes = [1, 256], strides = [1, 1]} : vector<2x256xf32> to vector<1x256xf32>
    %321 = arith.mulf %318, %320 : vector<1x256xf32>
    %322 = arith.addf %316, %321 : vector<1x256xf32>
    %323 = vector.extract_strided_slice %317 {offsets = [1, 0], sizes = [1, 256], strides = [1, 1]} : vector<2x256xf32> to vector<1x256xf32>
    %324 = arith.mulf %319, %323 : vector<1x256xf32>
    %325 = arith.addf %322, %324 : vector<1x256xf32>
    %c240_i32 = arith.constant 240 : i32
    %326 = tpu.dynamic_rotate %46 by %c240_i32 dim 1 : vector<2x256xf32>, i32 -> vector<2x256xf32>
    %c31 = arith.constant 31 : index
    %c0_117 = arith.constant 0 : index
    %327 = vector.load %arg6[%c31, %c0_117] : memref<49x256xf32, #tpu.memory_space<vmem>>, vector<1x256xf32>
    %c31_118 = arith.constant 31 : index
    %c0_119 = arith.constant 0 : index
    %328 = vector.load %arg7[%c31_118, %c0_119] : memref<49x256xf32, #tpu.memory_space<vmem>>, vector<1x256xf32>
    %329 = vector.extract_strided_slice %326 {offsets = [0, 0], sizes = [1, 256], strides = [1, 1]} : vector<2x256xf32> to vector<1x256xf32>
    %330 = arith.mulf %327, %329 : vector<1x256xf32>
    %331 = arith.addf %325, %330 : vector<1x256xf32>
    %332 = vector.extract_strided_slice %326 {offsets = [1, 0], sizes = [1, 256], strides = [1, 1]} : vector<2x256xf32> to vector<1x256xf32>
    %333 = arith.mulf %328, %332 : vector<1x256xf32>
    %334 = arith.addf %331, %333 : vector<1x256xf32>
    %c239_i32 = arith.constant 239 : i32
    %335 = tpu.dynamic_rotate %46 by %c239_i32 dim 1 : vector<2x256xf32>, i32 -> vector<2x256xf32>
    %c32 = arith.constant 32 : index
    %c0_120 = arith.constant 0 : index
    %336 = vector.load %arg6[%c32, %c0_120] : memref<49x256xf32, #tpu.memory_space<vmem>>, vector<1x256xf32>
    %c32_121 = arith.constant 32 : index
    %c0_122 = arith.constant 0 : index
    %337 = vector.load %arg7[%c32_121, %c0_122] : memref<49x256xf32, #tpu.memory_space<vmem>>, vector<1x256xf32>
    %338 = vector.extract_strided_slice %335 {offsets = [0, 0], sizes = [1, 256], strides = [1, 1]} : vector<2x256xf32> to vector<1x256xf32>
    %339 = arith.mulf %336, %338 : vector<1x256xf32>
    %340 = arith.addf %334, %339 : vector<1x256xf32>
    %341 = vector.extract_strided_slice %335 {offsets = [1, 0], sizes = [1, 256], strides = [1, 1]} : vector<2x256xf32> to vector<1x256xf32>
    %342 = arith.mulf %337, %341 : vector<1x256xf32>
    %343 = arith.addf %340, %342 : vector<1x256xf32>
    %c238_i32 = arith.constant 238 : i32
    %344 = tpu.dynamic_rotate %46 by %c238_i32 dim 1 : vector<2x256xf32>, i32 -> vector<2x256xf32>
    %c33 = arith.constant 33 : index
    %c0_123 = arith.constant 0 : index
    %345 = vector.load %arg6[%c33, %c0_123] : memref<49x256xf32, #tpu.memory_space<vmem>>, vector<1x256xf32>
    %c33_124 = arith.constant 33 : index
    %c0_125 = arith.constant 0 : index
    %346 = vector.load %arg7[%c33_124, %c0_125] : memref<49x256xf32, #tpu.memory_space<vmem>>, vector<1x256xf32>
    %347 = vector.extract_strided_slice %344 {offsets = [0, 0], sizes = [1, 256], strides = [1, 1]} : vector<2x256xf32> to vector<1x256xf32>
    %348 = arith.mulf %345, %347 : vector<1x256xf32>
    %349 = arith.addf %343, %348 : vector<1x256xf32>
    %350 = vector.extract_strided_slice %344 {offsets = [1, 0], sizes = [1, 256], strides = [1, 1]} : vector<2x256xf32> to vector<1x256xf32>
    %351 = arith.mulf %346, %350 : vector<1x256xf32>
    %352 = arith.addf %349, %351 : vector<1x256xf32>
    %c237_i32 = arith.constant 237 : i32
    %353 = tpu.dynamic_rotate %46 by %c237_i32 dim 1 : vector<2x256xf32>, i32 -> vector<2x256xf32>
    %c34 = arith.constant 34 : index
    %c0_126 = arith.constant 0 : index
    %354 = vector.load %arg6[%c34, %c0_126] : memref<49x256xf32, #tpu.memory_space<vmem>>, vector<1x256xf32>
    %c34_127 = arith.constant 34 : index
    %c0_128 = arith.constant 0 : index
    %355 = vector.load %arg7[%c34_127, %c0_128] : memref<49x256xf32, #tpu.memory_space<vmem>>, vector<1x256xf32>
    %356 = vector.extract_strided_slice %353 {offsets = [0, 0], sizes = [1, 256], strides = [1, 1]} : vector<2x256xf32> to vector<1x256xf32>
    %357 = arith.mulf %354, %356 : vector<1x256xf32>
    %358 = arith.addf %352, %357 : vector<1x256xf32>
    %359 = vector.extract_strided_slice %353 {offsets = [1, 0], sizes = [1, 256], strides = [1, 1]} : vector<2x256xf32> to vector<1x256xf32>
    %360 = arith.mulf %355, %359 : vector<1x256xf32>
    %361 = arith.addf %358, %360 : vector<1x256xf32>
    %c227_i32 = arith.constant 227 : i32
    %362 = tpu.dynamic_rotate %46 by %c227_i32 dim 1 : vector<2x256xf32>, i32 -> vector<2x256xf32>
    %c35 = arith.constant 35 : index
    %c0_129 = arith.constant 0 : index
    %363 = vector.load %arg6[%c35, %c0_129] : memref<49x256xf32, #tpu.memory_space<vmem>>, vector<1x256xf32>
    %c35_130 = arith.constant 35 : index
    %c0_131 = arith.constant 0 : index
    %364 = vector.load %arg7[%c35_130, %c0_131] : memref<49x256xf32, #tpu.memory_space<vmem>>, vector<1x256xf32>
    %365 = vector.extract_strided_slice %362 {offsets = [0, 0], sizes = [1, 256], strides = [1, 1]} : vector<2x256xf32> to vector<1x256xf32>
    %366 = arith.mulf %363, %365 : vector<1x256xf32>
    %367 = arith.addf %361, %366 : vector<1x256xf32>
    %368 = vector.extract_strided_slice %362 {offsets = [1, 0], sizes = [1, 256], strides = [1, 1]} : vector<2x256xf32> to vector<1x256xf32>
    %369 = arith.mulf %364, %368 : vector<1x256xf32>
    %370 = arith.addf %367, %369 : vector<1x256xf32>
    %c226_i32 = arith.constant 226 : i32
    %371 = tpu.dynamic_rotate %46 by %c226_i32 dim 1 : vector<2x256xf32>, i32 -> vector<2x256xf32>
    %c36 = arith.constant 36 : index
    %c0_132 = arith.constant 0 : index
    %372 = vector.load %arg6[%c36, %c0_132] : memref<49x256xf32, #tpu.memory_space<vmem>>, vector<1x256xf32>
    %c36_133 = arith.constant 36 : index
    %c0_134 = arith.constant 0 : index
    %373 = vector.load %arg7[%c36_133, %c0_134] : memref<49x256xf32, #tpu.memory_space<vmem>>, vector<1x256xf32>
    %374 = vector.extract_strided_slice %371 {offsets = [0, 0], sizes = [1, 256], strides = [1, 1]} : vector<2x256xf32> to vector<1x256xf32>
    %375 = arith.mulf %372, %374 : vector<1x256xf32>
    %376 = arith.addf %370, %375 : vector<1x256xf32>
    %377 = vector.extract_strided_slice %371 {offsets = [1, 0], sizes = [1, 256], strides = [1, 1]} : vector<2x256xf32> to vector<1x256xf32>
    %378 = arith.mulf %373, %377 : vector<1x256xf32>
    %379 = arith.addf %376, %378 : vector<1x256xf32>
    %c225_i32 = arith.constant 225 : i32
    %380 = tpu.dynamic_rotate %46 by %c225_i32 dim 1 : vector<2x256xf32>, i32 -> vector<2x256xf32>
    %c37 = arith.constant 37 : index
    %c0_135 = arith.constant 0 : index
    %381 = vector.load %arg6[%c37, %c0_135] : memref<49x256xf32, #tpu.memory_space<vmem>>, vector<1x256xf32>
    %c37_136 = arith.constant 37 : index
    %c0_137 = arith.constant 0 : index
    %382 = vector.load %arg7[%c37_136, %c0_137] : memref<49x256xf32, #tpu.memory_space<vmem>>, vector<1x256xf32>
    %383 = vector.extract_strided_slice %380 {offsets = [0, 0], sizes = [1, 256], strides = [1, 1]} : vector<2x256xf32> to vector<1x256xf32>
    %384 = arith.mulf %381, %383 : vector<1x256xf32>
    %385 = arith.addf %379, %384 : vector<1x256xf32>
    %386 = vector.extract_strided_slice %380 {offsets = [1, 0], sizes = [1, 256], strides = [1, 1]} : vector<2x256xf32> to vector<1x256xf32>
    %387 = arith.mulf %382, %386 : vector<1x256xf32>
    %388 = arith.addf %385, %387 : vector<1x256xf32>
    %c224_i32 = arith.constant 224 : i32
    %389 = tpu.dynamic_rotate %46 by %c224_i32 dim 1 : vector<2x256xf32>, i32 -> vector<2x256xf32>
    %c38 = arith.constant 38 : index
    %c0_138 = arith.constant 0 : index
    %390 = vector.load %arg6[%c38, %c0_138] : memref<49x256xf32, #tpu.memory_space<vmem>>, vector<1x256xf32>
    %c38_139 = arith.constant 38 : index
    %c0_140 = arith.constant 0 : index
    %391 = vector.load %arg7[%c38_139, %c0_140] : memref<49x256xf32, #tpu.memory_space<vmem>>, vector<1x256xf32>
    %392 = vector.extract_strided_slice %389 {offsets = [0, 0], sizes = [1, 256], strides = [1, 1]} : vector<2x256xf32> to vector<1x256xf32>
    %393 = arith.mulf %390, %392 : vector<1x256xf32>
    %394 = arith.addf %388, %393 : vector<1x256xf32>
    %395 = vector.extract_strided_slice %389 {offsets = [1, 0], sizes = [1, 256], strides = [1, 1]} : vector<2x256xf32> to vector<1x256xf32>
    %396 = arith.mulf %391, %395 : vector<1x256xf32>
    %397 = arith.addf %394, %396 : vector<1x256xf32>
    %c223_i32 = arith.constant 223 : i32
    %398 = tpu.dynamic_rotate %46 by %c223_i32 dim 1 : vector<2x256xf32>, i32 -> vector<2x256xf32>
    %c39 = arith.constant 39 : index
    %c0_141 = arith.constant 0 : index
    %399 = vector.load %arg6[%c39, %c0_141] : memref<49x256xf32, #tpu.memory_space<vmem>>, vector<1x256xf32>
    %c39_142 = arith.constant 39 : index
    %c0_143 = arith.constant 0 : index
    %400 = vector.load %arg7[%c39_142, %c0_143] : memref<49x256xf32, #tpu.memory_space<vmem>>, vector<1x256xf32>
    %401 = vector.extract_strided_slice %398 {offsets = [0, 0], sizes = [1, 256], strides = [1, 1]} : vector<2x256xf32> to vector<1x256xf32>
    %402 = arith.mulf %399, %401 : vector<1x256xf32>
    %403 = arith.addf %397, %402 : vector<1x256xf32>
    %404 = vector.extract_strided_slice %398 {offsets = [1, 0], sizes = [1, 256], strides = [1, 1]} : vector<2x256xf32> to vector<1x256xf32>
    %405 = arith.mulf %400, %404 : vector<1x256xf32>
    %406 = arith.addf %403, %405 : vector<1x256xf32>
    %c222_i32 = arith.constant 222 : i32
    %407 = tpu.dynamic_rotate %46 by %c222_i32 dim 1 : vector<2x256xf32>, i32 -> vector<2x256xf32>
    %c40 = arith.constant 40 : index
    %c0_144 = arith.constant 0 : index
    %408 = vector.load %arg6[%c40, %c0_144] : memref<49x256xf32, #tpu.memory_space<vmem>>, vector<1x256xf32>
    %c40_145 = arith.constant 40 : index
    %c0_146 = arith.constant 0 : index
    %409 = vector.load %arg7[%c40_145, %c0_146] : memref<49x256xf32, #tpu.memory_space<vmem>>, vector<1x256xf32>
    %410 = vector.extract_strided_slice %407 {offsets = [0, 0], sizes = [1, 256], strides = [1, 1]} : vector<2x256xf32> to vector<1x256xf32>
    %411 = arith.mulf %408, %410 : vector<1x256xf32>
    %412 = arith.addf %406, %411 : vector<1x256xf32>
    %413 = vector.extract_strided_slice %407 {offsets = [1, 0], sizes = [1, 256], strides = [1, 1]} : vector<2x256xf32> to vector<1x256xf32>
    %414 = arith.mulf %409, %413 : vector<1x256xf32>
    %415 = arith.addf %412, %414 : vector<1x256xf32>
    %c221_i32 = arith.constant 221 : i32
    %416 = tpu.dynamic_rotate %46 by %c221_i32 dim 1 : vector<2x256xf32>, i32 -> vector<2x256xf32>
    %c41 = arith.constant 41 : index
    %c0_147 = arith.constant 0 : index
    %417 = vector.load %arg6[%c41, %c0_147] : memref<49x256xf32, #tpu.memory_space<vmem>>, vector<1x256xf32>
    %c41_148 = arith.constant 41 : index
    %c0_149 = arith.constant 0 : index
    %418 = vector.load %arg7[%c41_148, %c0_149] : memref<49x256xf32, #tpu.memory_space<vmem>>, vector<1x256xf32>
    %419 = vector.extract_strided_slice %416 {offsets = [0, 0], sizes = [1, 256], strides = [1, 1]} : vector<2x256xf32> to vector<1x256xf32>
    %420 = arith.mulf %417, %419 : vector<1x256xf32>
    %421 = arith.addf %415, %420 : vector<1x256xf32>
    %422 = vector.extract_strided_slice %416 {offsets = [1, 0], sizes = [1, 256], strides = [1, 1]} : vector<2x256xf32> to vector<1x256xf32>
    %423 = arith.mulf %418, %422 : vector<1x256xf32>
    %424 = arith.addf %421, %423 : vector<1x256xf32>
    %c211_i32 = arith.constant 211 : i32
    %425 = tpu.dynamic_rotate %46 by %c211_i32 dim 1 : vector<2x256xf32>, i32 -> vector<2x256xf32>
    %c42 = arith.constant 42 : index
    %c0_150 = arith.constant 0 : index
    %426 = vector.load %arg6[%c42, %c0_150] : memref<49x256xf32, #tpu.memory_space<vmem>>, vector<1x256xf32>
    %c42_151 = arith.constant 42 : index
    %c0_152 = arith.constant 0 : index
    %427 = vector.load %arg7[%c42_151, %c0_152] : memref<49x256xf32, #tpu.memory_space<vmem>>, vector<1x256xf32>
    %428 = vector.extract_strided_slice %425 {offsets = [0, 0], sizes = [1, 256], strides = [1, 1]} : vector<2x256xf32> to vector<1x256xf32>
    %429 = arith.mulf %426, %428 : vector<1x256xf32>
    %430 = arith.addf %424, %429 : vector<1x256xf32>
    %431 = vector.extract_strided_slice %425 {offsets = [1, 0], sizes = [1, 256], strides = [1, 1]} : vector<2x256xf32> to vector<1x256xf32>
    %432 = arith.mulf %427, %431 : vector<1x256xf32>
    %433 = arith.addf %430, %432 : vector<1x256xf32>
    %c210_i32 = arith.constant 210 : i32
    %434 = tpu.dynamic_rotate %46 by %c210_i32 dim 1 : vector<2x256xf32>, i32 -> vector<2x256xf32>
    %c43 = arith.constant 43 : index
    %c0_153 = arith.constant 0 : index
    %435 = vector.load %arg6[%c43, %c0_153] : memref<49x256xf32, #tpu.memory_space<vmem>>, vector<1x256xf32>
    %c43_154 = arith.constant 43 : index
    %c0_155 = arith.constant 0 : index
    %436 = vector.load %arg7[%c43_154, %c0_155] : memref<49x256xf32, #tpu.memory_space<vmem>>, vector<1x256xf32>
    %437 = vector.extract_strided_slice %434 {offsets = [0, 0], sizes = [1, 256], strides = [1, 1]} : vector<2x256xf32> to vector<1x256xf32>
    %438 = arith.mulf %435, %437 : vector<1x256xf32>
    %439 = arith.addf %433, %438 : vector<1x256xf32>
    %440 = vector.extract_strided_slice %434 {offsets = [1, 0], sizes = [1, 256], strides = [1, 1]} : vector<2x256xf32> to vector<1x256xf32>
    %441 = arith.mulf %436, %440 : vector<1x256xf32>
    %442 = arith.addf %439, %441 : vector<1x256xf32>
    %c209_i32 = arith.constant 209 : i32
    %443 = tpu.dynamic_rotate %46 by %c209_i32 dim 1 : vector<2x256xf32>, i32 -> vector<2x256xf32>
    %c44 = arith.constant 44 : index
    %c0_156 = arith.constant 0 : index
    %444 = vector.load %arg6[%c44, %c0_156] : memref<49x256xf32, #tpu.memory_space<vmem>>, vector<1x256xf32>
    %c44_157 = arith.constant 44 : index
    %c0_158 = arith.constant 0 : index
    %445 = vector.load %arg7[%c44_157, %c0_158] : memref<49x256xf32, #tpu.memory_space<vmem>>, vector<1x256xf32>
    %446 = vector.extract_strided_slice %443 {offsets = [0, 0], sizes = [1, 256], strides = [1, 1]} : vector<2x256xf32> to vector<1x256xf32>
    %447 = arith.mulf %444, %446 : vector<1x256xf32>
    %448 = arith.addf %442, %447 : vector<1x256xf32>
    %449 = vector.extract_strided_slice %443 {offsets = [1, 0], sizes = [1, 256], strides = [1, 1]} : vector<2x256xf32> to vector<1x256xf32>
    %450 = arith.mulf %445, %449 : vector<1x256xf32>
    %451 = arith.addf %448, %450 : vector<1x256xf32>
    %c208_i32 = arith.constant 208 : i32
    %452 = tpu.dynamic_rotate %46 by %c208_i32 dim 1 : vector<2x256xf32>, i32 -> vector<2x256xf32>
    %c45 = arith.constant 45 : index
    %c0_159 = arith.constant 0 : index
    %453 = vector.load %arg6[%c45, %c0_159] : memref<49x256xf32, #tpu.memory_space<vmem>>, vector<1x256xf32>
    %c45_160 = arith.constant 45 : index
    %c0_161 = arith.constant 0 : index
    %454 = vector.load %arg7[%c45_160, %c0_161] : memref<49x256xf32, #tpu.memory_space<vmem>>, vector<1x256xf32>
    %455 = vector.extract_strided_slice %452 {offsets = [0, 0], sizes = [1, 256], strides = [1, 1]} : vector<2x256xf32> to vector<1x256xf32>
    %456 = arith.mulf %453, %455 : vector<1x256xf32>
    %457 = arith.addf %451, %456 : vector<1x256xf32>
    %458 = vector.extract_strided_slice %452 {offsets = [1, 0], sizes = [1, 256], strides = [1, 1]} : vector<2x256xf32> to vector<1x256xf32>
    %459 = arith.mulf %454, %458 : vector<1x256xf32>
    %460 = arith.addf %457, %459 : vector<1x256xf32>
    %c207_i32 = arith.constant 207 : i32
    %461 = tpu.dynamic_rotate %46 by %c207_i32 dim 1 : vector<2x256xf32>, i32 -> vector<2x256xf32>
    %c46 = arith.constant 46 : index
    %c0_162 = arith.constant 0 : index
    %462 = vector.load %arg6[%c46, %c0_162] : memref<49x256xf32, #tpu.memory_space<vmem>>, vector<1x256xf32>
    %c46_163 = arith.constant 46 : index
    %c0_164 = arith.constant 0 : index
    %463 = vector.load %arg7[%c46_163, %c0_164] : memref<49x256xf32, #tpu.memory_space<vmem>>, vector<1x256xf32>
    %464 = vector.extract_strided_slice %461 {offsets = [0, 0], sizes = [1, 256], strides = [1, 1]} : vector<2x256xf32> to vector<1x256xf32>
    %465 = arith.mulf %462, %464 : vector<1x256xf32>
    %466 = arith.addf %460, %465 : vector<1x256xf32>
    %467 = vector.extract_strided_slice %461 {offsets = [1, 0], sizes = [1, 256], strides = [1, 1]} : vector<2x256xf32> to vector<1x256xf32>
    %468 = arith.mulf %463, %467 : vector<1x256xf32>
    %469 = arith.addf %466, %468 : vector<1x256xf32>
    %c206_i32 = arith.constant 206 : i32
    %470 = tpu.dynamic_rotate %46 by %c206_i32 dim 1 : vector<2x256xf32>, i32 -> vector<2x256xf32>
    %c47 = arith.constant 47 : index
    %c0_165 = arith.constant 0 : index
    %471 = vector.load %arg6[%c47, %c0_165] : memref<49x256xf32, #tpu.memory_space<vmem>>, vector<1x256xf32>
    %c47_166 = arith.constant 47 : index
    %c0_167 = arith.constant 0 : index
    %472 = vector.load %arg7[%c47_166, %c0_167] : memref<49x256xf32, #tpu.memory_space<vmem>>, vector<1x256xf32>
    %473 = vector.extract_strided_slice %470 {offsets = [0, 0], sizes = [1, 256], strides = [1, 1]} : vector<2x256xf32> to vector<1x256xf32>
    %474 = arith.mulf %471, %473 : vector<1x256xf32>
    %475 = arith.addf %469, %474 : vector<1x256xf32>
    %476 = vector.extract_strided_slice %470 {offsets = [1, 0], sizes = [1, 256], strides = [1, 1]} : vector<2x256xf32> to vector<1x256xf32>
    %477 = arith.mulf %472, %476 : vector<1x256xf32>
    %478 = arith.addf %475, %477 : vector<1x256xf32>
    %c205_i32 = arith.constant 205 : i32
    %479 = tpu.dynamic_rotate %46 by %c205_i32 dim 1 : vector<2x256xf32>, i32 -> vector<2x256xf32>
    %c48 = arith.constant 48 : index
    %c0_168 = arith.constant 0 : index
    %480 = vector.load %arg6[%c48, %c0_168] : memref<49x256xf32, #tpu.memory_space<vmem>>, vector<1x256xf32>
    %c48_169 = arith.constant 48 : index
    %c0_170 = arith.constant 0 : index
    %481 = vector.load %arg7[%c48_169, %c0_170] : memref<49x256xf32, #tpu.memory_space<vmem>>, vector<1x256xf32>
    %482 = vector.extract_strided_slice %479 {offsets = [0, 0], sizes = [1, 256], strides = [1, 1]} : vector<2x256xf32> to vector<1x256xf32>
    %483 = arith.mulf %480, %482 : vector<1x256xf32>
    %484 = arith.addf %478, %483 : vector<1x256xf32>
    %485 = vector.extract_strided_slice %479 {offsets = [1, 0], sizes = [1, 256], strides = [1, 1]} : vector<2x256xf32> to vector<1x256xf32>
    %486 = arith.mulf %481, %485 : vector<1x256xf32>
    %487 = arith.addf %484, %486 : vector<1x256xf32>
    %c0_171 = arith.constant 0 : index
    %488 = memref.load %arg9[%c0_171] : memref<1xf32, #tpu.memory_space<smem>>
    %489 = vector.broadcast %488 : f32 to vector<1x256xf32>
    %490 = arith.addf %487, %489 : vector<1x256xf32>
    %cst_172 = arith.constant 0.000000e+00 : f32
    %491 = vector.broadcast %cst_172 : f32 to vector<1x256xf32>
    %492 = arith.subf %491, %490 : vector<1x256xf32>
    %493 = math.exp %492 : vector<1x256xf32>
    %cst_173 = arith.constant 1.000000e+00 : f32
    %494 = vector.broadcast %cst_173 : f32 to vector<1x256xf32>
    %495 = arith.addf %494, %493 : vector<1x256xf32>
    %cst_174 = arith.constant 1.000000e+00 : f32
    %496 = vector.broadcast %cst_174 : f32 to vector<1x256xf32>
    %497 = arith.divf %496, %495 : vector<1x256xf32>
    %498 = vector.shape_cast %497 : vector<1x256xf32> to vector<1x1x256xf32>
    %499 = vector.broadcast %498 : vector<1x1x256xf32> to vector<1x32x256xf32>
    %500 = arith.mulf %41, %499 : vector<1x32x256xf32>
    %c0_175 = arith.constant 0 : index
    %c0_176 = arith.constant 0 : index
    %c0_177 = arith.constant 0 : index
    %501 = vector.load %arg10[%c0_175, %c0_176, %c0_177] : memref<1x32x256xf32, #tpu.memory_space<vmem>>, vector<1x32x256xf32>
    tpu.vector_store %arg10[%c0_175, %c0_176, %c0_177], %500 {strides = array<i32>} : memref<1x32x256xf32, #tpu.memory_space<vmem>>, vector<1x32x256xf32>,
    return
  }
  func.func @transform_0(%arg0: i32) -> (i32, i32, i32) {
    %c0_i32 = arith.constant 0 : i32
    %c0_i32_0 = arith.constant 0 : i32
    %c0_i32_1 = arith.constant 0 : i32
    return %arg0, %c0_i32, %c0_i32_0 : i32, i32, i32
  }
  func.func @transform_1(%arg0: i32) -> (i32, i32) {
    %c0_i32 = arith.constant 0 : i32
    %c0_i32_0 = arith.constant 0 : i32
    %c0_i32_1 = arith.constant 0 : i32
    return %c0_i32, %c0_i32_0 : i32, i32
  }
  func.func @transform_2(%arg0: i32) -> (i32, i32) {
    %c0_i32 = arith.constant 0 : i32
    %c0_i32_0 = arith.constant 0 : i32
    %c0_i32_1 = arith.constant 0 : i32
    return %c0_i32, %c0_i32_0 : i32, i32
  }
  func.func @transform_3(%arg0: i32) -> (i32, i32) {
    %c0_i32 = arith.constant 0 : i32
    %c0_i32_0 = arith.constant 0 : i32
    %c0_i32_1 = arith.constant 0 : i32
    return %c0_i32, %c0_i32_0 : i32, i32
  }
  func.func @transform_4(%arg0: i32) -> (i32, i32) {
    %c0_i32 = arith.constant 0 : i32
    %c0_i32_0 = arith.constant 0 : i32
    %c0_i32_1 = arith.constant 0 : i32
    return %c0_i32, %c0_i32_0 : i32, i32
  }
  func.func @transform_5(%arg0: i32) -> (i32, i32) {
    %c0_i32 = arith.constant 0 : i32
    %c0_i32_0 = arith.constant 0 : i32
    %c0_i32_1 = arith.constant 0 : i32
    return %c0_i32, %c0_i32_0 : i32, i32
  }
  func.func @transform_6(%arg0: i32) -> (i32, i32) {
    %c0_i32 = arith.constant 0 : i32
    %c0_i32_0 = arith.constant 0 : i32
    %c0_i32_1 = arith.constant 0 : i32
    return %c0_i32, %c0_i32_0 : i32, i32
  }
  func.func @transform_7(%arg0: i32) -> (i32, i32) {
    %c0_i32 = arith.constant 0 : i32
    %c0_i32_0 = arith.constant 0 : i32
    %c0_i32_1 = arith.constant 0 : i32
    return %c0_i32, %c0_i32_0 : i32, i32
  }
  func.func @transform_8(%arg0: i32) -> i32 {
    %c0_i32 = arith.constant 0 : i32
    %c0_i32_0 = arith.constant 0 : i32
    return %c0_i32 : i32
  }
  func.func @transform_9(%arg0: i32) -> (i32, i32, i32) {
    %c0_i32 = arith.constant 0 : i32
    %c0_i32_0 = arith.constant 0 : i32
    %c0_i32_1 = arith.constant 0 : i32
    return %arg0, %c0_i32, %c0_i32_0 : i32, i32, i32
  }
}

</mosaic_0001>

<bundles_post_ra>
// kernel: tpu_custom_call.1
= control target key start
LH: loop header
LB: loop body
LE: loop exit
PB: predicated region body
PF: predicated region fallthrough
CT: control target
= control target key end

     0   :  { %s4101_s0 = inlined_call_operand.hbm [shape: f32[8,32,256], index: 0, kind: input, shape index: {}]   ;;  %s4102_s1 = inlined_call_operand.vmem [shape: f32[32,2], index: 1, kind: input, shape index: {}]   ;;  %s4103_s2 = inlined_call_operand.vmem [shape: f32[32,2], index: 2, kind: input, shape index: {}]   ;;  %s4104_s3 = inlined_call_operand.vmem [shape: f32[1,2], index: 3, kind: input, shape index: {}]   ;;  %s4105_s4 = inlined_call_operand.vmem [shape: f32[1,32], index: 4, kind: input, shape index: {}]   ;;  %s4106_s5 = inlined_call_operand.hbm [shape: f32[49,256], index: 5, kind: input, shape index: {}]   ;;  %s4107_s6 = inlined_call_operand.hbm [shape: f32[49,256], index: 6, kind: input, shape index: {}]   ;;  %s4108_s7 = inlined_call_operand.vmem [shape: f32[1,256], index: 7, kind: input, shape index: {}]   ;;  %s4109_s8 = inlined_call_operand.<no memory space> [shape: f32[1], index: 8, kind: input, shape index: {}]   ;;  %s4110_s9 = inlined_call_operand.hbm [shape: f32[8,32,256], index: 9, kind: output, shape index: {}]  }
   0x1   :  { %4117 = sst [smem:[#allocation13_spill]] %s4106_s5 }
   0x2   :  { %14 = sst [smem:[#allocation2]] %s4109_s8 }
   0x3   :  { %15 = vsyncpa [#allocation4], 0 }
   0x4   :  { %17 = vsyncpa [#allocation4 + $0x1], 0 }
   0x5   :  { %18 = vsyncpa [#allocation7], 0 }
   0x6   :  { %19 = vsyncpa [#allocation5], 0 }
   0x7   :  { %21 = vsyncpa [#allocation5 + $0x1], 0  ;;  %s3347_s11 = smov 0   ;;  %s3349_s12 = smov 0  }
   0x8   :  { %s3351_s7 = smov 0   ;;  %s3353_s13 = smov 0  }
   0x9 LB: > { %s3368_s8 = sadd.s32 4294967295, %s3235_s13   ;;  %s2924_s14 = sadd.s32 4294967294, %s3235_s13   ;;  %s3235_s13 = sphi %s3353_s13, %s4136_s13   ;;  %s3231_s7 = sphi %s3351_s7, %s4135_s7   ;;  %s3227_s12 = sphi %s3349_s12, %s4134_s12   ;;  %s3223_s11 = sphi %s3347_s11, %s4133_s11  }
   0xa   : > { %p47_p0 = scmp.ne.s32.totalorder %s3227_s12, %s3223_s11  ;;  %p4112_p1 = scmp.eq.s32.totalorder %s3368_s8, 0 }
   0xb   : > { %p239_p2 = scmp.eq.s32.totalorder %s3368_s8, 7  ;;  %p245_p3 = scmp.eq.s32.totalorder %s2924_s14, 7 }
   0xc   : > { %p3377_p4 = por %p4112_p1, %p47_p0  ;;  %p2925_p5 = scmp.ge.s32.totalorder %s3235_s13, 1 }
   0xd   : > { %p3382_p6 = por %p245_p3, %p47_p0  ;;  %p252_p7 = scmp.lt.s32.totalorder %s3235_s13, 9 }
   0xe   : > { %s4118_s15 = scalar_select %p3377_p4, 1, 0 }
   0xf   : > { %s4119_s16 = scalar_select %p3382_p6, 1, 0 }
  0x10   : > { %p3387_p8 = pnand %p2925_p5, %p252_p7  ;;  %s3237_s18 = smov [#allocation6]  }
  0x11   : > { %s276_s19 = sshll.u32 %s3237_s18, 4  ;;  %s3238_s21 = smov [#allocation8]   ;;  %s277_s19 = int_to_ptr.vmem [resolvable:$true] %s276_s19 }
  0x12   : > { %s4120_s17 = scalar_select %p3387_p8, 1, 0 }
  0x13   : > { %p2957_p9 = pneg %p3387_p8  ;;  %s289_s22 = sshll.u32 %s3238_s21, 4  ;;  %s290_s22 = int_to_ptr.vmem [resolvable:$true] %s289_s22 }
  0x14   : > { %s3098_s23 = scalar_lea.vmem %s277_s19, 1792  ;;  %p3106_p3 = scmp.lt.s32.totalorder %s277_s19, %s277_s19 }
  0x15   : > { %p3395_p10 = pnand %p2957_p9, %p4112_p1  ;;  %p3099_p12 = scmp.ne.s32.totalorder %s277_s19, %s3098_s23 }
  0x16   : > { %p3107_p5 = scmp.lt.s32.totalorder %s3098_s23, %s3098_s23 }
  0x17   : > { %p3089_p11 = pneg %p3395_p10 }
  0x18   : > { %p3108_p7 = por %p3107_p5, %p3106_p3 }
  0x19   : > { %p3101_p13 = pnand %p3099_p12, %p3089_p11 }
  0x1b   : > { %p3102_p0 = pneg %p3101_p13 }
  0x1d   : > { %p3109_p9 = pnand %p3108_p7, %p3102_p0 }
  0x1f   : > { %3112 = shalt.err (!%p3109_p9)
}
  0x20   : > { %s4111_s24 = smov 256   ;;  %s4113_s25 = smov 16  }
  0x21   : > { %s4122_s5 = sld [smem:[#allocation13_spill]]  ;;  %s3124_s28 = scalar_lea.vmem %s290_s22, 1792 }
  0x22   : > { %p3125_p12 = scmp.ne.s32.totalorder %s290_s22, %s3124_s28  ;;  %p3132_p0 = scmp.lt.s32.totalorder %s290_s22, %s290_s22 }
  0x23   : > { %p3133_p5 = scmp.lt.s32.totalorder %s3124_s28, %s3124_s28 }
  0x24   : > { %p3127_p13 = pnand %p3125_p12, %p3089_p11 }
  0x25   : > { %p3134_p7 = por %p3133_p5, %p3132_p0 }
  0x26   : > { %p3128_p3 = pneg %p3127_p13 }
  0x27   : > { %2960 = dma.hbm_to_vmem [thread:$0]  (!%p3395_p10), %s4122_s5, 1792, %s277_s19, [#allocation7], %s4111_s24, %s4111_s24, %s4113_s25  }
  0x28   : > { %p3135_p9 = pnand %p3134_p7, %p3128_p3 }
  0x2a   : > { %3138 = shalt.err (!%p3135_p9)
}
  0x2b   : > { %2963 = dma.hbm_to_vmem [thread:$0]  (!%p3395_p10), %s4107_s6, 1792, %s290_s22, [#allocation7], %s4111_s24, %s4111_s24, %s4113_s25  }
  0x2c   : > { %s3424_s10 = sadd.s32 1, %s3235_s13   ;;  %s34_s14 = sadd.s32 1, %s3231_s7 }
  0x2d   : > { %s31_s18 = ssub.s32 %s3235_s13, %s3424_s10  ;;  %p41_p11 = scmp.ne.s32.totalorder %s3231_s7, %s3227_s12 }
  0x2e   : > { %p32_p12 = scmp.eq.s32.totalorder %s31_s18, 0  ;;  %p42_p13 = scmp.eq.s32.totalorder %s3235_s13, 0 }
  0x2f   : > { %p3434_p3 = por %p239_p2, %p41_p11  ;;  %p2974_p0 = scmp.lt.s32.totalorder %s3235_s13, 8 }
  0x30   : > { %s3440_s20 = scalar_select %p32_p12, %s3231_s7, %s34_s14  }
  0x31   : > { %s4123_s19 = scalar_select %p3434_p3, 1, 0 }
  0x32   : > { %p43_p5 = por %p42_p13, %p41_p11  ;;  %s309_s21 = sand.u32 1, %s3231_s7  }
  0x33   : > { %s2929_s23 = sshll.u32 %s309_s21, 6  ;;  %s2943_s22 = sshll.u32 %s3235_s13, 10 }
  0x34   : > { %s3447_s28 = scalar_lea.hbm %s4101_s0, %s2943_s22  ;;  %s313_s29 = scalar_lea.vmem [#allocation3], %s2929_s23 }
  0x35   : > { %s320_s30 = sshll.u32 %s313_s29, 4  ;;  %p3451_p2 = pnand %p2974_p0, %p43_p5  ;;  %s3449_s30 = int_to_ptr.vmem [resolvable:$true] %s320_s30 }
  0x36   : > { %s3455_s14 = scalar_lea.sflag [#allocation4], %s309_s21  ;;  %s3139_s24 = scalar_lea.hbm %s3447_s28, 1024 }
  0x37   : > { %p3140_p10 = scmp.ne.s32.totalorder %s3447_s28, %s3139_s24  ;;  %p3141_p7 = pneg %p3451_p2 }
  0x38   : > { %s3144_s23 = scalar_lea.hbm %s4101_s0, 8192  ;;  %p3145_p12 = scmp.lt.s32.totalorder %s3447_s28, %s4101_s0 }
  0x39   : > { %p3142_p9 = pnand %p3141_p7, %p3140_p10  ;;  %p3146_p13 = scmp.lt.s32.totalorder %s3144_s23, %s3139_s24 }
  0x3b   : > { %p3143_p11 = pneg %p3142_p9  ;;  %p3147_p0 = por %p3146_p13, %p3145_p12 }
  0x3d   : > { %p3148_p5 = pnand %p3147_p0, %p3143_p11 }
  0x3f   : > { %3151 = shalt.err (!%p3148_p5)
}
  0x40   : > { %s3152_s21 = scalar_lea.vmem %s3449_s30, 1024  ;;  %s3241_s25 = smov [#allocation3]  }
  0x41   : > { %p3153_p1 = scmp.ne.s32.totalorder %s3449_s30, %s3152_s21  ;;  %s3157_s5 = sshll.u32 %s3241_s25, 4  ;;  %s3158_s5 = int_to_ptr.vmem [resolvable:$false] %s3157_s5 }
  0x42   : > { %s3159_s22 = scalar_lea.vmem %s3158_s5, 2048  ;;  %p3160_p9 = scmp.lt.s32.totalorder %s3449_s30, %s3158_s5 }
  0x43   : > { %p3155_p6 = pnand %p3153_p1, %p3141_p7  ;;  %p3161_p3 = scmp.lt.s32.totalorder %s3159_s22, %s3152_s21 }
  0x45   : > { %p3156_p10 = pneg %p3155_p6  ;;  %p3162_p4 = por %p3161_p3, %p3160_p9 }
  0x47   : > { %p3163_p8 = pnand %p3162_p4, %p3156_p10 }
  0x49   : > { %3166 = shalt.err (!%p3163_p8)
}
  0x4a   : > { %s4125_s24 = smov 16   ;;  %s4126_s26 = smov 256  }
  0x4b   : > { %2967 = dma.hbm_to_vmem [thread:$0]  (!%p3451_p2), %s3447_s28, 1024, %s3449_s30, %s3455_s14, %s4126_s26, %s4126_s26, %s4125_s24  }
  0x4c   : > { %p4127_p1 = scmp.ne.s32.totalorder %s4120_s17, 0 }
  0x4d   : > { %s3482_s25 = sand.u32 (!%p4127_p1), 1, %s3227_s12   ;;  %p4128_p4 = scmp.ne.s32.totalorder (!%p4127_p1), %s4118_s15, 0 }
  0x4e   : > { %332 = sbr.rel (%p4127_p1) target bundleno = 1161 (0x489), region = 56  ;;  %s2933_s5 = sshll.u32 (!%p4127_p1), %s3482_s25, 6 }
  0x4f   : > { %s335_s23 = scalar_lea.sflag (!%p4127_p1), [#allocation4], %s3482_s25  ;;  %s338_s18 = scalar_lea.vmem (!%p4127_p1), [#allocation3], %s2933_s5 }
  0x53   : > { %3210 = dma.done.wait (%p4128_p4), %s335_s23, 1024  }
  0x54   : > { %3212 = vsyncadd (%p4128_p4), %s335_s23, 4294966272  ;;  %p4129_p6 = scmp.eq.s32.totalorder %s3368_s8, 0 }
  0x56   : > { %3214 = dma.done.wait (%p4129_p6), [#allocation7], 3584   ;;  %p4130_p8 = pmov %p4129_p6 }
  0x57   : > { %v3496_v0 = vld [vmem:[%s338_s18 + $0x20] sm:$0xff]  ;;  %v3498_v1 = vld [vmem:[%s338_s18 + $0x28] sm:$0xff]  ;;  %v3506_v5 = vld [vmem:[%s338_s18 + $0x30] sm:$0xff]  ;;  %v421_v16 = vlaneseq  ;;  %vm432_vm0 = vcmask 130112   ;;  %vm439_vm1 = vcmask 195712   ;;  %vm446_vm2 = vcmask 261312  }
  0x58   : > { %3216 = vsyncadd (%p4130_p8), [#allocation7], 4294963712  ;;  %v3500_v2 = vld [vmem:[%s338_s18] sm:$0xff]  ;;  %v395_v3 = vadd.f32 %v3498_v1, %v3496_v0  ;;  %v3504_v4 = vld [vmem:[%s338_s18 + $0x8] sm:$0xff]  ;;  %v411_v15 = vmax.f32 %v3496_v0, %v3498_v1  ;;  %vm473_vm3 = vcmask 1040384   ;;  %vm529_vm4 = vcmask 15360  }
  0x59   : > { %v3508_v6 = vld [vmem:[%s338_s18 + $0x38] sm:$0xff]  ;;  %v389_v7 = vadd.f32 %v3504_v4, %v3500_v2  ;;  %v3512_v8 = vld [vmem:[%s338_s18 + $0x10] sm:$0xff]  ;;  %v405_v13 = vmax.f32 %v3500_v2, %v3504_v4  ;;  %v3528_v17 = vand.u32 127, %v421_v16  ;;  %v3531_v20 = vshrl.u32 %v421_v16, 7  ;;  %v476_v57 = vld [vmem:[%s4102_s1 + $0x8] sm:$0xff]  ;;  %s3243_s21 = smov 51  }
  0x5a   : > { %v3514_v9 = vld [vmem:[%s338_s18 + $0x18] sm:$0xff]  ;;  %396 = vadd.xlane.f32.xlu1 %v395_v3  ;;  %v398_v10 = vadd.f32 %v3508_v6, %v3506_v5  ;;  %v414_v14 = vmax.f32 %v3506_v5, %v3508_v6  ;;  %v475_v58 = vld [vmem:[%s4102_s1] sm:$0xff]  ;;  %v477_v63 = vld [vmem:[%s4102_s1 + $0x10] sm:$0xff]  ;;  %s3244_s22 = smov 50   ;;  %s3245_s24 = smov 49  }
  0x5b   : > { %390 = vadd.xlane.f32.xlu0 %v389_v7  ;;  %v392_v11 = vadd.f32 %v3514_v9, %v3512_v8  ;;  %v408_v12 = vmax.f32 %v3512_v8, %v3514_v9  ;;  %v427_v19 = vadd.s32 4294967288, %v3528_v17  ;;  %v434_v22 = vadd.s32 4294967280, %v3528_v17  ;;  %s3246_s26 = smov 48   ;;  %s3247_s23 = smov 47  }
  0x5c   : > { %v425_v25 = vsub.s32 %v3528_v17, %v3531_v20  ;;  %v441_v27 = vadd.s32 4294967272, %v3528_v17  ;;  %v3543_v49 = vsub.s32 0, %v3531_v20  ;;  %v504_v55 = vsub.s32 1, %v3531_v20  ;;  %s3248_s18 = smov 46   ;;  %s3249_s15 = smov 45  }
  0x5d   : > { %v430_v24 = vsub.s32 %v427_v19, %v3531_v20  ;;  %v437_v30 = vsub.s32 %v434_v22, %v3531_v20  ;;  %s3250_s17 = smov 35   ;;  %s3251_s28 = smov 34   ;;  %vm737_vm5 = vcmp.lt.s32.totalorder %v3528_v17, 51  ;;  %vm777_vm6 = vcmp.lt.s32.totalorder %v3528_v17, 50 }
  0x5e   : > { %399 = vadd.xlane.f32.xlu1 %v398_v10  ;;  %v444_v35 = vsub.s32 %v441_v27, %v3531_v20  ;;  %s3252_s30 = smov 33   ;;  %s3253_s14 = smov 32   ;;  %vm819_vm7 = vcmp.lt.s32.totalorder %v3528_v17, 49  ;;  %vm861_vm8 = vcmp.lt.s32.totalorder %v3528_v17, 48  ;;  %vm903_vm9 = vcmp.lt.s32.totalorder %v3528_v17, 47 }
  0x5f   : > { %393 = vadd.xlane.f32.xlu0 %v392_v11  ;;  %s3254_s27 = smov 31   ;;  %s3255_s29 = smov 30   ;;  %vm945_vm10 = vcmp.lt.s32.totalorder %v3528_v17, 46  ;;  %vm987_vm11 = vcmp.lt.s32.totalorder %v3528_v17, 45  ;;  %vm1029_vm12 = vcmp.lt.s32.totalorder %v3528_v17, 35  ;;  %vm1071_vm13 = vcmp.lt.s32.totalorder %v3528_v17, 34 }
  0x60   : > { %vm1113_vm14 = vcmp.lt.s32.totalorder %v3528_v17, 33  ;;  %vm1155_vm15 = vcmp.lt.s32.totalorder %v3528_v17, 32  ;;  %p4131_p2 = scmp.ne.s32.totalorder %s4123_s19, 0 }
  0x62   : > { %409 = vmax.xlane.f32.xlu1 %v408_v12 }
  0x63   : > { %406 = vmax.xlane.f32.xlu0 %v405_v13  ;;  %v478_v13 = vld [vmem:[%s4102_s1 + $0x18] sm:$0xff] }
  0x66   : > { %415 = vmax.xlane.f32.xlu1 %v414_v14 }
  0x67   : > { %412 = vmax.xlane.f32.xlu0 %v411_v15 }
  0xe3   : > { %v397_v18 = vpop.xlane.xlu1 %396 }
  0xe4   : > { %v391_v21 = vpop.xlane.xlu0 %390  ;;  %v403_v31 = vmul.f32 0.00390625, %v397_v18 }
  0xe5   : > { %v401_v26 = vmul.f32 0.00390625, %v391_v21 }
  0xe6   : > { %v438_v41 = vrot.slane %v403_v31, %v437_v30 }
  0xe7   : > { %v400_v23 = vpop.xlane.xlu1 %399  ;;  %v426_v34 = vrot.slane %v401_v26, %v425_v25 }
  0xe8   : > { %v394_v28 = vpop.xlane.xlu0 %393  ;;  %v404_v36 = vmul.f32 0.00390625, %v400_v23 }
  0xe9   : > { %v402_v29 = vmul.f32 0.00390625, %v394_v28 }
  0xea   : > { %v445_v43 = vrot.slane %v404_v36, %v444_v35 }
  0xeb   : > { %v431_v32 = vrot.slane %v402_v29, %v430_v24  ;;  %v410_v33 = vpop.xlane.xlu1 %409 }
  0xec   : > { %v407_v37 = vpop.xlane.xlu0 %406  ;;  %v460_v39 = vrot.slane %v410_v33, %v430_v24 }
  0xed   : > { %v433_v38 = vsel %vm432_vm0, %v431_v32, %v426_v34  ;;  %v456_v40 = vrot.slane %v407_v37, %v425_v25 }
  0xee   : > { %v440_v46 = vsel %vm439_vm1, %v438_v41, %v433_v38 }
  0xef   : > { %v416_v42 = vpop.xlane.xlu1 %415  ;;  %v461_v48 = vsel %vm432_vm0, %v460_v39, %v456_v40  ;;  %v447_v52 = vsel %vm446_vm2, %v445_v43, %v440_v46  ;;  %v2937_v43 = vld [vmem:[%s4104_s3] ss:$0 sm:$0xff]  ;;  %vm1197_vm0 = vcmp.lt.s32.totalorder %v3528_v17, 31 }
  0xf0   : > { %v413_v44 = vpop.xlane.xlu0 %412  ;;  %v470_v45 = vrot.slane %v416_v42, %v444_v35 }
  0xf1   : > { %v465_v47 = vrot.slane %v413_v44, %v437_v30 }
  0xf3   : > { %v466_v50 = vsel %vm439_vm1, %v465_v47, %v461_v48  ;;  %vm1239_vm1 = vcmp.lt.s32.totalorder %v3528_v17, 30 }
  0xf4   : > { %v471_v51 = vsel %vm446_vm2, %v470_v45, %v466_v50  ;;  %vm1281_vm2 = vcmp.lt.s32.totalorder %v3528_v17, 29 }
  0xf5   : > { %v474_v53 = vsel %vm473_vm3, %v447_v52, %v471_v51  ;;  %v480_v51 = vld [vmem:[%s4103_s2 + $0x8] sm:$0xff]  ;;  %v479_v52 = vld [vmem:[%s4103_s2] sm:$0xff] }
  0xf6   : > { %v486_v54 = vrot.slane %v474_v53, %v3543_v49  ;;  %v505_v56 = vrot.slane %v474_v53, %v504_v55 }
  0xf8   : > { %492 = vbcast.lane.b32.xlu1 %v486_v54, 264  ;;  %488 = vbcast.lane.b32.xlu0 %v486_v54, 256 }
  0xfc   : > { %507 = vbcast.lane.b32.xlu1 %v505_v56, 256  ;;  %496 = vbcast.lane.b32.xlu0 %v486_v54, 272 }
 0x100   : > { %511 = vbcast.lane.b32.xlu1 %v505_v56, 264  ;;  %500 = vbcast.lane.b32.xlu0 %v486_v54, 280 }
 0x104   : > { %515 = vbcast.lane.b32.xlu1 %v505_v56, 272 }
 0x108   : > { %519 = vbcast.lane.b32.xlu1 %v505_v56, 280 }
 0x16a   : > { %v493_v59 = vpop.permute.xlu1 %492  ;;  %v489_v60 = vpop.permute.xlu0 %488 }
 0x16b   : > { %v522_v61 = vmul.f32 %v493_v59, %v476_v57  ;;  %v521_v62 = vmul.f32 %v489_v60, %v475_v58 }
 0x16d   : > { %v531_v10 = vsel %vm529_vm4, %v522_v61, 0.0  ;;  %v530_v11 = vsel %vm529_vm4, %v521_v62, 0.0 }
 0x16e   : > { %v508_v3 = vpop.permute.xlu1 %507  ;;  %v497_v7 = vpop.permute.xlu0 %496  ;;  %v532_v15 = vadd.f32 %v531_v10, %v530_v11 }
 0x16f   : > { %v523_v12 = vmul.f32 %v497_v7, %v477_v63  ;;  %v525_v23 = vmul.f32 %v508_v3, %v475_v58  ;;  %v481_v3 = vld [vmem:[%s4103_s2 + $0x10] sm:$0xff] }
 0x171   : > { %v533_v14 = vsel %vm529_vm4, %v523_v12, 0.0  ;;  %v543_v30 = vsel %vm529_vm4, %v525_v23, 0.0 }
 0x172   : > { %v512_v16 = vpop.permute.xlu1 %511  ;;  %v501_v18 = vpop.permute.xlu0 %500  ;;  %v534_v22 = vadd.f32 %v533_v14, %v532_v15 }
 0x173   : > { %v526_v19 = vmul.f32 %v512_v16, %v476_v57  ;;  %v524_v21 = vmul.f32 %v501_v18, %v478_v13  ;;  %v482_v16 = vld [vmem:[%s4103_s2 + $0x18] sm:$0xff]  ;;  %v611_v18 = vld [vmem:[%s4105_s4] sm:$0x1] }
 0x175   : > { %v535_v24 = vsel %vm529_vm4, %v524_v21, 0.0  ;;  %v544_v27 = vsel %vm529_vm4, %v526_v19, 0.0 }
 0x176   : > { %v536_v25 = vadd.f32 %v535_v24, %v534_v22  ;;  %v516_v26 = vpop.permute.xlu1 %515  ;;  %v545_v32 = vadd.f32 %v544_v27, %v543_v30  ;;  %v612_v22 = vmul.f32 2.0, %v611_v18 }
 0x177   : > { %v527_v28 = vmul.f32 %v516_v26, %v477_v63 }
 0x178   : > { %v537_v29 = vrot.slane %v536_v25, 4  ;;  %v617_v24 = vrot.slane %v612_v22, %v3543_v49 }
 0x179   : > { %v546_v31 = vsel %vm529_vm4, %v527_v28, 0.0 }
 0x17a   : > { %v538_v33 = vadd.f32 %v537_v29, %v536_v25  ;;  %v520_v34 = vpop.permute.xlu1 %519  ;;  %v547_v37 = vadd.f32 %v546_v31, %v545_v32  ;;  %v3242_v25 = vmov 0  }
 0x17b   : > { %v528_v35 = vmul.f32 %v520_v34, %v478_v13  ;;  %3066 = vset.pattern.permute.xlu1 %v3242_v25  ;;  %3065 = vset.pattern.permute.xlu0 %v3242_v25 }
 0x17c   : > { %v539_v36 = vrot.slane %v538_v33, 2 }
 0x17d   : > { %v548_v38 = vsel %vm529_vm4, %v528_v35, 0.0 }
 0x17e   : > { %v540_v39 = vadd.f32 %v539_v36, %v538_v33  ;;  %v549_v40 = vadd.f32 %v548_v38, %v547_v37 }
 0x180   : > { %v541_v41 = vrot.slane %v540_v39, 1  ;;  %v550_v42 = vrot.slane %v549_v40, 4 }
 0x182   : > { %v542_v44 = vadd.f32 %v541_v41, %v540_v39  ;;  %v551_v45 = vadd.f32 %v550_v42, %v549_v40 }
 0x184   : > { %v563_v46 = vadd.f32 %v2937_v43, %v542_v44  ;;  %v552_v47 = vrot.slane %v551_v45, 2 }
 0x186   : > { %v553_v48 = vadd.f32 %v552_v47, %v551_v45  ;;  %v565_v50 = vmax.f32 %v563_v46, 0.0 }
 0x188   : > { %v554_v53 = vrot.slane %v553_v48, 1  ;;  %v570_v54 = vrot.slane %v565_v50, %v3543_v49 }
 0x18a   : > { %v555_v56 = vadd.f32 %v554_v53, %v553_v48  ;;  %v576_v57 = vmul.f32 %v570_v54, %v480_v51  ;;  %v575_v58 = vmul.f32 %v570_v54, %v479_v52  ;;  %v577_v15 = vmul.f32 %v570_v54, %v481_v3 }
 0x18b   : > { %v578_v21 = vmul.f32 %v570_v54, %v482_v16 }
 0x18c   : > { %v564_v59 = vadd.f32 %v2937_v43, %v555_v56  ;;  %v586_v60 = vsel %vm529_vm4, %v576_v57, 0.0  ;;  %v583_v61 = vsel %vm529_vm4, %v575_v58, 0.0  ;;  %v589_v19 = vsel %vm529_vm4, %v577_v15, 0.0 }
 0x18d   : > { %587 = vadd.xlane.f32.xlu1 %v586_v60  ;;  %584 = vadd.xlane.f32.xlu0 %v583_v61  ;;  %v592_v23 = vsel %vm529_vm4, %v578_v21, 0.0 }
 0x18e   : > { %v566_v62 = vmax.f32 %v564_v59, 0.0 }
 0x190   : > { %v574_v63 = vrot.slane %v566_v62, %v3543_v49 }
 0x192   : > { %v581_v7 = vmul.f32 %v574_v63, %v481_v3  ;;  %v579_v10 = vmul.f32 %v574_v63, %v479_v52  ;;  %v580_v13 = vmul.f32 %v574_v63, %v480_v51  ;;  %v582_v26 = vmul.f32 %v574_v63, %v482_v16 }
 0x194   : > { %v601_v11 = vsel %vm529_vm4, %v581_v7, 0.0  ;;  %v595_v12 = vsel %vm529_vm4, %v579_v10, 0.0  ;;  %v598_v14 = vsel %vm529_vm4, %v580_v13, 0.0  ;;  %v604_v27 = vsel %vm529_vm4, %v582_v26, 0.0 }
 0x195   : > { %602 = vadd.xlane.f32.xlu1 %v601_v11  ;;  %596 = vadd.xlane.f32.xlu0 %v595_v12  ;;  %vm1365_vm4 = vcmp.lt.s32.totalorder %v3528_v17, 18 }
 0x199   : > { %599 = vadd.xlane.f32.xlu0 %v598_v14 }
 0x19d   : > { %590 = vadd.xlane.f32.xlu0 %v589_v19 }
 0x1a1   : > { %593 = vadd.xlane.f32.xlu0 %v592_v23 }
 0x1a6   : > { %623 = vbcast.lane.b32.xlu1 %v617_v24, 264 }
 0x1aa   : > { %627 = vbcast.lane.b32.xlu1 %v617_v24, 272 }
 0x1b7   : > { %619 = vbcast.lane.b32.xlu0 %v617_v24, 256 }
 0x1ce   : > { %605 = vadd.xlane.f32.xlu1 %v604_v27 }
 0x1df   : > { %631 = vbcast.lane.b32.xlu1 %v617_v24, 280 }
 0x216   : > { %v588_v28 = vpop.xlane.xlu1 %587  ;;  %v585_v29 = vpop.xlane.xlu0 %584 }
 0x21e   : > { %v603_v30 = vpop.xlane.xlu1 %602  ;;  %v597_v31 = vpop.xlane.xlu0 %596 }
 0x21f   : > { %v607_v44 = vadd.f32 %v597_v31, %v585_v29 }
 0x222   : > { %v624_v32 = vpop.permute.xlu1 %623  ;;  %v600_v33 = vpop.xlane.xlu0 %599 }
 0x223   : > { %v608_v34 = vadd.f32 %v600_v33, %v588_v28 }
 0x225   : > { %v638_v35 = vadd.f32 %v624_v32, %v608_v34 }
 0x226   : > { %v591_v36 = vpop.xlane.xlu0 %590  ;;  %v628_v39 = vpop.permute.xlu1 %627 }
 0x227   : > { %v642_v37 = vsub.f32 0.0, %v638_v35  ;;  %v609_v38 = vadd.f32 %v603_v30, %v591_v36 }
 0x229   : > { %v647_v40 = vmul.f32 1.442695, %v642_v37  ;;  %v639_v41 = vadd.f32 %v628_v39, %v609_v38 }
 0x22a   : > { %v594_v42 = vpop.xlane.xlu0 %593 }
 0x22b   : > { %3067 = vpow2.f32 %v647_v40  ;;  %v643_v43 = vsub.f32 0.0, %v639_v41 }
 0x22d   : > { %v649_v45 = vmul.f32 1.442695, %v643_v43 }
 0x22e   : > { %v620_v46 = vpop.permute.xlu0 %619 }
 0x22f   : > { %3069 = vpow2.f32 %v649_v45  ;;  %v637_v47 = vadd.f32 %v620_v46, %v607_v44 }
 0x231   : > { %v641_v48 = vsub.f32 0.0, %v637_v47 }
 0x233   : > { %v645_v50 = vmul.f32 1.442695, %v641_v48 }
 0x235   : > { %3071 = vpow2.f32 %v645_v50 }
 0x238   : > { %v3068_v51 = vpop.eup %3067 }
 0x239   : > { %v654_v52 = vadd.f32 1.0, %v3068_v51 }
 0x23b   : > { %3073 = vrcp.f32 %v654_v52 }
 0x23c   : > { %v3070_v53 = vpop.eup %3069 }
 0x23d   : > { %v655_v54 = vadd.f32 1.0, %v3070_v53 }
 0x23f   : > { %3075 = vrcp.f32 %v655_v54 }
 0x242   : > { %v3072_v56 = vpop.eup %3071 }
 0x243   : > { %v653_v57 = vadd.f32 1.0, %v3072_v56 }
 0x245   : > { %3077 = vrcp.f32 %v653_v57 }
 0x248   : > { %v3074_v58 = vpop.eup %3073 }
 0x249   : > { %672 = vperm.xlu1 %3066, %v3074_v58  }
 0x24c   : > { %v3076_v59 = vpop.eup %3075 }
 0x24d   : > { %677 = vperm.xlu1 %3066, %v3076_v59  }
 0x252   : > { %v3078_v60 = vpop.eup %3077 }
 0x253   : > { %667 = vperm.xlu0 %3065, %v3078_v60  }
 0x257   : > { %v606_v61 = vpop.xlane.xlu1 %605 }
 0x258   : > { %v610_v62 = vadd.f32 %v606_v61, %v594_v42 }
 0x25b   : > { %v632_v63 = vpop.permute.xlu1 %631 }
 0x25c   : > { %v640_v3 = vadd.f32 %v632_v63, %v610_v62  ;;  %v3270_v62 = vmov 1966171168  }
 0x25d   : > { %v746_v63 = vunpack.c.l.s4 %v3270_v62 }
 0x25e   : > { %v644_v7 = vsub.f32 0.0, %v640_v3 }
 0x25f   : > { %v747_v3 = vunpack.c.0.s8 %v746_v63 }
 0x260   : > { %v651_v10 = vmul.f32 1.442695, %v644_v7 }
 0x262   : > { %3079 = vpow2.f32 %v651_v10 }
 0x26f   : > { %v3080_v11 = vpop.eup %3079 }
 0x270   : > { %v656_v12 = vadd.f32 1.0, %v3080_v11 }
 0x272   : > { %3081 = vrcp.f32 %v656_v12 }
 0x27f   : > { %v3082_v13 = vpop.eup %3081 }
 0x280   : > { %682 = vperm.xlu0 %3065, %v3082_v13   ;;  %v3707_v13 = vsub.s32 %v747_v3, %v3531_v20 }
 0x2c4   : > { %v673_v14 = vpop.permute.xlu1 %672 }
 0x2c5   : > { %v3606_v19 = vmul.f32 %v673_v14, %v3512_v8  ;;  %v3609_v21 = vmul.f32 %v673_v14, %v3514_v9 }
 0x2c8   : > { %v678_v22 = vpop.permute.xlu1 %677 }
 0x2c9   : > { %v3616_v25 = vmul.f32 %v678_v22, %v3496_v0 }
 0x2ce   : > { %v668_v15 = vpop.permute.xlu0 %667 }
 0x2cf   : > { %v3600_v16 = vmul.f32 %v668_v15, %v3500_v2  ;;  %v3603_v18 = vmul.f32 %v668_v15, %v3504_v4  ;;  %v3619_v2 = vmul.f32 %v678_v22, %v3498_v1 }
 0x2d1   : > { %v693_v23 = vadd.f32 %v3606_v19, %v3600_v16  ;;  %v702_v24 = vadd.f32 %v3609_v21, %v3603_v18  ;;  %v713_v28 = vmax.f32 %v3600_v16, %v3616_v25  ;;  %v722_v0 = vmax.f32 %v3603_v18, %v3619_v2 }
 0x2d3   : > { %v694_v8 = vadd.f32 %v693_v23, %v3616_v25  ;;  %v703_v26 = vadd.f32 %v702_v24, %v3619_v2 }
 0x2fb   : > { %v683_v4 = vpop.permute.xlu0 %682 }
 0x2fc   : > { %v3624_v9 = vmul.f32 %v683_v4, %v3506_v5  ;;  %v3627_v27 = vmul.f32 %v683_v4, %v3508_v6 }
 0x2fe   : > { %v695_v1 = vadd.f32 %v694_v8, %v3624_v9  ;;  %v704_v29 = vadd.f32 %v703_v26, %v3627_v27  ;;  %v714_v30 = vmax.f32 %v3606_v19, %v3624_v9  ;;  %v723_v5 = vmax.f32 %v3609_v21, %v3627_v27  ;;  %v740_v8 = vld [vmem:[#allocation6] ss:$8 sm:$0x3] }
 0x300   : > { %v696_v31 = vrot.slane %v695_v1, 4  ;;  %v705_v32 = vrot.slane %v704_v29, 4  ;;  %v715_v6 = vmax.f32 %v713_v28, %v714_v30  ;;  %v724_v33 = vmax.f32 %v722_v0, %v723_v5 }
 0x302   : > { %v697_v34 = vadd.f32 %v696_v31, %v695_v1  ;;  %v706_v35 = vadd.f32 %v705_v32, %v704_v29  ;;  %v716_v36 = vrot.slane %v715_v6, 4  ;;  %v725_v37 = vrot.slane %v724_v33, 4  ;;  %v741_v1 = vld [vmem:[#allocation8] ss:$8 sm:$0x3] }
 0x304   : > { %v698_v38 = vrot.slane %v697_v34, 2  ;;  %v707_v39 = vrot.slane %v706_v35, 2  ;;  %v717_v40 = vmax.f32 %v715_v6, %v716_v36  ;;  %v726_v41 = vmax.f32 %v724_v33, %v725_v37  ;;  %v781_v6 = vld [vmem:[#allocation6 + $0x1] ss:$8 sm:$0x3] }
 0x306   : > { %v699_v42 = vadd.f32 %v698_v38, %v697_v34  ;;  %v708_v43 = vadd.f32 %v707_v39, %v706_v35  ;;  %v718_v44 = vrot.slane %v717_v40, 2  ;;  %v727_v45 = vrot.slane %v726_v41, 2  ;;  %v783_v39 = vld [vmem:[#allocation8 + $0x1] ss:$8 sm:$0x3] }
 0x308   : > { %v700_v46 = vrot.slane %v699_v42, 1  ;;  %v709_v47 = vrot.slane %v708_v43, 1  ;;  %v719_v48 = vmax.f32 %v717_v40, %v718_v44  ;;  %v728_v50 = vmax.f32 %v726_v41, %v727_v45 }
 0x30a   : > { %v701_v51 = vadd.f32 %v700_v46, %v699_v42  ;;  %v710_v52 = vadd.f32 %v709_v47, %v708_v43  ;;  %v720_v53 = vrot.slane %v719_v48, 1  ;;  %v729_v54 = vrot.slane %v728_v50, 1  ;;  %v823_v46 = vld [vmem:[#allocation6 + $0x2] ss:$8 sm:$0x3] }
 0x30c   : > { %v711_v56 = vmul.f32 0.03125, %v701_v51  ;;  %v712_v57 = vmul.f32 0.03125, %v710_v52  ;;  %v721_v58 = vmax.f32 %v719_v48, %v720_v53  ;;  %v730_v59 = vmax.f32 %v728_v50, %v729_v54  ;;  %v825_v54 = vld [vmem:[#allocation8 + $0x2] ss:$8 sm:$0x3] }
 0x30e   : > { %v3640_v60 = vsel %vm473_vm3, %v711_v56, %v721_v58  ;;  %v3643_v61 = vsel %vm473_vm3, %v712_v57, %v730_v59  ;;  %vm1323_vm3 = vcmp.lt.s32.totalorder %v3528_v17, 19 }
 0x30f   : > { %735 = vrot.lane.b32.xlu0 %v3643_v61, %s3243_s21  ;;  %733 = vrot.lane.b32.xlu1 %v3640_v60, %s3243_s21  ;;  %s3256_s21 = smov 29  }
 0x313   : > { %775 = vrot.lane.b32.xlu0 %v3643_v61, %s3244_s22  ;;  %773 = vrot.lane.b32.xlu1 %v3640_v60, %s3244_s22  ;;  %s3257_s22 = smov 19  }
 0x317   : > { %817 = vrot.lane.b32.xlu0 %v3643_v61, %s3245_s24  ;;  %815 = vrot.lane.b32.xlu1 %v3640_v60, %s3245_s24  ;;  %s3258_s24 = smov 18  }
 0x31b   : > { %859 = vrot.lane.b32.xlu0 %v3643_v61, %s3246_s26  ;;  %857 = vrot.lane.b32.xlu1 %v3640_v60, %s3246_s26  ;;  %s3259_s26 = smov 17  }
 0x31f   : > { %901 = vrot.lane.b32.xlu0 %v3643_v61, %s3247_s23  ;;  %899 = vrot.lane.b32.xlu1 %v3640_v60, %s3247_s23  ;;  %s3260_s23 = smov 16  }
 0x323   : > { %943 = vrot.lane.b32.xlu0 %v3643_v61, %s3248_s18  ;;  %941 = vrot.lane.b32.xlu1 %v3640_v60, %s3248_s18  ;;  %s3261_s18 = smov 15  }
 0x327   : > { %985 = vrot.lane.b32.xlu0 %v3643_v61, %s3249_s15  ;;  %983 = vrot.lane.b32.xlu1 %v3640_v60, %s3249_s15  ;;  %s3262_s15 = smov 14  }
 0x32b   : > { %1027 = vrot.lane.b32.xlu0 %v3643_v61, %s3250_s17  ;;  %1025 = vrot.lane.b32.xlu1 %v3640_v60, %s3250_s17  ;;  %s3263_s17 = smov 13  }
 0x32f   : > { %1069 = vrot.lane.b32.xlu0 %v3643_v61, %s3251_s28  ;;  %1067 = vrot.lane.b32.xlu1 %v3640_v60, %s3251_s28  ;;  %s3264_s28 = smov 3  }
 0x333   : > { %1111 = vrot.lane.b32.xlu0 %v3643_v61, %s3252_s30  ;;  %1109 = vrot.lane.b32.xlu1 %v3640_v60, %s3252_s30  ;;  %s3265_s30 = smov 2  }
 0x337   : > { %1153 = vrot.lane.b32.xlu0 %v3643_v61, %s3253_s14  ;;  %1151 = vrot.lane.b32.xlu1 %v3640_v60, %s3253_s14  ;;  %s3266_s14 = smov 1  }
 0x33b   : > { %1195 = vrot.lane.b32.xlu0 %v3643_v61, %s3254_s27  ;;  %1193 = vrot.lane.b32.xlu1 %v3640_v60, %s3254_s27  ;;  %s3267_s27 = smov 127  }
 0x33f   : > { %1237 = vrot.lane.b32.xlu0 %v3643_v61, %s3255_s29  ;;  %1235 = vrot.lane.b32.xlu1 %v3640_v60, %s3255_s29  ;;  %s3268_s29 = smov 126  }
 0x343   : > { %1279 = vrot.lane.b32.xlu0 %v3643_v61, %s3256_s21  ;;  %1277 = vrot.lane.b32.xlu1 %v3640_v60, %s3256_s21  ;;  %s3269_s21 = smov 125  }
 0x347   : > { %1321 = vrot.lane.b32.xlu0 %v3643_v61, %s3257_s22  ;;  %1319 = vrot.lane.b32.xlu1 %v3640_v60, %s3257_s22  ;;  %s3271_s22 = smov 115  }
 0x34b   : > { %1363 = vrot.lane.b32.xlu0 %v3643_v61, %s3258_s24  ;;  %1361 = vrot.lane.b32.xlu1 %v3640_v60, %s3258_s24  ;;  %s3272_s24 = smov 114  }
 0x34f   : > { %1405 = vrot.lane.b32.xlu0 %v3643_v61, %s3259_s26  ;;  %1403 = vrot.lane.b32.xlu1 %v3640_v60, %s3259_s26  ;;  %s3273_s26 = smov 113  }
 0x353   : > { %1447 = vrot.lane.b32.xlu0 %v3643_v61, %s3260_s23  ;;  %1445 = vrot.lane.b32.xlu1 %v3640_v60, %s3260_s23 }
 0x357   : > { %1489 = vrot.lane.b32.xlu0 %v3643_v61, %s3261_s18  ;;  %1487 = vrot.lane.b32.xlu1 %v3640_v60, %s3261_s18  ;;  %s3274_s18 = smov 112  }
 0x35b   : > { %1531 = vrot.lane.b32.xlu0 %v3643_v61, %s3262_s15  ;;  %1529 = vrot.lane.b32.xlu1 %v3640_v60, %s3262_s15  ;;  %s3275_s15 = smov 111  }
 0x35f   : > { %1573 = vrot.lane.b32.xlu0 %v3643_v61, %s3263_s17  ;;  %1571 = vrot.lane.b32.xlu1 %v3640_v60, %s3263_s17  ;;  %s3276_s17 = smov 110  }
 0x363   : > { %1615 = vrot.lane.b32.xlu0 %v3643_v61, %s3264_s28  ;;  %1613 = vrot.lane.b32.xlu1 %v3640_v60, %s3264_s28  ;;  %s3277_s28 = smov 109  }
 0x367   : > { %1657 = vrot.lane.b32.xlu0 %v3643_v61, %s3265_s30  ;;  %1655 = vrot.lane.b32.xlu1 %v3640_v60, %s3265_s30  ;;  %s3278_s30 = smov 99  }
 0x36b   : > { %1699 = vrot.lane.b32.xlu0 %v3643_v61, %s3266_s14  ;;  %1697 = vrot.lane.b32.xlu1 %v3640_v60, %s3266_s14  ;;  %s3279_s14 = smov 98  }
 0x36f   : > { %1776 = vrot.lane.b32.xlu0 %v3643_v61, %s3267_s27  ;;  %1774 = vrot.lane.b32.xlu1 %v3640_v60, %s3267_s27  ;;  %s3280_s27 = smov 97  }
 0x373   : > { %1818 = vrot.lane.b32.xlu0 %v3643_v61, %s3268_s29  ;;  %1816 = vrot.lane.b32.xlu1 %v3640_v60, %s3268_s29  ;;  %s3281_s29 = smov 96  }
 0x377   : > { %1860 = vrot.lane.b32.xlu0 %v3643_v61, %s3269_s21  ;;  %1858 = vrot.lane.b32.xlu1 %v3640_v60, %s3269_s21  ;;  %s3282_s21 = smov 95  }
 0x37b   : > { %1902 = vrot.lane.b32.xlu0 %v3643_v61, %s3271_s22  ;;  %1900 = vrot.lane.b32.xlu1 %v3640_v60, %s3271_s22  ;;  %s3283_s22 = smov 94  }
 0x37f   : > { %1944 = vrot.lane.b32.xlu0 %v3643_v61, %s3272_s24  ;;  %1942 = vrot.lane.b32.xlu1 %v3640_v60, %s3272_s24  ;;  %s3284_s24 = smov 93  }
 0x381   : > { %v736_v7 = vpop.permute.xlu0 %735  ;;  %v734_v10 = vpop.permute.xlu1 %733 }
 0x382   : > { %v738_v11 = vsel %vm737_vm5, %v734_v10, %v736_v7  ;;  %v739_v12 = vsel %vm737_vm5, %v736_v7, %v734_v10  ;;  %vm1407_vm5 = vcmp.lt.s32.totalorder %v3528_v17, 17 }
 0x383   : > { %v744_v14 = vcombine.low %v739_v12, %v738_v11  ;;  %1986 = vrot.lane.b32.xlu0 %v3643_v61, %s3273_s26  ;;  %1984 = vrot.lane.b32.xlu1 %v3640_v60, %s3273_s26  ;;  %s3285_s26 = smov 83  }
 0x385   : > { %v751_v15 = vrot.slane %v744_v14, %v3707_v13  ;;  %v776_v22 = vpop.permute.xlu0 %775  ;;  %v774_v23 = vpop.permute.xlu1 %773  ;;  %v865_v14 = vld [vmem:[#allocation6 + $0x3] ss:$8 sm:$0x3] }
 0x386   : > { %v778_v24 = vsel %vm777_vm6, %v774_v23, %v776_v22  ;;  %v779_v4 = vsel %vm777_vm6, %v776_v22, %v774_v23  ;;  %vm1449_vm6 = vcmp.lt.s32.totalorder %v3528_v17, 16 }
 0x387   : > { %v758_v26 = vrot.slane %v751_v15, %v3707_v13  ;;  %v762_v28 = vcombine.high %v751_v15, %v751_v15  ;;  %v786_v0 = vcombine.low %v779_v4, %v778_v24  ;;  %2028 = vrot.lane.b32.xlu0 %v3643_v61, %s3274_s18  ;;  %2026 = vrot.lane.b32.xlu1 %v3640_v60, %s3274_s18  ;;  %v867_v4 = vld [vmem:[#allocation8 + $0x3] ss:$8 sm:$0x3]  ;;  %s3286_s18 = smov 82  }
 0x389   : > { %v769_v29 = vrot.slane %v762_v28, %v3707_v13  ;;  %v793_v30 = vrot.slane %v786_v0, %v3707_v13  ;;  %v818_v5 = vpop.permute.xlu0 %817  ;;  %v816_v31 = vpop.permute.xlu1 %815  ;;  %v760_v32 = vmul.f32 %v758_v26, %v740_v8 }
 0x38a   : > { %v820_v33 = vsel %vm819_vm7, %v816_v31, %v818_v5  ;;  %v821_v34 = vsel %vm819_vm7, %v818_v5, %v816_v31  ;;  %vm1491_vm7 = vcmp.lt.s32.totalorder %v3528_v17, 15 }
 0x38b   : > { %v771_v35 = vmul.f32 %v769_v29, %v741_v1  ;;  %v800_v36 = vrot.slane %v793_v30, %v3707_v13  ;;  %v804_v37 = vcombine.high %v793_v30, %v793_v30  ;;  %v828_v38 = vcombine.low %v821_v34, %v820_v33  ;;  %2070 = vrot.lane.b32.xlu0 %v3643_v61, %s3275_s15  ;;  %v907_v29 = vld [vmem:[#allocation6 + $0x4] ss:$8 sm:$0x3] }
 0x38c   : > { %2068 = vrot.lane.b32.xlu1 %v3640_v60, %s3275_s15  ;;  %s3287_s15 = smov 81  }
 0x38d   : > { %v772_v40 = vadd.f32 %v771_v35, %v760_v32  ;;  %v802_v41 = vmul.f32 %v800_v36, %v781_v6  ;;  %v811_v42 = vrot.slane %v804_v37, %v3707_v13  ;;  %v835_v43 = vrot.slane %v828_v38, %v3707_v13  ;;  %v860_v44 = vpop.permute.xlu0 %859  ;;  %v858_v45 = vpop.permute.xlu1 %857  ;;  %v909_v35 = vld [vmem:[#allocation8 + $0x4] ss:$8 sm:$0x3] }
 0x38e   : > { %v862_v47 = vsel %vm861_vm8, %v858_v45, %v860_v44  ;;  %v863_v48 = vsel %vm861_vm8, %v860_v44, %v858_v45  ;;  %vm1533_vm8 = vcmp.lt.s32.totalorder %v3528_v17, 14 }
 0x38f   : > { %v803_v50 = vadd.f32 %v802_v41, %v772_v40  ;;  %v813_v51 = vmul.f32 %v811_v42, %v783_v39  ;;  %v842_v52 = vrot.slane %v835_v43, %v3707_v13  ;;  %v846_v53 = vcombine.high %v835_v43, %v835_v43  ;;  %2112 = vrot.lane.b32.xlu0 %v3643_v61, %s3276_s17  ;;  %v949_v42 = vld [vmem:[#allocation6 + $0x5] ss:$8 sm:$0x3] }
 0x390   : > { %v870_v56 = vcombine.low %v863_v48, %v862_v47  ;;  %2110 = vrot.lane.b32.xlu1 %v3640_v60, %s3276_s17  ;;  %s3288_s17 = smov 80  }
 0x391   : > { %v814_v57 = vadd.f32 %v813_v51, %v803_v50  ;;  %v844_v58 = vmul.f32 %v842_v52, %v823_v46  ;;  %v853_v59 = vrot.slane %v846_v53, %v3707_v13  ;;  %v902_v62 = vpop.permute.xlu0 %901  ;;  %v900_v63 = vpop.permute.xlu1 %899  ;;  %v951_v51 = vld [vmem:[#allocation8 + $0x5] ss:$8 sm:$0x3] }
 0x392   : > { %v877_v3 = vrot.slane %v870_v56, %v3707_v13  ;;  %v904_v7 = vsel %vm903_vm9, %v900_v63, %v902_v62  ;;  %v905_v10 = vsel %vm903_vm9, %v902_v62, %v900_v63  ;;  %vm1575_vm9 = vcmp.lt.s32.totalorder %v3528_v17, 13 }
 0x393   : > { %v845_v11 = vadd.f32 %v844_v58, %v814_v57  ;;  %v855_v12 = vmul.f32 %v853_v59, %v825_v54  ;;  %v912_v15 = vcombine.low %v905_v10, %v904_v7  ;;  %2154 = vrot.lane.b32.xlu0 %v3643_v61, %s3277_s28  ;;  %v991_v59 = vld [vmem:[#allocation6 + $0x6] ss:$8 sm:$0x3] }
 0x394   : > { %v884_v22 = vrot.slane %v877_v3, %v3707_v13  ;;  %v888_v23 = vcombine.high %v877_v3, %v877_v3  ;;  %2152 = vrot.lane.b32.xlu1 %v3640_v60, %s3277_s28  ;;  %s3289_s28 = smov 79  }
 0x395   : > { %v856_v24 = vadd.f32 %v855_v12, %v845_v11  ;;  %v919_v8 = vrot.slane %v912_v15, %v3707_v13  ;;  %v944_v26 = vpop.permute.xlu0 %943  ;;  %v942_v28 = vpop.permute.xlu1 %941 }
 0x396   : > { %v886_v0 = vmul.f32 %v884_v22, %v865_v14  ;;  %v895_v1 = vrot.slane %v888_v23, %v3707_v13  ;;  %v946_v30 = vsel %vm945_vm10, %v942_v28, %v944_v26  ;;  %v947_v5 = vsel %vm945_vm10, %v944_v26, %v942_v28  ;;  %v993_v14 = vld [vmem:[#allocation8 + $0x6] ss:$8 sm:$0x3]  ;;  %v1033_v26 = vld [vmem:[#allocation6 + $0x7] ss:$8 sm:$0x3] }
 0x397   : > { %v926_v31 = vrot.slane %v919_v8, %v3707_v13  ;;  %v930_v32 = vcombine.high %v919_v8, %v919_v8  ;;  %v954_v6 = vcombine.low %v947_v5, %v946_v30  ;;  %2196 = vrot.lane.b32.xlu0 %v3643_v61, %s3278_s30  ;;  %vm1617_vm10 = vcmp.lt.s32.totalorder %v3528_v17, 3 }
 0x398   : > { %v887_v33 = vadd.f32 %v886_v0, %v856_v24  ;;  %v897_v34 = vmul.f32 %v895_v1, %v867_v4  ;;  %2194 = vrot.lane.b32.xlu1 %v3640_v60, %s3278_s30  ;;  %s3290_s30 = smov 78  }
 0x399   : > { %v928_v36 = vmul.f32 %v926_v31, %v907_v29  ;;  %v937_v37 = vrot.slane %v930_v32, %v3707_v13  ;;  %v961_v38 = vrot.slane %v954_v6, %v3707_v13  ;;  %v986_v39 = vpop.permute.xlu0 %985  ;;  %v984_v40 = vpop.permute.xlu1 %983  ;;  %v1035_v32 = vld [vmem:[#allocation8 + $0x7] ss:$8 sm:$0x3] }
 0x39a   : > { %v898_v41 = vadd.f32 %v897_v34, %v887_v33  ;;  %v988_v43 = vsel %vm987_vm11, %v984_v40, %v986_v39  ;;  %v989_v44 = vsel %vm987_vm11, %v986_v39, %v984_v40  ;;  %vm1659_vm11 = vcmp.lt.s32.totalorder %v3528_v17, 2 }
 0x39b   : > { %v939_v45 = vmul.f32 %v937_v37, %v909_v35  ;;  %v968_v46 = vrot.slane %v961_v38, %v3707_v13  ;;  %v972_v47 = vcombine.high %v961_v38, %v961_v38  ;;  %v996_v48 = vcombine.low %v989_v44, %v988_v43  ;;  %2238 = vrot.lane.b32.xlu0 %v3643_v61, %s3279_s14  ;;  %v1075_v38 = vld [vmem:[#allocation6 + $0x10] ss:$8 sm:$0x3] }
 0x39c   : > { %v929_v50 = vadd.f32 %v928_v36, %v898_v41  ;;  %2236 = vrot.lane.b32.xlu1 %v3640_v60, %s3279_s14  ;;  %s3291_s14 = smov 77  }
 0x39d   : > { %v970_v52 = vmul.f32 %v968_v46, %v949_v42  ;;  %v979_v53 = vrot.slane %v972_v47, %v3707_v13  ;;  %v1003_v54 = vrot.slane %v996_v48, %v3707_v13  ;;  %v1028_v56 = vpop.permute.xlu0 %1027  ;;  %v1026_v57 = vpop.permute.xlu1 %1025  ;;  %v1077_v46 = vld [vmem:[#allocation8 + $0x10] ss:$8 sm:$0x3] }
 0x39e   : > { %v940_v58 = vadd.f32 %v939_v45, %v929_v50  ;;  %v1030_v62 = vsel %vm1029_vm12, %v1026_v57, %v1028_v56  ;;  %v1031_v63 = vsel %vm1029_vm12, %v1028_v56, %v1026_v57  ;;  %vm1701_vm12 = vcmp.lt.s32.totalorder %v3528_v17, 1 }
 0x39f   : > { %v981_v3 = vmul.f32 %v979_v53, %v951_v51  ;;  %v1010_v7 = vrot.slane %v1003_v54, %v3707_v13  ;;  %v1014_v10 = vcombine.high %v1003_v54, %v1003_v54  ;;  %v1038_v11 = vcombine.low %v1031_v63, %v1030_v62  ;;  %2280 = vrot.lane.b32.xlu0 %v3643_v61, %s3280_s27  ;;  %v1117_v54 = vld [vmem:[#allocation6 + $0x11] ss:$8 sm:$0x3] }
 0x3a0   : > { %v971_v12 = vadd.f32 %v970_v52, %v940_v58  ;;  %2278 = vrot.lane.b32.xlu1 %v3640_v60, %s3280_s27  ;;  %s2782_s27 = sld [smem:[#allocation2]] }
 0x3a1   : > { %v1012_v15 = vmul.f32 %v1010_v7, %v991_v59  ;;  %v1021_v22 = vrot.slane %v1014_v10, %v3707_v13  ;;  %v1045_v23 = vrot.slane %v1038_v11, %v3707_v13  ;;  %v1070_v24 = vpop.permute.xlu0 %1069  ;;  %v1068_v4 = vpop.permute.xlu1 %1067  ;;  %v1119_v7 = vld [vmem:[#allocation8 + $0x11] ss:$8 sm:$0x3] }
 0x3a2   : > { %v982_v8 = vadd.f32 %v981_v3, %v971_v12  ;;  %v1072_v28 = vsel %vm1071_vm13, %v1068_v4, %v1070_v24  ;;  %v1073_v0 = vsel %vm1071_vm13, %v1070_v24, %v1068_v4  ;;  %vm1778_vm13 = vcmp.lt.s32.totalorder %v3528_v17, 127 }
 0x3a3   : > { %v1023_v1 = vmul.f32 %v1021_v22, %v993_v14  ;;  %v1052_v29 = vrot.slane %v1045_v23, %v3707_v13  ;;  %v1056_v30 = vcombine.high %v1045_v23, %v1045_v23  ;;  %v1080_v5 = vcombine.low %v1073_v0, %v1072_v28  ;;  %2322 = vrot.lane.b32.xlu0 %v3643_v61, %s3281_s29  ;;  %v1159_v23 = vld [vmem:[#allocation6 + $0x12] ss:$8 sm:$0x3] }
 0x3a4   : > { %v1013_v31 = vadd.f32 %v1012_v15, %v982_v8  ;;  %2320 = vrot.lane.b32.xlu1 %v3640_v60, %s3281_s29  ;;  %s2944_s29 = sshll.u32 %s3368_s8, 10 }
 0x3a5   : > { %v1054_v6 = vmul.f32 %v1052_v29, %v1033_v26  ;;  %v1063_v33 = vrot.slane %v1056_v30, %v3707_v13  ;;  %v1087_v34 = vrot.slane %v1080_v5, %v3707_v13  ;;  %v1112_v35 = vpop.permute.xlu0 %1111  ;;  %v1110_v36 = vpop.permute.xlu1 %1109  ;;  %v1161_v29 = vld [vmem:[#allocation8 + $0x12] ss:$8 sm:$0x3]  ;;  %s4052_s8 = scalar_lea.hbm %s4110_s9, %s2944_s29 }
 0x3a6   : > { %v1024_v37 = vadd.f32 %v1023_v1, %v1013_v31  ;;  %v1114_v39 = vsel %vm1113_vm14, %v1110_v36, %v1112_v35  ;;  %v1115_v40 = vsel %vm1113_vm14, %v1112_v35, %v1110_v36  ;;  %vm1820_vm14 = vcmp.lt.s32.totalorder %v3528_v17, 126 }
 0x3a7   : > { %v1065_v41 = vmul.f32 %v1063_v33, %v1035_v32  ;;  %v1094_v42 = vrot.slane %v1087_v34, %v3707_v13  ;;  %v1098_v43 = vcombine.high %v1087_v34, %v1087_v34  ;;  %v1122_v44 = vcombine.low %v1115_v40, %v1114_v39  ;;  %2364 = vrot.lane.b32.xlu0 %v3643_v61, %s3282_s21  ;;  %v1201_v34 = vld [vmem:[#allocation6 + $0x13] ss:$8 sm:$0x3] }
 0x3a8   : > { %v1055_v45 = vadd.f32 %v1054_v6, %v1024_v37  ;;  %2362 = vrot.lane.b32.xlu1 %v3640_v60, %s3282_s21  ;;  %s380_s21 = scalar_lea.vmem [#allocation9], %s2933_s5  ;;  %s2819_s5 = scalar_lea.sflag [#allocation5], %s3482_s25 }
 0x3a9   : > { %v1096_v47 = vmul.f32 %v1094_v42, %v1075_v38  ;;  %v1105_v48 = vrot.slane %v1098_v43, %v3707_v13  ;;  %v1129_v50 = vrot.slane %v1122_v44, %v3707_v13  ;;  %v1154_v51 = vpop.permute.xlu0 %1153  ;;  %v1152_v52 = vpop.permute.xlu1 %1151  ;;  %v1203_v42 = vld [vmem:[#allocation8 + $0x13] ss:$8 sm:$0x3] }
 0x3aa   : > { %v1066_v53 = vadd.f32 %v1065_v41, %v1055_v45  ;;  %v1156_v56 = vsel %vm1155_vm15, %v1152_v52, %v1154_v51  ;;  %v1157_v57 = vsel %vm1155_vm15, %v1154_v51, %v1152_v52  ;;  %vm1862_vm15 = vcmp.lt.s32.totalorder %v3528_v17, 125 }
 0x3ab   : > { %v1107_v58 = vmul.f32 %v1105_v48, %v1077_v46  ;;  %v1136_v59 = vrot.slane %v1129_v50, %v3707_v13  ;;  %v1140_v62 = vcombine.high %v1129_v50, %v1129_v50  ;;  %v1164_v63 = vcombine.low %v1157_v57, %v1156_v56  ;;  %2406 = vrot.lane.b32.xlu0 %v3643_v61, %s3283_s22  ;;  %v1243_v50 = vld [vmem:[#allocation6 + $0x14] ss:$8 sm:$0x3] }
 0x3ac   : > { %v1097_v3 = vadd.f32 %v1096_v47, %v1066_v53  ;;  %2404 = vrot.lane.b32.xlu1 %v3640_v60, %s3283_s22  ;;  %s2832_s22 = sshll.u32 %s380_s21, 4  ;;  %s4058_s22 = int_to_ptr.vmem [resolvable:$true] %s2832_s22 }
 0x3ad   : > { %v1138_v10 = vmul.f32 %v1136_v59, %v1117_v54  ;;  %v1147_v11 = vrot.slane %v1140_v62, %v3707_v13  ;;  %v1171_v12 = vrot.slane %v1164_v63, %v3707_v13  ;;  %v1196_v14 = vpop.permute.xlu0 %1195  ;;  %v1194_v15 = vpop.permute.xlu1 %1193  ;;  %v1245_v59 = vld [vmem:[#allocation8 + $0x14] ss:$8 sm:$0x3] }
 0x3ae   : > { %v1108_v22 = vadd.f32 %v1107_v58, %v1097_v3  ;;  %v1198_v24 = vsel %vm1197_vm0, %v1194_v15, %v1196_v14  ;;  %v1199_v4 = vsel %vm1197_vm0, %v1196_v14, %v1194_v15  ;;  %vm1904_vm0 = vcmp.lt.s32.totalorder %v3528_v17, 115 }
 0x3af   : > { %v1149_v8 = vmul.f32 %v1147_v11, %v1119_v7  ;;  %v1178_v26 = vrot.slane %v1171_v12, %v3707_v13  ;;  %v1182_v28 = vcombine.high %v1171_v12, %v1171_v12  ;;  %v1206_v0 = vcombine.low %v1199_v4, %v1198_v24  ;;  %2448 = vrot.lane.b32.xlu0 %v3643_v61, %s3284_s24  ;;  %v1285_v12 = vld [vmem:[#allocation6 + $0x15] ss:$8 sm:$0x3] }
 0x3b0   : > { %v1139_v1 = vadd.f32 %v1138_v10, %v1108_v22  ;;  %2446 = vrot.lane.b32.xlu1 %v3640_v60, %s3284_s24 }
 0x3b1   : > { %v1180_v30 = vmul.f32 %v1178_v26, %v1159_v23  ;;  %v1189_v5 = vrot.slane %v1182_v28, %v3707_v13  ;;  %v1213_v31 = vrot.slane %v1206_v0, %v3707_v13  ;;  %v1238_v32 = vpop.permute.xlu0 %1237  ;;  %v1236_v6 = vpop.permute.xlu1 %1235  ;;  %v1287_v26 = vld [vmem:[#allocation8 + $0x15] ss:$8 sm:$0x3] }
 0x3b2   : > { %v1150_v33 = vadd.f32 %v1149_v8, %v1139_v1  ;;  %v1240_v35 = vsel %vm1239_vm1, %v1236_v6, %v1238_v32  ;;  %v1241_v36 = vsel %vm1239_vm1, %v1238_v32, %v1236_v6  ;;  %vm1946_vm1 = vcmp.lt.s32.totalorder %v3528_v17, 114 }
 0x3b3   : > { %v1191_v37 = vmul.f32 %v1189_v5, %v1161_v29  ;;  %v1220_v38 = vrot.slane %v1213_v31, %v3707_v13  ;;  %v1224_v39 = vcombine.high %v1213_v31, %v1213_v31  ;;  %v1248_v40 = vcombine.low %v1241_v36, %v1240_v35  ;;  %2490 = vrot.lane.b32.xlu0 %v3643_v61, %s3285_s26  ;;  %v1327_v31 = vld [vmem:[#allocation6 + $0x16] ss:$8 sm:$0x3] }
 0x3b4   : > { %v1181_v41 = vadd.f32 %v1180_v30, %v1150_v33  ;;  %2488 = vrot.lane.b32.xlu1 %v3640_v60, %s3285_s26 }
 0x3b5   : > { %v1222_v43 = vmul.f32 %v1220_v38, %v1201_v34  ;;  %v1231_v44 = vrot.slane %v1224_v39, %v3707_v13  ;;  %v1255_v45 = vrot.slane %v1248_v40, %v3707_v13  ;;  %v1280_v46 = vpop.permute.xlu0 %1279  ;;  %v1278_v47 = vpop.permute.xlu1 %1277  ;;  %v1329_v38 = vld [vmem:[#allocation8 + $0x16] ss:$8 sm:$0x3] }
 0x3b6   : > { %v1192_v48 = vadd.f32 %v1191_v37, %v1181_v41  ;;  %v1282_v51 = vsel %vm1281_vm2, %v1278_v47, %v1280_v46  ;;  %v1283_v52 = vsel %vm1281_vm2, %v1280_v46, %v1278_v47  ;;  %vm1988_vm2 = vcmp.lt.s32.totalorder %v3528_v17, 113 }
 0x3b7   : > { %v1233_v53 = vmul.f32 %v1231_v44, %v1203_v42  ;;  %v1262_v54 = vrot.slane %v1255_v45, %v3707_v13  ;;  %v1266_v56 = vcombine.high %v1255_v45, %v1255_v45  ;;  %v1290_v57 = vcombine.low %v1283_v52, %v1282_v51  ;;  %2532 = vrot.lane.b32.xlu0 %v3643_v61, %s3286_s18  ;;  %v1369_v45 = vld [vmem:[#allocation6 + $0x17] ss:$8 sm:$0x3] }
 0x3b8   : > { %v1223_v58 = vadd.f32 %v1222_v43, %v1192_v48  ;;  %2530 = vrot.lane.b32.xlu1 %v3640_v60, %s3286_s18  ;;  %s3167_s18 = scalar_lea.vmem %s4058_s22, 1024 }
 0x3b9   : > { %v1264_v62 = vmul.f32 %v1262_v54, %v1243_v50  ;;  %v1273_v63 = vrot.slane %v1266_v56, %v3707_v13  ;;  %v1297_v3 = vrot.slane %v1290_v57, %v3707_v13  ;;  %v1322_v7 = vpop.permute.xlu0 %1321  ;;  %v1320_v10 = vpop.permute.xlu1 %1319  ;;  %v1371_v54 = vld [vmem:[#allocation8 + $0x17] ss:$8 sm:$0x3]  ;;  %p3168_p3 = scmp.ne.s32.totalorder %s4058_s22, %s3167_s18 }
 0x3ba   : > { %v1234_v11 = vadd.f32 %v1233_v53, %v1223_v58  ;;  %v1324_v14 = vsel %vm1323_vm3, %v1320_v10, %v1322_v7  ;;  %v1325_v15 = vsel %vm1323_vm3, %v1322_v7, %v1320_v10  ;;  %vm2030_vm3 = vcmp.lt.s32.totalorder %v3528_v17, 112 }
 0x3bb   : > { %v1275_v22 = vmul.f32 %v1273_v63, %v1245_v59  ;;  %v1304_v23 = vrot.slane %v1297_v3, %v3707_v13  ;;  %v1308_v24 = vcombine.high %v1297_v3, %v1297_v3  ;;  %v1332_v4 = vcombine.low %v1325_v15, %v1324_v14  ;;  %2574 = vrot.lane.b32.xlu0 %v3643_v61, %s3287_s15  ;;  %v1411_v3 = vld [vmem:[#allocation6 + $0x20] ss:$8 sm:$0x3]  ;;  %p3169_p7 = pnand %p3168_p3, %p4131_p2 }
 0x3bc   : > { %v1265_v8 = vadd.f32 %v1264_v62, %v1234_v11  ;;  %2572 = vrot.lane.b32.xlu1 %v3640_v60, %s3287_s15  ;;  %s3292_s15 = smov [#allocation9]  }
 0x3bd   : > { %v1306_v28 = vmul.f32 %v1304_v23, %v1285_v12  ;;  %v1315_v0 = vrot.slane %v1308_v24, %v3707_v13  ;;  %v1339_v1 = vrot.slane %v1332_v4, %v3707_v13  ;;  %v1364_v29 = vpop.permute.xlu0 %1363  ;;  %v1362_v30 = vpop.permute.xlu1 %1361  ;;  %v1413_v23 = vld [vmem:[#allocation8 + $0x20] ss:$8 sm:$0x3]  ;;  %p3170_p11 = pneg %p3169_p7 }
 0x3be   : > { %v1276_v5 = vadd.f32 %v1275_v22, %v1265_v8  ;;  %v1366_v32 = vsel %vm1365_vm4, %v1362_v30, %v1364_v29  ;;  %v1367_v6 = vsel %vm1365_vm4, %v1364_v29, %v1362_v30  ;;  %vm2072_vm4 = vcmp.lt.s32.totalorder %v3528_v17, 111 }
 0x3bf   : > { %v1317_v33 = vmul.f32 %v1315_v0, %v1287_v26  ;;  %v1346_v34 = vrot.slane %v1339_v1, %v3707_v13  ;;  %v1350_v35 = vcombine.high %v1339_v1, %v1339_v1  ;;  %v1374_v36 = vcombine.low %v1367_v6, %v1366_v32  ;;  %2616 = vrot.lane.b32.xlu0 %v3643_v61, %s3288_s17  ;;  %v1453_v1 = vld [vmem:[#allocation6 + $0x21] ss:$8 sm:$0x3] }
 0x3c0   : > { %v1307_v37 = vadd.f32 %v1306_v28, %v1276_v5  ;;  %2614 = vrot.lane.b32.xlu1 %v3640_v60, %s3288_s17  ;;  %s3171_s17 = sshll.u32 %s3292_s15, 4  ;;  %s3172_s17 = int_to_ptr.vmem [resolvable:$false] %s3171_s17 }
 0x3c1   : > { %v1348_v39 = vmul.f32 %v1346_v34, %v1327_v31  ;;  %v1357_v40 = vrot.slane %v1350_v35, %v3707_v13  ;;  %v1381_v41 = vrot.slane %v1374_v36, %v3707_v13  ;;  %v1406_v42 = vpop.permute.xlu0 %1405  ;;  %v1404_v43 = vpop.permute.xlu1 %1403  ;;  %v1455_v34 = vld [vmem:[#allocation8 + $0x21] ss:$8 sm:$0x3]  ;;  %p3174_p12 = scmp.lt.s32.totalorder %s4058_s22, %s3172_s17 }
 0x3c2   : > { %v1318_v44 = vadd.f32 %v1317_v33, %v1307_v37  ;;  %v1408_v46 = vsel %vm1407_vm5, %v1404_v43, %v1406_v42  ;;  %v1409_v47 = vsel %vm1407_vm5, %v1406_v42, %v1404_v43  ;;  %vm2114_vm5 = vcmp.lt.s32.totalorder %v3528_v17, 110 }
 0x3c3   : > { %v1359_v48 = vmul.f32 %v1357_v40, %v1329_v38  ;;  %v1388_v50 = vrot.slane %v1381_v41, %v3707_v13  ;;  %v1392_v51 = vcombine.high %v1381_v41, %v1381_v41  ;;  %v1416_v52 = vcombine.low %v1409_v47, %v1408_v46  ;;  %2658 = vrot.lane.b32.xlu0 %v3643_v61, %s3289_s28  ;;  %v1495_v41 = vld [vmem:[#allocation6 + $0x22] ss:$8 sm:$0x3] }
 0x3c4   : > { %v1349_v53 = vadd.f32 %v1348_v39, %v1318_v44  ;;  %2656 = vrot.lane.b32.xlu1 %v3640_v60, %s3289_s28  ;;  %s3173_s28 = scalar_lea.vmem %s3172_s17, 2048 }
 0x3c5   : > { %v1390_v56 = vmul.f32 %v1388_v50, %v1369_v45  ;;  %v1399_v57 = vrot.slane %v1392_v51, %v3707_v13  ;;  %v1423_v58 = vrot.slane %v1416_v52, %v3707_v13  ;;  %v1448_v59 = vpop.permute.xlu0 %1447  ;;  %v1446_v62 = vpop.permute.xlu1 %1445  ;;  %v1497_v50 = vld [vmem:[#allocation8 + $0x22] ss:$8 sm:$0x3]  ;;  %p3175_p13 = scmp.lt.s32.totalorder %s3173_s28, %s3167_s18 }
 0x3c6   : > { %v1360_v63 = vadd.f32 %v1359_v48, %v1349_v53  ;;  %v1450_v7 = vsel %vm1449_vm6, %v1446_v62, %v1448_v59  ;;  %v1451_v10 = vsel %vm1449_vm6, %v1448_v59, %v1446_v62  ;;  %vm2156_vm6 = vcmp.lt.s32.totalorder %v3528_v17, 109 }
 0x3c7   : > { %v1401_v11 = vmul.f32 %v1399_v57, %v1371_v54  ;;  %v1430_v12 = vrot.slane %v1423_v58, %v3707_v13  ;;  %v1434_v14 = vcombine.high %v1423_v58, %v1423_v58  ;;  %v1458_v15 = vcombine.low %v1451_v10, %v1450_v7  ;;  %2700 = vrot.lane.b32.xlu0 %v3643_v61, %s3290_s30  ;;  %v1537_v58 = vld [vmem:[#allocation6 + $0x23] ss:$8 sm:$0x3]  ;;  %p3176_p0 = por %p3175_p13, %p3174_p12 }
 0x3c8   : > { %v1391_v22 = vadd.f32 %v1390_v56, %v1360_v63  ;;  %2698 = vrot.lane.b32.xlu1 %v3640_v60, %s3290_s30 }
 0x3c9   : > { %v1432_v24 = vmul.f32 %v1430_v12, %v1411_v3  ;;  %v1441_v4 = vrot.slane %v1434_v14, %v3707_v13  ;;  %v1465_v8 = vrot.slane %v1458_v15, %v3707_v13  ;;  %v1490_v26 = vpop.permute.xlu0 %1489  ;;  %v1488_v28 = vpop.permute.xlu1 %1487  ;;  %v1539_v12 = vld [vmem:[#allocation8 + $0x23] ss:$8 sm:$0x3]  ;;  %p3177_p5 = pnand %p3176_p0, %p3170_p11 }
 0x3ca   : > { %v1402_v0 = vadd.f32 %v1401_v11, %v1391_v22  ;;  %v1492_v29 = vsel %vm1491_vm7, %v1488_v28, %v1490_v26  ;;  %v1493_v30 = vsel %vm1491_vm7, %v1490_v26, %v1488_v28  ;;  %vm2198_vm7 = vcmp.lt.s32.totalorder %v3528_v17, 99 }
 0x3cb   : > { %v1443_v5 = vmul.f32 %v1441_v4, %v1413_v23  ;;  %v1472_v31 = vrot.slane %v1465_v8, %v3707_v13  ;;  %v1476_v32 = vcombine.high %v1465_v8, %v1465_v8  ;;  %v1500_v6 = vcombine.low %v1493_v30, %v1492_v29  ;;  %2742 = vrot.lane.b32.xlu0 %v3643_v61, %s3291_s14  ;;  %v1579_v8 = vld [vmem:[#allocation6 + $0x24] ss:$8 sm:$0x3] }
 0x3cc   : > { %v1433_v33 = vadd.f32 %v1432_v24, %v1402_v0  ;;  %2740 = vrot.lane.b32.xlu1 %v3640_v60, %s3291_s14 }
 0x3cd   : > { %v1474_v35 = vmul.f32 %v1472_v31, %v1453_v1  ;;  %v1483_v36 = vrot.slane %v1476_v32, %v3707_v13  ;;  %v1507_v37 = vrot.slane %v1500_v6, %v3707_v13  ;;  %v1532_v38 = vpop.permute.xlu0 %1531  ;;  %v1530_v39 = vpop.permute.xlu1 %1529  ;;  %v1581_v31 = vld [vmem:[#allocation8 + $0x24] ss:$8 sm:$0x3] }
 0x3ce   : > { %v1444_v40 = vadd.f32 %v1443_v5, %v1433_v33  ;;  %v1534_v42 = vsel %vm1533_vm8, %v1530_v39, %v1532_v38  ;;  %v1535_v43 = vsel %vm1533_vm8, %v1532_v38, %v1530_v39  ;;  %vm2240_vm8 = vcmp.lt.s32.totalorder %v3528_v17, 98 }
 0x3cf   : > { %v1485_v44 = vmul.f32 %v1483_v36, %v1455_v34  ;;  %v1514_v45 = vrot.slane %v1507_v37, %v3707_v13  ;;  %v1518_v46 = vcombine.high %v1507_v37, %v1507_v37  ;;  %v1542_v47 = vcombine.low %v1535_v43, %v1534_v42  ;;  %v1621_v37 = vld [vmem:[#allocation6 + $0x25] ss:$8 sm:$0x3] }
 0x3d0   : > { %v1475_v48 = vadd.f32 %v1474_v35, %v1444_v40 }
 0x3d1   : > { %v1516_v51 = vmul.f32 %v1514_v45, %v1495_v41  ;;  %v1525_v52 = vrot.slane %v1518_v46, %v3707_v13  ;;  %v1549_v53 = vrot.slane %v1542_v47, %v3707_v13  ;;  %v1574_v54 = vpop.permute.xlu0 %1573  ;;  %v1572_v56 = vpop.permute.xlu1 %1571  ;;  %v1623_v45 = vld [vmem:[#allocation8 + $0x25] ss:$8 sm:$0x3]  ;;  %v1745_v46 = vcombine.low %v3640_v60, %v3643_v61 }
 0x3d2   : > { %v1486_v57 = vadd.f32 %v1485_v44, %v1475_v48  ;;  %v1576_v59 = vsel %vm1575_vm9, %v1572_v56, %v1574_v54  ;;  %v1577_v62 = vsel %vm1575_vm9, %v1574_v54, %v1572_v56  ;;  %v1663_v54 = vld [vmem:[#allocation6 + $0x26] ss:$8 sm:$0x3]  ;;  %vm2282_vm9 = vcmp.lt.s32.totalorder %v3528_v17, 97 }
 0x3d3   : > { %v1527_v63 = vmul.f32 %v1525_v52, %v1497_v50  ;;  %v1556_v3 = vrot.slane %v1549_v53, %v3707_v13  ;;  %v1560_v7 = vcombine.high %v1549_v53, %v1549_v53  ;;  %v1584_v10 = vcombine.low %v1577_v62, %v1576_v59 }
 0x3d4   : > { %v1517_v11 = vadd.f32 %v1516_v51, %v1486_v57 }
 0x3d5   : > { %v1558_v14 = vmul.f32 %v1556_v3, %v1537_v58  ;;  %v1567_v15 = vrot.slane %v1560_v7, %v3707_v13  ;;  %v1591_v22 = vrot.slane %v1584_v10, %v3707_v13  ;;  %v1616_v23 = vpop.permute.xlu0 %1615  ;;  %v1614_v24 = vpop.permute.xlu1 %1613  ;;  %v1752_v3 = vrot.slane %v1745_v46, %v3707_v13 }
 0x3d6   : > { %v1528_v4 = vadd.f32 %v1527_v63, %v1517_v11  ;;  %v1618_v26 = vsel %vm1617_vm10, %v1614_v24, %v1616_v23  ;;  %v1619_v28 = vsel %vm1617_vm10, %v1616_v23, %v1614_v24  ;;  %v1665_v63 = vld [vmem:[#allocation8 + $0x26] ss:$8 sm:$0x3]  ;;  %vm2324_vm10 = vcmp.lt.s32.totalorder %v3528_v17, 96 }
 0x3d7   : > { %v1569_v0 = vmul.f32 %v1567_v15, %v1539_v12  ;;  %v1598_v1 = vrot.slane %v1591_v22, %v3707_v13  ;;  %v1602_v29 = vcombine.high %v1591_v22, %v1591_v22  ;;  %v1626_v30 = vcombine.low %v1619_v28, %v1618_v26  ;;  %v1705_v22 = vld [vmem:[#allocation6 + $0x27] ss:$8 sm:$0x3] }
 0x3d8   : > { %v1559_v5 = vadd.f32 %v1558_v14, %v1528_v4 }
 0x3d9   : > { %v1600_v32 = vmul.f32 %v1598_v1, %v1579_v8  ;;  %v1609_v6 = vrot.slane %v1602_v29, %v3707_v13  ;;  %v1633_v33 = vrot.slane %v1626_v30, %v3707_v13  ;;  %v1658_v34 = vpop.permute.xlu0 %1657  ;;  %v1656_v35 = vpop.permute.xlu1 %1655  ;;  %v1707_v1 = vld [vmem:[#allocation8 + $0x27] ss:$8 sm:$0x3]  ;;  %v1763_v29 = vcombine.high %v1752_v3, %v1752_v3 }
 0x3da   : > { %v1570_v36 = vadd.f32 %v1569_v0, %v1559_v5  ;;  %v1660_v38 = vsel %vm1659_vm11, %v1656_v35, %v1658_v34  ;;  %v1661_v39 = vsel %vm1659_vm11, %v1658_v34, %v1656_v35  ;;  %v1740_v35 = vld [vmem:[#allocation6 + $0x30] ss:$8 sm:$0x3]  ;;  %vm2366_vm11 = vcmp.lt.s32.totalorder %v3528_v17, 95 }
 0x3db   : > { %v1611_v40 = vmul.f32 %v1609_v6, %v1581_v31  ;;  %v1640_v41 = vrot.slane %v1633_v33, %v3707_v13  ;;  %v1644_v42 = vcombine.high %v1633_v33, %v1633_v33  ;;  %v1668_v43 = vcombine.low %v1661_v39, %v1660_v38 }
 0x3dc   : > { %v1601_v44 = vadd.f32 %v1600_v32, %v1570_v36  ;;  %v1759_v31 = vrot.slane %v1752_v3, %v3707_v13 }
 0x3dd   : > { %v1642_v47 = vmul.f32 %v1640_v41, %v1621_v37  ;;  %v1651_v48 = vrot.slane %v1644_v42, %v3707_v13  ;;  %v1675_v50 = vrot.slane %v1668_v43, %v3707_v13  ;;  %v1700_v51 = vpop.permute.xlu0 %1699  ;;  %v1698_v52 = vpop.permute.xlu1 %1697  ;;  %v1770_v41 = vrot.slane %v1763_v29, %v3707_v13  ;;  %v1742_v43 = vld [vmem:[#allocation8 + $0x30] ss:$8 sm:$0x3] }
 0x3de   : > { %v1612_v53 = vadd.f32 %v1611_v40, %v1601_v44  ;;  %v1702_v56 = vsel %vm1701_vm12, %v1698_v52, %v1700_v51  ;;  %v1703_v57 = vsel %vm1701_vm12, %v1700_v51, %v1698_v52  ;;  %v1761_v44 = vmul.f32 %v1759_v31, %v1740_v35 }
 0x3df   : > { %v1653_v58 = vmul.f32 %v1651_v48, %v1623_v45  ;;  %v1682_v60 = vrot.slane %v1675_v50, %v3707_v13  ;;  %v1686_v61 = vcombine.high %v1675_v50, %v1675_v50  ;;  %v1710_v59 = vcombine.low %v1703_v57, %v1702_v56 }
 0x3e0   : > { %v1643_v62 = vadd.f32 %v1642_v47, %v1612_v53  ;;  %v1782_v53 = vld [vmem:[#allocation6 + $0x31] ss:$8 sm:$0x3]  ;;  %v1772_v57 = vmul.f32 %v1770_v41, %v1742_v43  ;;  %vm2408_vm12 = vcmp.lt.s32.totalorder %v3528_v17, 94 }
 0x3e1   : > { %v1684_v7 = vmul.f32 %v1682_v60, %v1663_v54  ;;  %v1693_v10 = vrot.slane %v1686_v61, %v3707_v13  ;;  %v1717_v11 = vrot.slane %v1710_v59, %v3707_v13  ;;  %v1777_v12 = vpop.permute.xlu0 %1776  ;;  %v1775_v14 = vpop.permute.xlu1 %1774  ;;  %v1784_v61 = vld [vmem:[#allocation8 + $0x31] ss:$8 sm:$0x3] }
 0x3e2   : > { %v1654_v15 = vadd.f32 %v1653_v58, %v1643_v62  ;;  %v1779_v23 = vsel %vm1778_vm13, %v1775_v14, %v1777_v12  ;;  %v1780_v24 = vsel %vm1778_vm13, %v1777_v12, %v1775_v14  ;;  %vm2450_vm13 = vcmp.lt.s32.totalorder %v3528_v17, 93 }
 0x3e3   : > { %v1695_v4 = vmul.f32 %v1693_v10, %v1665_v63  ;;  %v1724_v8 = vrot.slane %v1717_v11, %v3707_v13  ;;  %v1728_v26 = vcombine.high %v1717_v11, %v1717_v11  ;;  %v1787_v28 = vcombine.low %v1779_v23, %v1780_v24  ;;  %v1824_v11 = vld [vmem:[#allocation6 + $0x32] ss:$8 sm:$0x3] }
 0x3e4   : > { %v1685_v0 = vadd.f32 %v1684_v7, %v1654_v15 }
 0x3e5   : > { %v1726_v30 = vmul.f32 %v1724_v8, %v1705_v22  ;;  %v1735_v5 = vrot.slane %v1728_v26, %v3707_v13  ;;  %v1794_v32 = vrot.slane %v1787_v28, %v3707_v13  ;;  %v1819_v6 = vpop.permute.xlu0 %1818  ;;  %v1817_v33 = vpop.permute.xlu1 %1816  ;;  %v1826_v8 = vld [vmem:[#allocation8 + $0x32] ss:$8 sm:$0x3] }
 0x3e6   : > { %v1696_v34 = vadd.f32 %v1695_v4, %v1685_v0  ;;  %v1821_v36 = vsel %vm1820_vm14, %v1817_v33, %v1819_v6  ;;  %v1822_v37 = vsel %vm1820_vm14, %v1819_v6, %v1817_v33  ;;  %vm2492_vm14 = vcmp.lt.s32.totalorder %v3528_v17, 83 }
 0x3e7   : > { %v1737_v38 = vmul.f32 %v1735_v5, %v1707_v1  ;;  %v1829_v39 = vcombine.low %v1821_v36, %v1822_v37  ;;  %v1805_v42 = vcombine.high %v1794_v32, %v1794_v32  ;;  %v1801_v50 = vrot.slane %v1794_v32, %v3707_v13  ;;  %v1866_v32 = vld [vmem:[#allocation6 + $0x33] ss:$8 sm:$0x3]  ;;  %v1868_v37 = vld [vmem:[#allocation8 + $0x33] ss:$8 sm:$0x3] }
 0x3e8   : > { %v1727_v40 = vadd.f32 %v1726_v30, %v1696_v34 }
 0x3e9   : > { %v1836_v45 = vrot.slane %v1829_v39, %v3707_v13  ;;  %v1861_v46 = vpop.permute.xlu0 %1860  ;;  %v1859_v47 = vpop.permute.xlu1 %1858  ;;  %v1812_v58 = vrot.slane %v1805_v42, %v3707_v13  ;;  %v1803_v10 = vmul.f32 %v1801_v50, %v1782_v53  ;;  %v1910_v53 = vld [vmem:[#allocation8 + $0x34] ss:$8 sm:$0x3] }
 0x3ea   : > { %v1738_v48 = vadd.f32 %v1737_v38, %v1727_v40  ;;  %v1863_v51 = vsel %vm1862_vm15, %v1859_v47, %v1861_v46  ;;  %v1864_v52 = vsel %vm1862_vm15, %v1861_v46, %v1859_v47  ;;  %vm2534_vm15 = vcmp.lt.s32.totalorder %v3528_v17, 82 }
 0x3eb   : > { %v1871_v54 = vcombine.low %v1863_v51, %v1864_v52  ;;  %v1847_v60 = vcombine.high %v1836_v45, %v1836_v45  ;;  %v1843_v59 = vrot.slane %v1836_v45, %v3707_v13  ;;  %v1814_v23 = vmul.f32 %v1812_v58, %v1784_v61 }
 0x3ec   : > { %v1762_v56 = vadd.f32 %v1761_v44, %v1738_v48  ;;  %v1908_v44 = vld [vmem:[#allocation6 + $0x34] ss:$8 sm:$0x3] }
 0x3ed   : > { %v1878_v62 = vrot.slane %v1871_v54, %v3707_v13  ;;  %v1903_v63 = vpop.permute.xlu0 %1902  ;;  %v1901_v3 = vpop.permute.xlu1 %1900  ;;  %v1854_v24 = vrot.slane %v1847_v60, %v3707_v13  ;;  %v1845_v26 = vmul.f32 %v1843_v59, %v1824_v11 }
 0x3ee   : > { %v1773_v7 = vadd.f32 %v1772_v57, %v1762_v56  ;;  %v1905_v12 = vsel %vm1904_vm0, %v1901_v3, %v1903_v63  ;;  %v1906_v14 = vsel %vm1904_vm0, %v1903_v63, %v1901_v3  ;;  %v1950_v63 = vld [vmem:[#allocation6 + $0x35] ss:$8 sm:$0x3]  ;;  %vm2576_vm0 = vcmp.lt.s32.totalorder %v3528_v17, 81 }
 0x3ef   : > { %v1913_v15 = vcombine.low %v1905_v12, %v1906_v14  ;;  %v1889_v4 = vcombine.high %v1878_v62, %v1878_v62  ;;  %v1885_v30 = vrot.slane %v1878_v62, %v3707_v13  ;;  %v1856_v34 = vmul.f32 %v1854_v24, %v1826_v8  ;;  %v1952_v14 = vld [vmem:[#allocation8 + $0x35] ss:$8 sm:$0x3] }
 0x3f0   : > { %v1804_v22 = vadd.f32 %v1803_v10, %v1773_v7 }
 0x3f1   : > { %v1920_v28 = vrot.slane %v1913_v15, %v3707_v13  ;;  %v1945_v0 = vpop.permute.xlu0 %1944  ;;  %v1943_v1 = vpop.permute.xlu1 %1942  ;;  %v1896_v35 = vrot.slane %v1889_v4, %v3707_v13  ;;  %v1887_v43 = vmul.f32 %v1885_v30, %v1866_v32 }
 0x3f2   : > { %v1815_v29 = vadd.f32 %v1814_v23, %v1804_v22  ;;  %v1947_v5 = vsel %vm1946_vm1, %v1943_v1, %v1945_v0  ;;  %v1948_v31 = vsel %vm1946_vm1, %v1945_v0, %v1943_v1  ;;  %vm2618_vm1 = vcmp.lt.s32.totalorder %v3528_v17, 80 }
 0x3f3   : > { %v1955_v6 = vcombine.low %v1947_v5, %v1948_v31  ;;  %v1931_v36 = vcombine.high %v1920_v28, %v1920_v28  ;;  %v1927_v38 = vrot.slane %v1920_v28, %v3707_v13  ;;  %v1898_v50 = vmul.f32 %v1896_v35, %v1868_v37  ;;  %v1994_v31 = vld [vmem:[#allocation8 + $0x36] ss:$8 sm:$0x3]  ;;  %v2034_v37 = vld [vmem:[#allocation6 + $0x37] ss:$8 sm:$0x3] }
 0x3f4   : > { %v1846_v33 = vadd.f32 %v1845_v26, %v1815_v29  ;;  %v1992_v26 = vld [vmem:[#allocation6 + $0x36] ss:$8 sm:$0x3] }
 0x3f5   : > { %v1962_v39 = vrot.slane %v1955_v6, %v3707_v13  ;;  %v1987_v40 = vpop.permute.xlu0 %1986  ;;  %v1985_v41 = vpop.permute.xlu1 %1984  ;;  %v1938_v51 = vrot.slane %v1931_v36, %v3707_v13  ;;  %v1929_v54 = vmul.f32 %v1927_v38, %v1908_v44  ;;  %v2036_v44 = vld [vmem:[#allocation8 + $0x37] ss:$8 sm:$0x3] }
 0x3f6   : > { %v1857_v42 = vadd.f32 %v1856_v34, %v1846_v33  ;;  %v1989_v45 = vsel %vm1988_vm2, %v1985_v41, %v1987_v40  ;;  %v1990_v46 = vsel %vm1988_vm2, %v1987_v40, %v1985_v41  ;;  %vm2660_vm2 = vcmp.lt.s32.totalorder %v3528_v17, 79 }
 0x3f7   : > { %v1997_v47 = vcombine.low %v1989_v45, %v1990_v46  ;;  %v1973_v52 = vcombine.high %v1962_v39, %v1962_v39  ;;  %v1969_v61 = vrot.slane %v1962_v39, %v3707_v13  ;;  %v1940_v10 = vmul.f32 %v1938_v51, %v1910_v53 }
 0x3f8   : > { %v1888_v48 = vadd.f32 %v1887_v43, %v1857_v42 }
 0x3f9   : > { %v2004_v56 = vrot.slane %v1997_v47, %v3707_v13  ;;  %v2029_v57 = vpop.permute.xlu0 %2028  ;;  %v2027_v58 = vpop.permute.xlu1 %2026  ;;  %v1980_v11 = vrot.slane %v1973_v52, %v3707_v13  ;;  %v1971_v24 = vmul.f32 %v1969_v61, %v1950_v63  ;;  %v2078_v63 = vld [vmem:[#allocation8 + $0x40] ss:$8 sm:$0x3] }
 0x3fa   : > { %v1899_v60 = vadd.f32 %v1898_v50, %v1888_v48  ;;  %v2031_v59 = vsel %vm2030_vm3, %v2027_v58, %v2029_v57  ;;  %v2032_v62 = vsel %vm2030_vm3, %v2029_v57, %v2027_v58  ;;  %vm2702_vm3 = vcmp.lt.s32.totalorder %v3528_v17, 78 }
 0x3fb   : > { %v2039_v3 = vcombine.low %v2031_v59, %v2032_v62  ;;  %v2015_v12 = vcombine.high %v2004_v56, %v2004_v56  ;;  %v2011_v4 = vrot.slane %v2004_v56, %v3707_v13  ;;  %v1982_v29 = vmul.f32 %v1980_v11, %v1952_v14  ;;  %v2076_v56 = vld [vmem:[#allocation6 + $0x40] ss:$8 sm:$0x3] }
 0x3fc   : > { %v1930_v7 = vadd.f32 %v1929_v54, %v1899_v60 }
 0x3fd   : > { %v2046_v15 = vrot.slane %v2039_v3, %v3707_v13  ;;  %v2071_v22 = vpop.permute.xlu0 %2070  ;;  %v2022_v30 = vrot.slane %v2015_v12, %v3707_v13  ;;  %v2013_v34 = vmul.f32 %v2011_v4, %v1992_v26 }
 0x3fe   : > { %v1941_v23 = vadd.f32 %v1940_v10, %v1930_v7  ;;  %v2069_v8 = vpop.permute.xlu1 %2068 }
 0x3ff   : > { %v2057_v28 = vcombine.high %v2046_v15, %v2046_v15  ;;  %v2073_v0 = vsel %vm2072_vm4, %v2069_v8, %v2071_v22  ;;  %v2074_v5 = vsel %vm2072_vm4, %v2071_v22, %v2069_v8  ;;  %v2053_v35 = vrot.slane %v2046_v15, %v3707_v13  ;;  %v2118_v15 = vld [vmem:[#allocation6 + $0x41] ss:$8 sm:$0x3] }
 0x400   : > { %v1972_v1 = vadd.f32 %v1971_v24, %v1941_v23  ;;  %v2081_v32 = vcombine.low %v2073_v0, %v2074_v5  ;;  %v2024_v43 = vmul.f32 %v2022_v30, %v1994_v31  ;;  %vm2744_vm4 = vcmp.lt.s32.totalorder %v3528_v17, 77 }
 0x401   : > { %v2113_v6 = vpop.permute.xlu0 %2112  ;;  %v2064_v38 = vrot.slane %v2057_v28, %v3707_v13  ;;  %v2055_v50 = vmul.f32 %v2053_v35, %v2034_v37  ;;  %v2120_v28 = vld [vmem:[#allocation8 + $0x41] ss:$8 sm:$0x3] }
 0x402   : > { %v1983_v33 = vadd.f32 %v1982_v29, %v1972_v1  ;;  %v2111_v36 = vpop.permute.xlu1 %2110  ;;  %v2088_v39 = vrot.slane %v2081_v32, %v3707_v13  ;;  %v2160_v32 = vld [vmem:[#allocation6 + $0x42] ss:$8 sm:$0x3] }
 0x403   : > { %v2115_v40 = vsel %vm2114_vm5, %v2111_v36, %v2113_v6  ;;  %v2116_v41 = vsel %vm2114_vm5, %v2113_v6, %v2111_v36  ;;  %v2066_v54 = vmul.f32 %v2064_v38, %v2036_v44  ;;  %v2162_v38 = vld [vmem:[#allocation8 + $0x42] ss:$8 sm:$0x3] }
 0x404   : > { %v2014_v42 = vadd.f32 %v2013_v34, %v1983_v33  ;;  %v2123_v45 = vcombine.low %v2115_v40, %v2116_v41  ;;  %v2099_v46 = vcombine.high %v2088_v39, %v2088_v39  ;;  %v2095_v51 = vrot.slane %v2088_v39, %v3707_v13 }
 0x405   : > { %v2155_v47 = vpop.permute.xlu0 %2154 }
 0x406   : > { %v2025_v48 = vadd.f32 %v2024_v43, %v2014_v42  ;;  %v2130_v52 = vrot.slane %v2123_v45, %v3707_v13  ;;  %v2153_v53 = vpop.permute.xlu1 %2152  ;;  %v2106_v61 = vrot.slane %v2099_v46, %v3707_v13  ;;  %v2097_v10 = vmul.f32 %v2095_v51, %v2076_v56 }
 0x407   : > { %v2157_v57 = vsel %vm2156_vm6, %v2153_v53, %v2155_v47  ;;  %v2158_v58 = vsel %vm2156_vm6, %v2155_v47, %v2153_v53 }
 0x408   : > { %v2056_v60 = vadd.f32 %v2055_v50, %v2025_v48  ;;  %v2141_v59 = vcombine.high %v2130_v52, %v2130_v52  ;;  %v2165_v62 = vcombine.low %v2157_v57, %v2158_v58  ;;  %v2137_v11 = vrot.slane %v2130_v52, %v3707_v13  ;;  %v2202_v48 = vld [vmem:[#allocation6 + $0x43] ss:$8 sm:$0x3]  ;;  %v2204_v57 = vld [vmem:[#allocation8 + $0x43] ss:$8 sm:$0x3] }
 0x409   : > { %v2197_v3 = vpop.permute.xlu0 %2196  ;;  %v2108_v4 = vmul.f32 %v2106_v61, %v2078_v63 }
 0x40a   : > { %v2067_v7 = vadd.f32 %v2066_v54, %v2056_v60  ;;  %v2172_v12 = vrot.slane %v2165_v62, %v3707_v13  ;;  %v2195_v14 = vpop.permute.xlu1 %2194  ;;  %v2148_v8 = vrot.slane %v2141_v59, %v3707_v13  ;;  %v2139_v30 = vmul.f32 %v2137_v11, %v2118_v15 }
 0x40b   : > { %v2199_v22 = vsel %vm2198_vm7, %v2195_v14, %v2197_v3  ;;  %v2200_v23 = vsel %vm2198_vm7, %v2197_v3, %v2195_v14  ;;  %v2244_v3 = vld [vmem:[#allocation6 + $0x44] ss:$8 sm:$0x3] }
 0x40c   : > { %v2098_v24 = vadd.f32 %v2097_v10, %v2067_v7  ;;  %v2183_v26 = vcombine.high %v2172_v12, %v2172_v12  ;;  %v2207_v0 = vcombine.low %v2199_v22, %v2200_v23  ;;  %v2179_v5 = vrot.slane %v2172_v12, %v3707_v13  ;;  %v2246_v22 = vld [vmem:[#allocation8 + $0x44] ss:$8 sm:$0x3] }
 0x40d   : > { %v2239_v1 = vpop.permute.xlu0 %2238  ;;  %v2150_v37 = vmul.f32 %v2148_v8, %v2120_v28 }
 0x40e   : > { %v2109_v29 = vadd.f32 %v2108_v4, %v2098_v24  ;;  %v2237_v31 = vpop.permute.xlu1 %2236  ;;  %v2190_v6 = vrot.slane %v2183_v26, %v3707_v13  ;;  %v2214_v33 = vrot.slane %v2207_v0, %v3707_v13  ;;  %v2181_v43 = vmul.f32 %v2179_v5, %v2160_v32  ;;  %v2286_v0 = vld [vmem:[#allocation6 + $0x45] ss:$8 sm:$0x3] }
 0x40f   : > { %v2241_v34 = vsel %vm2240_vm8, %v2237_v31, %v2239_v1  ;;  %v2242_v35 = vsel %vm2240_vm8, %v2239_v1, %v2237_v31 }
 0x410   : > { %v2140_v36 = vadd.f32 %v2139_v30, %v2109_v29  ;;  %v2249_v39 = vcombine.low %v2241_v34, %v2242_v35  ;;  %v2225_v40 = vcombine.high %v2214_v33, %v2214_v33  ;;  %v2221_v44 = vrot.slane %v2214_v33, %v3707_v13 }
 0x411   : > { %v2281_v41 = vpop.permute.xlu0 %2280  ;;  %v2192_v47 = vmul.f32 %v2190_v6, %v2162_v38  ;;  %v2288_v6 = vld [vmem:[#allocation8 + $0x45] ss:$8 sm:$0x3] }
 0x412   : > { %v2151_v42 = vadd.f32 %v2150_v37, %v2140_v36  ;;  %v2256_v45 = vrot.slane %v2249_v39, %v3707_v13  ;;  %v2279_v46 = vpop.permute.xlu1 %2278  ;;  %v2232_v53 = vrot.slane %v2225_v40, %v3707_v13  ;;  %v2223_v61 = vmul.f32 %v2221_v44, %v2202_v48 }
 0x413   : > { %v2283_v50 = vsel %vm2282_vm9, %v2279_v46, %v2281_v41  ;;  %v2284_v51 = vsel %vm2282_vm9, %v2281_v41, %v2279_v46 }
 0x414   : > { %v2182_v52 = vadd.f32 %v2181_v43, %v2151_v42  ;;  %v2267_v54 = vcombine.high %v2256_v45, %v2256_v45  ;;  %v2291_v56 = vcombine.low %v2283_v50, %v2284_v51  ;;  %v2263_v59 = vrot.slane %v2256_v45, %v3707_v13  ;;  %v2328_v42 = vld [vmem:[#allocation6 + $0x46] ss:$8 sm:$0x3]  ;;  %v2330_v50 = vld [vmem:[#allocation8 + $0x46] ss:$8 sm:$0x3] }
 0x415   : > { %v2323_v58 = vpop.permute.xlu0 %2322  ;;  %v2234_v12 = vmul.f32 %v2232_v53, %v2204_v57 }
 0x416   : > { %v2193_v60 = vadd.f32 %v2192_v47, %v2182_v52  ;;  %v2298_v62 = vrot.slane %v2291_v56, %v3707_v13  ;;  %v2321_v63 = vpop.permute.xlu1 %2320  ;;  %v2274_v14 = vrot.slane %v2267_v54, %v3707_v13  ;;  %v2265_v8 = vmul.f32 %v2263_v59, %v2244_v3 }
 0x417   : > { %v2325_v7 = vsel %vm2324_vm10, %v2321_v63, %v2323_v58  ;;  %v2326_v10 = vsel %vm2324_vm10, %v2323_v58, %v2321_v63  ;;  %v2370_v58 = vld [vmem:[#allocation6 + $0x47] ss:$8 sm:$0x3] }
 0x418   : > { %v2224_v11 = vadd.f32 %v2223_v61, %v2193_v60  ;;  %v2309_v15 = vcombine.high %v2298_v62, %v2298_v62  ;;  %v2333_v23 = vcombine.low %v2325_v7, %v2326_v10  ;;  %v2305_v26 = vrot.slane %v2298_v62, %v3707_v13  ;;  %v2372_v7 = vld [vmem:[#allocation8 + $0x47] ss:$8 sm:$0x3] }
 0x419   : > { %v2365_v24 = vpop.permute.xlu0 %2364  ;;  %v2276_v32 = vmul.f32 %v2274_v14, %v2246_v22 }
 0x41a   : > { %v2235_v4 = vadd.f32 %v2234_v12, %v2224_v11  ;;  %v2363_v28 = vpop.permute.xlu1 %2362  ;;  %v2316_v1 = vrot.slane %v2309_v15, %v3707_v13  ;;  %v2340_v29 = vrot.slane %v2333_v23, %v3707_v13  ;;  %v2307_v37 = vmul.f32 %v2305_v26, %v2286_v0  ;;  %v2412_v23 = vld [vmem:[#allocation6 + $0x50] ss:$8 sm:$0x3] }
 0x41b   : > { %v2367_v30 = vsel %vm2366_vm11, %v2363_v28, %v2365_v24  ;;  %v2368_v5 = vsel %vm2366_vm11, %v2365_v24, %v2363_v28 }
 0x41c   : > { %v2266_v31 = vadd.f32 %v2265_v8, %v2235_v4  ;;  %v2375_v33 = vcombine.low %v2367_v30, %v2368_v5  ;;  %v2351_v34 = vcombine.high %v2340_v29, %v2340_v29  ;;  %v2347_v38 = vrot.slane %v2340_v29, %v3707_v13 }
 0x41d   : > { %v2407_v35 = vpop.permute.xlu0 %2406  ;;  %v2318_v41 = vmul.f32 %v2316_v1, %v2288_v6  ;;  %v2414_v1 = vld [vmem:[#allocation8 + $0x50] ss:$8 sm:$0x3] }
 0x41e   : > { %v2277_v36 = vadd.f32 %v2276_v32, %v2266_v31  ;;  %v2382_v39 = vrot.slane %v2375_v33, %v3707_v13  ;;  %v2405_v40 = vpop.permute.xlu1 %2404  ;;  %v2358_v46 = vrot.slane %v2351_v34, %v3707_v13  ;;  %v2349_v53 = vmul.f32 %v2347_v38, %v2328_v42 }
 0x41f   : > { %v2409_v43 = vsel %vm2408_vm12, %v2405_v40, %v2407_v35  ;;  %v2410_v44 = vsel %vm2408_vm12, %v2407_v35, %v2405_v40 }
 0x420   : > { %v2308_v45 = vadd.f32 %v2307_v37, %v2277_v36  ;;  %v2393_v47 = vcombine.high %v2382_v39, %v2382_v39  ;;  %v2417_v48 = vcombine.low %v2409_v43, %v2410_v44  ;;  %v2389_v54 = vrot.slane %v2382_v39, %v3707_v13  ;;  %v2454_v36 = vld [vmem:[#allocation6 + $0x51] ss:$8 sm:$0x3]  ;;  %v2456_v43 = vld [vmem:[#allocation8 + $0x51] ss:$8 sm:$0x3] }
 0x421   : > { %v2449_v51 = vpop.permute.xlu0 %2448  ;;  %v2360_v62 = vmul.f32 %v2358_v46, %v2330_v50 }
 0x422   : > { %v2319_v52 = vadd.f32 %v2318_v41, %v2308_v45  ;;  %v2424_v56 = vrot.slane %v2417_v48, %v3707_v13  ;;  %v2447_v57 = vpop.permute.xlu1 %2446  ;;  %v2400_v63 = vrot.slane %v2393_v47, %v3707_v13  ;;  %v2391_v14 = vmul.f32 %v2389_v54, %v2370_v58 }
 0x423   : > { %v2451_v60 = vsel %vm2450_vm13, %v2447_v57, %v2449_v51  ;;  %v2452_v61 = vsel %vm2450_vm13, %v2449_v51, %v2447_v57  ;;  %v2496_v51 = vld [vmem:[#allocation6 + $0x52] ss:$8 sm:$0x3] }
 0x424   : > { %v2350_v59 = vadd.f32 %v2349_v53, %v2319_v52  ;;  %v2435_v3 = vcombine.high %v2424_v56, %v2424_v56  ;;  %v2459_v10 = vcombine.low %v2451_v60, %v2452_v61  ;;  %v2431_v15 = vrot.slane %v2424_v56, %v3707_v13  ;;  %v2498_v60 = vld [vmem:[#allocation8 + $0x52] ss:$8 sm:$0x3] }
 0x425   : > { %v2491_v11 = vpop.permute.xlu0 %2490  ;;  %v2402_v0 = vmul.f32 %v2400_v63, %v2372_v7 }
 0x426   : > { %v2361_v12 = vadd.f32 %v2360_v62, %v2350_v59  ;;  %v2489_v22 = vpop.permute.xlu1 %2488  ;;  %v2442_v24 = vrot.slane %v2435_v3, %v3707_v13  ;;  %v2466_v4 = vrot.slane %v2459_v10, %v3707_v13  ;;  %v2433_v32 = vmul.f32 %v2431_v15, %v2412_v23  ;;  %v2538_v10 = vld [vmem:[#allocation6 + $0x53] ss:$8 sm:$0x3] }
 0x427   : > { %v2493_v8 = vsel %vm2492_vm14, %v2489_v22, %v2491_v11  ;;  %v2494_v26 = vsel %vm2492_vm14, %v2491_v11, %v2489_v22 }
 0x428   : > { %v2392_v28 = vadd.f32 %v2391_v14, %v2361_v12  ;;  %v2501_v29 = vcombine.low %v2493_v8, %v2494_v26  ;;  %v2477_v30 = vcombine.high %v2466_v4, %v2466_v4  ;;  %v2473_v6 = vrot.slane %v2466_v4, %v3707_v13 }
 0x429   : > { %v2533_v5 = vpop.permute.xlu0 %2532  ;;  %v2444_v35 = vmul.f32 %v2442_v24, %v2414_v1  ;;  %v2540_v24 = vld [vmem:[#allocation8 + $0x53] ss:$8 sm:$0x3] }
 0x42a   : > { %v2403_v31 = vadd.f32 %v2402_v0, %v2392_v28  ;;  %v2508_v33 = vrot.slane %v2501_v29, %v3707_v13  ;;  %v2531_v34 = vpop.permute.xlu1 %2530  ;;  %v2484_v40 = vrot.slane %v2477_v30, %v3707_v13  ;;  %v2475_v46 = vmul.f32 %v2473_v6, %v2454_v36 }
 0x42b   : > { %v2535_v37 = vsel %vm2534_vm15, %v2531_v34, %v2533_v5  ;;  %v2536_v38 = vsel %vm2534_vm15, %v2533_v5, %v2531_v34 }
 0x42c   : > { %v2434_v39 = vadd.f32 %v2433_v32, %v2403_v31  ;;  %v2519_v41 = vcombine.high %v2508_v33, %v2508_v33  ;;  %v2543_v42 = vcombine.low %v2535_v37, %v2536_v38  ;;  %v2515_v47 = vrot.slane %v2508_v33, %v3707_v13  ;;  %v2580_v31 = vld [vmem:[#allocation6 + $0x54] ss:$8 sm:$0x3]  ;;  %v2582_v37 = vld [vmem:[#allocation8 + $0x54] ss:$8 sm:$0x3] }
 0x42d   : > { %v2575_v44 = vpop.permute.xlu0 %2574  ;;  %v2486_v56 = vmul.f32 %v2484_v40, %v2456_v43 }
 0x42e   : > { %v2445_v45 = vadd.f32 %v2444_v35, %v2434_v39  ;;  %v2550_v48 = vrot.slane %v2543_v42, %v3707_v13  ;;  %v2573_v50 = vpop.permute.xlu1 %2572  ;;  %v2526_v57 = vrot.slane %v2519_v41, %v3707_v13  ;;  %v2517_v63 = vmul.f32 %v2515_v47, %v2496_v51 }
 0x42f   : > { %v2577_v52 = vsel %vm2576_vm0, %v2573_v50, %v2575_v44  ;;  %v2578_v53 = vsel %vm2576_vm0, %v2575_v44, %v2573_v50  ;;  %v2622_v44 = vld [vmem:[#allocation6 + $0x55] ss:$8 sm:$0x3] }
 0x430   : > { %v2476_v54 = vadd.f32 %v2475_v46, %v2445_v45  ;;  %v2561_v58 = vcombine.high %v2550_v48, %v2550_v48  ;;  %v2585_v61 = vcombine.low %v2577_v52, %v2578_v53  ;;  %v2557_v3 = vrot.slane %v2550_v48, %v3707_v13  ;;  %v2624_v52 = vld [vmem:[#allocation8 + $0x55] ss:$8 sm:$0x3] }
 0x431   : > { %v2617_v59 = vpop.permute.xlu0 %2616  ;;  %v2528_v23 = vmul.f32 %v2526_v57, %v2498_v60 }
 0x432   : > { %v2487_v62 = vadd.f32 %v2486_v56, %v2476_v54  ;;  %v2615_v7 = vpop.permute.xlu1 %2614  ;;  %v2568_v11 = vrot.slane %v2561_v58, %v3707_v13  ;;  %v2592_v12 = vrot.slane %v2585_v61, %v3707_v13  ;;  %v2559_v0 = vmul.f32 %v2557_v3, %v2538_v10  ;;  %v2664_v61 = vld [vmem:[#allocation6 + $0x56] ss:$8 sm:$0x3] }
 0x433   : > { %v2619_v14 = vsel %vm2618_vm1, %v2615_v7, %v2617_v59  ;;  %v2620_v15 = vsel %vm2618_vm1, %v2617_v59, %v2615_v7 }
 0x434   : > { %v2518_v22 = vadd.f32 %v2517_v63, %v2487_v62  ;;  %v2627_v4 = vcombine.low %v2619_v14, %v2620_v15  ;;  %v2603_v8 = vcombine.high %v2592_v12, %v2592_v12  ;;  %v2599_v1 = vrot.slane %v2592_v12, %v3707_v13 }
 0x435   : > { %v2659_v26 = vpop.permute.xlu0 %2658  ;;  %v2570_v5 = vmul.f32 %v2568_v11, %v2540_v24  ;;  %v2666_v11 = vld [vmem:[#allocation8 + $0x56] ss:$8 sm:$0x3]  ;;  %v2706_v24 = vld [vmem:[#allocation6 + $0x57] ss:$8 sm:$0x3] }
 0x436   : > { %v2529_v28 = vadd.f32 %v2528_v23, %v2518_v22  ;;  %v2634_v29 = vrot.slane %v2627_v4, %v3707_v13  ;;  %v2657_v30 = vpop.permute.xlu1 %2656  ;;  %v2610_v34 = vrot.slane %v2603_v8, %v3707_v13  ;;  %v2601_v40 = vmul.f32 %v2599_v1, %v2580_v31 }
 0x437   : > { %v2661_v32 = vsel %vm2660_vm2, %v2657_v30, %v2659_v26  ;;  %v2662_v6 = vsel %vm2660_vm2, %v2659_v26, %v2657_v30 }
 0x438   : > { %v2560_v33 = vadd.f32 %v2559_v0, %v2529_v28  ;;  %v2645_v35 = vcombine.high %v2634_v29, %v2634_v29  ;;  %v2669_v36 = vcombine.low %v2661_v32, %v2662_v6  ;;  %v2641_v41 = vrot.slane %v2634_v29, %v3707_v13  ;;  %v2708_v0 = vld [vmem:[#allocation8 + $0x57] ss:$8 sm:$0x3] }
 0x439   : > { %v2701_v38 = vpop.permute.xlu0 %2700  ;;  %v2612_v48 = vmul.f32 %v2610_v34, %v2582_v37 }
 0x43a   : > { %v2571_v39 = vadd.f32 %v2570_v5, %v2560_v33  ;;  %v2676_v42 = vrot.slane %v2669_v36, %v3707_v13  ;;  %v2699_v43 = vpop.permute.xlu1 %2698  ;;  %v2652_v50 = vrot.slane %v2645_v35, %v3707_v13  ;;  %v2643_v57 = vmul.f32 %v2641_v41, %v2622_v44  ;;  %v2748_v5 = vld [vmem:[#allocation6 + $0x60] ss:$8 sm:$0x3]  ;;  %v2750_v33 = vld [vmem:[#allocation8 + $0x60] ss:$8 sm:$0x3] }
 0x43b   : > { %v2703_v45 = vsel %vm2702_vm3, %v2699_v43, %v2701_v38  ;;  %v2704_v46 = vsel %vm2702_vm3, %v2701_v38, %v2699_v43  ;;  %v2783_v38 = vstv %s2782_s27 }
 0x43c   : > { %v2602_v47 = vadd.f32 %v2601_v40, %v2571_v39  ;;  %v2687_v51 = vcombine.high %v2676_v42, %v2676_v42  ;;  %v2711_v53 = vcombine.low %v2703_v45, %v2704_v46  ;;  %v2683_v58 = vrot.slane %v2676_v42, %v3707_v13 }
 0x43d   : > { %v2743_v54 = vpop.permute.xlu0 %2742  ;;  %v2654_v17 = vmul.f32 %v2652_v50, %v2624_v52 }
 0x43e   : > { %v2613_v56 = vadd.f32 %v2612_v48, %v2602_v47  ;;  %v2741_v60 = vpop.permute.xlu1 %2740  ;;  %v2718_v59 = vrot.slane %v2711_v53, %v3707_v13  ;;  %v2694_v7 = vrot.slane %v2687_v51, %v3707_v13  ;;  %v2685_v15 = vmul.f32 %v2683_v58, %v2664_v61 }
 0x43f   : > { %v2745_v62 = vsel %vm2744_vm4, %v2741_v60, %v2743_v54  ;;  %v2746_v63 = vsel %vm2744_vm4, %v2743_v54, %v2741_v60 }
 0x440   : > { %v2644_v3 = vadd.f32 %v2643_v57, %v2613_v56  ;;  %v2753_v10 = vcombine.low %v2745_v62, %v2746_v63  ;;  %v2729_v12 = vcombine.high %v2718_v59, %v2718_v59  ;;  %v2725_v22 = vrot.slane %v2718_v59, %v3707_v13 }
 0x441   : > { %v2696_v8 = vmul.f32 %v2694_v7, %v2666_v11 }
 0x442   : > { %v2655_v14 = vadd.f32 %v2654_v17, %v2644_v3  ;;  %v2760_v23 = vrot.slane %v2753_v10, %v3707_v13  ;;  %v2736_v26 = vrot.slane %v2729_v12, %v3707_v13  ;;  %v2727_v29 = vmul.f32 %v2725_v22, %v2706_v24 }
 0x444   : > { %v2686_v4 = vadd.f32 %v2685_v15, %v2655_v14  ;;  %v2771_v28 = vcombine.high %v2760_v23, %v2760_v23  ;;  %v2767_v30 = vrot.slane %v2760_v23, %v3707_v13  ;;  %v2738_v32 = vmul.f32 %v2736_v26, %v2708_v0 }
 0x446   : > { %v2697_v1 = vadd.f32 %v2696_v8, %v2686_v4  ;;  %v2778_v6 = vrot.slane %v2771_v28, %v3707_v13  ;;  %v2769_v35 = vmul.f32 %v2767_v30, %v2748_v5 }
 0x448   : > { %v2728_v31 = vadd.f32 %v2727_v29, %v2697_v1  ;;  %v2780_v37 = vmul.f32 %v2778_v6, %v2750_v33 }
 0x44a   : > { %v2739_v34 = vadd.f32 %v2738_v32, %v2728_v31 }
 0x44c   : > { %v2770_v36 = vadd.f32 %v2769_v35, %v2739_v34 }
 0x44e   : > { %v2781_v39 = vadd.f32 %v2780_v37, %v2770_v36 }
 0x450   : > { %v2784_v40 = vadd.f32 %v2783_v38, %v2781_v39 }
 0x452   : > { %v2785_v41 = vsub.f32 0.0, %v2784_v40 }
 0x454   : > { %v2786_v42 = vmul.f32 1.442695, %v2785_v41 }
 0x456   : > { %3083 = vpow2.f32 %v2786_v42 }
 0x463   : > { %v3084_v43 = vpop.eup %3083 }
 0x464   : > { %v2788_v44 = vadd.f32 1.0, %v3084_v43 }
 0x466   : > { %3085 = vrcp.f32 %v2788_v44 }
 0x473   : > { %v3086_v45 = vpop.eup %3085 }
 0x474   : > { %v2795_v13 = vrot.slane %v3086_v45, %v3543_v49  ;;  %v2799_v46 = vrot.slane %v3086_v45, %v504_v55 }
 0x476   : > { %v2802_v47 = vmul.f32 %v2795_v13, %v3600_v16  ;;  %v2803_v48 = vmul.f32 %v2799_v46, %v3603_v18  ;;  %v2804_v50 = vmul.f32 %v2795_v13, %v3606_v19  ;;  %v2805_v51 = vmul.f32 %v2799_v46, %v3609_v21 }
 0x477   : > { %v2806_v20 = vmul.f32 %v2795_v13, %v3616_v25  ;;  %v2807_v49 = vmul.f32 %v2799_v46, %v3619_v2  ;;  %v2808_v55 = vmul.f32 %v2795_v13, %v3624_v9  ;;  %v2809_v16 = vmul.f32 %v2799_v46, %v3627_v27 }
 0x478   : > { %2810 = vst [vmem:[%s380_s21] sm:$0xff] %v2802_v47  ;;  %2811 = vst [vmem:[%s380_s21 + $0x8] sm:$0xff] %v2803_v48 }
 0x479   : > { %2812 = vst [vmem:[%s380_s21 + $0x10] sm:$0xff] %v2804_v50  ;;  %2813 = vst [vmem:[%s380_s21 + $0x18] sm:$0xff] %v2805_v51 }
 0x47a   : > { %2814 = vst [vmem:[%s380_s21 + $0x20] sm:$0xff] %v2806_v20  ;;  %2815 = vst [vmem:[%s380_s21 + $0x28] sm:$0xff] %v2807_v49 }
 0x47b   : > { %2816 = vst [vmem:[%s380_s21 + $0x30] sm:$0xff] %v2808_v55  ;;  %2817 = vst [vmem:[%s380_s21 + $0x38] sm:$0xff] %v2809_v16 }
 0x47c   : > { %3180 = shalt.err (!%p3177_p5)
}
 0x47d   : > { %s3181_s30 = scalar_lea.hbm %s4052_s8, 1024  ;;  %s3185_s29 = scalar_lea.hbm %s4110_s9, 8192 }
 0x47e   : > { %p3182_p10 = scmp.ne.s32.totalorder %s4052_s8, %s3181_s30  ;;  %p3186_p4 = scmp.lt.s32.totalorder %s4052_s8, %s4110_s9 }
 0x47f   : > { %p3187_p6 = scmp.lt.s32.totalorder %s3185_s29, %s3181_s30 }
 0x480   : > { %p3183_p9 = pnand %p3182_p10, %p4131_p2 }
 0x481   : > { %p3188_p8 = por %p3187_p6, %p3186_p4 }
 0x482   : > { %p3184_p1 = pneg %p3183_p9 }
 0x484   : > { %p3189_p3 = pnand %p3188_p8, %p3184_p1 }
 0x486   : > { %3192 = shalt.err (!%p3189_p3)
}
 0x487   : > { %s3293_s26 = smov 256  }
 0x488   : > { %2955 = dma.vmem_to_hbm [thread:$0]  (%p4131_p2), %s4058_s22, 1024, %s4052_s8, %s2819_s5, %s3293_s26, %s3293_s26, %s3260_s23  }
 0x489 PF: > { %p2977_p7 = scmp.ge.s32.totalorder %s3235_s13, 2  ;;  %s2847_s18 = sand.u32 1, %s3223_s11  }
 0x48a   : > { %p4132_p11 = scmp.ne.s32.totalorder %s4119_s16, 0  ;;  %s2848_s15 = scalar_lea.sflag [#allocation5], %s2847_s18 }
 0x48c   : > { %p2969_p12 = pnand %p2977_p7, %p4132_p11 }
 0x48e   : > { %p2970_p13 = pneg %p2969_p12 }
 0x490   : > { %3218 = dma.done.wait (%p2970_p13), %s2848_s15, 1024  }
 0x491   : > { %3220 = vsyncadd (%p2970_p13), %s2848_s15, 4294966272  ;;  %p24_p0 = scmp.ge.s32.totalorder %s3424_s10, 10   ;;  %s4133_s11 = smov %s3227_s12 }
 0x492   : > { %s4134_s12 = smov %s3231_s7  ;;  %s4135_s7 = smov %s3440_s20 }
 0x493   : > { %s4136_s13 = smov %s3424_s10  ;;  %26 = sbr.rel (!%p24_p0) target bundleno = 9 (0x9), region = 205 }
 0x498   :  { %2853 = vsyncpa [#allocation4], 1 }
 0x499   :  { %2855 = vsyncpa [#allocation4 + $0x1], 1 }
 0x49a   :  { %2856 = vsyncpa [#allocation7], 1 }
 0x49b   :  { %2857 = vsyncpa [#allocation5], 1 }
 0x49c   :  { %2859 = vsyncpa [#allocation5 + $0x1], 1 }

</bundles_post_ra>
